<compile_context>
chip_gen: v7x
topology: tpu7x:2x2x1
jax: 0.10.0
libtpu: 0.0.40
codegen_flags: <defaults>
</compile_context>

<pallas_src>
import itertools
import numpy as np
import jax
import jax.numpy as jnp
from jax import lax
from jax.experimental import pallas as pl
from jax.experimental.pallas import tpu as pltpu

# ---------------- module hyper-parameters (Transformer_levit defaults) -------
DIM_HEAD = 32
HEADS = 4
ATN_RATIO = 2
MLP_RATIO = 2

KEY_DIM = DIM_HEAD                 # 32
V_DIM = KEY_DIM * ATN_RATIO        # 64
NH_KQ = KEY_DIM * HEADS            # 128
NH_V = V_DIM * HEADS               # 256
DIM_QKV = 2 * NH_KQ + NH_V         # 512
SCALE = KEY_DIM ** (-0.5)
BN_EPS = 1e-5
NEG_INF = -1e30                    # cross-batch mask value (exp -> exactly 0)


# ---------------- parameter helpers ------------------------------------------
def _fold_bn(w, gamma, beta, mean, var, eps=BN_EPS):
    """Fold inference-mode BatchNorm1d into a bias-free Linear.

    w: (in, out) so that y = x @ w.  Returns (w_eff, b_eff[1, out])."""
    s = gamma / jnp.sqrt(var + eps)
    return w * s[None, :], (beta - mean * s)[None, :]


def _make_linear_bn(key, a, b):
    """Deterministic synthetic init of Linear_BN(a, b), folded for inference."""
    k_w, k_g, k_b, k_m, k_v = jax.random.split(key, 5)
    w = jax.random.normal(k_w, (a, b), jnp.float32) / np.sqrt(a)
    gamma = 0.5 + jax.random.uniform(k_g, (b,), jnp.float32)
    beta = 0.1 * jax.random.normal(k_b, (b,), jnp.float32)
    mean = 0.1 * jax.random.normal(k_m, (b,), jnp.float32)
    var = 0.5 + jax.random.uniform(k_v, (b,), jnp.float32)
    return _fold_bn(w, gamma, beta, mean, var)


def _make_attention_bias(key, crop_size, heads):
    """Replicates attention_bias_idxs and gathers biases into (heads, N, N)."""
    points = list(itertools.product(range(crop_size), range(crop_size)))
    N = len(points)
    attention_offsets = {}
    idxs = []
    for p1 in points:
        for p2 in points:
            offset = (abs(p1[0] - p2[0]), abs(p1[1] - p2[1]))
            if offset not in attention_offsets:
                attention_offsets[offset] = len(attention_offsets)
            idxs.append(attention_offsets[offset])
    idxs = np.asarray(idxs, dtype=np.int32).reshape(N, N)
    biases = 0.1 * jax.random.normal(
        key, (heads, len(attention_offsets)), jnp.float32)
    return biases[:, idxs]                                        # (heads, N, N)


def init_params(key, dim_in, crop_size):
    """Natural (in, out) folded parameters, as the reference consumes them."""
    k_qkv, k_bias, k_proj, k_f1, k_f2 = jax.random.split(key, 5)
    w_qkv, b_qkv = _make_linear_bn(k_qkv, dim_in, DIM_QKV)
    abias = _make_attention_bias(k_bias, crop_size, HEADS)
    w_proj, b_proj = _make_linear_bn(k_proj, NH_V, dim_in)
    w_f1, b_f1 = _make_linear_bn(k_f1, dim_in, dim_in * MLP_RATIO)
    w_f2, b_f2 = _make_linear_bn(k_f2, dim_in * MLP_RATIO, dim_in)
    return (w_qkv, b_qkv, abias, w_proj, b_proj, w_f1, b_f1, w_f2, b_f2)


def prep_kernel_params(params):
    """One-time prep: fused/stacked channel-major weights, scale folded into Q,
    attention bias pre-transposed to key-major (it is symmetric anyway)."""
    wqkv, bqkv, abias, wproj, bproj, w1, b1, w2, b2 = params
    C = wqkv.shape[0]
    per_head = 2 * KEY_DIM + V_DIM                                 # 128
    w = wqkv.reshape(C, HEADS, per_head)                           # (C, H, 128)
    bvec = bqkv.reshape(HEADS, per_head)                           # (H, 128)

    # Stacked row order: [all heads' q | all heads' k | all heads' v]
    wq = jnp.transpose(w[:, :, :KEY_DIM], (1, 2, 0)).reshape(NH_KQ, C) * SCALE
    wk = jnp.transpose(w[:, :, KEY_DIM:2 * KEY_DIM], (1, 2, 0)).reshape(NH_KQ, C)
    wv = jnp.transpose(w[:, :, 2 * KEY_DIM:], (1, 2, 0)).reshape(NH_V, C)
    w_all = jnp.concatenate([wq, wk, wv], axis=0)                  # (512, C)

    bq = (bvec[:, :KEY_DIM] * SCALE).reshape(NH_KQ, 1)
    bk = bvec[:, KEY_DIM:2 * KEY_DIM].reshape(NH_KQ, 1)
    bv = bvec[:, 2 * KEY_DIM:].reshape(NH_V, 1)
    b_all = jnp.concatenate([bq, bk, bv], axis=0)                  # (512, 1)

    abias_t = jnp.transpose(abias, (0, 2, 1))                      # (H, m, n)
    wp = wproj.T                                                   # (C, 256)
    bp = bproj.reshape(-1, 1)                                      # (C, 1)
    w1t = w1.T                                                     # (2C, C)
    b1t = b1.reshape(-1, 1)                                        # (2C, 1)
    w2t = w2.T                                                     # (C, 2C)
    b2t = b2.reshape(-1, 1)                                        # (C, 1)
    return (w_all, b_all, abias_t, wp, bp, w1t, b1t, w2t, b2t)


def _block_diag_bias(abias_t, bb):
    """(H, N, N) key-major bias -> (H, bb*N, bb*N) block-diagonal bias with a
    large negative value off the diagonal blocks, so the lane-fused softmax
    never mixes positions that belong to different batch elements."""
    Hh, N, _ = abias_t.shape
    if bb == 1:
        return abias_t
    L = bb * N
    eye = jnp.eye(bb, dtype=abias_t.dtype)
    blk = jnp.einsum('ij,hmn->himjn', eye, abias_t).reshape(Hh, L, L)
    on = jnp.einsum('ij,mn->imjn', eye,
                    jnp.ones((N, N), abias_t.dtype)).reshape(L, L)
    return blk + (1.0 - on)[None] * NEG_INF


# ---------------- the Pallas kernel -------------------------------------------
def _levit_kernel(x_ref, wqkv_ref, bqkv_ref, abias_ref, wproj_ref, bproj_ref,
                  w1_ref, b1_ref, w2_ref, b2_ref, o_ref):
    """x_ref block: (1, C, L) channel-major with L = bb*N lanes."""
    f32 = jnp.float32
    x = x_ref[0]                                                   # (C, L)

    # ---- fused QKV projection: one (512,C)x(C,L) MXU op; scale is in Q -------
    qkv = jnp.dot(wqkv_ref[...], x, preferred_element_type=f32) + bqkv_ref[...]
    qT_all = qkv[:NH_KQ]                                           # (128, L)
    kT_all = qkv[NH_KQ:2 * NH_KQ]                                  # (128, L)
    vT_all = qkv[2 * NH_KQ:]                                       # (256, L)

    ctx_parts = []
    for h in range(HEADS):                        # short static unroll (4)
        qT = qT_all[h * KEY_DIM:(h + 1) * KEY_DIM]                 # (32, L)
        kT = kT_all[h * KEY_DIM:(h + 1) * KEY_DIM]                 # (32, L)
        vT = vT_all[h * V_DIM:(h + 1) * V_DIM]                     # (64, L)

        # sT[m, n] = k[m].q[n] + bias[m, n]; scores kept transposed so the
        # context matmul below is a plain (1,)x(0,) MXU contraction.
        sT = lax.dot_general(kT, qT, (((0,), (0,)), ((), ())),
                             preferred_element_type=f32) + abias_ref[h]
        sT = sT - jnp.max(sT, axis=0, keepdims=True)
        p = jnp.exp(sT)
        p = p * pl.reciprocal(jnp.sum(p, axis=0, keepdims=True), approx=True)

        ctxT = jnp.dot(vT, p, preferred_element_type=f32)          # (64, L)
        ctx_parts.append(jnp.clip(ctxT, -1.0, 1.0))                # Hardtanh

    # ---- fused output projection: single (C,256)x(256,L) MXU op --------------
    ctx_all = jnp.concatenate(ctx_parts, axis=0)                   # (256, L)
    x1 = x + jnp.dot(wproj_ref[...], ctx_all,
                     preferred_element_type=f32) + bproj_ref[...]  # residual

    # ---- ffnet: x1 + Linear_BN(C->2C) -> Hardtanh -> Linear_BN(2C->C) --------
    hdn = jnp.dot(w1_ref[...], x1, preferred_element_type=f32) + b1_ref[...]
    hdn = jnp.clip(hdn, -1.0, 1.0)
    ff = jnp.dot(w2_ref[...], hdn, preferred_element_type=f32) + b2_ref[...]
    o_ref[0] = x1 + ff


# ---------------- wrapper ------------------------------------------------------
def _num_tensorcores():
    """Robust TensorCore-count query (no device-kind string sniffing)."""
    try:
        info = pltpu.get_tpu_info()
        for attr in ("num_cores", "core_count", "num_tensorcores",
                     "tensorcore_count", "num_tensor_cores"):
            v = getattr(info, attr, None)
            if isinstance(v, (int, np.integer)) and int(v) > 0:
                return int(v)
    except Exception:
        pass
    try:
        v = getattr(jax.devices()[0], "num_cores", None)
        if isinstance(v, (int, np.integer)) and int(v) > 0:
            return int(v)
    except Exception:
        pass
    return 1


def _choose_batch_block(B, N, n_cores):
    """How many batch elements to fuse onto the lane axis per grid step:
    target a 128-wide lane axis, but keep >= 1 grid step per TensorCore when
    the batch size allows it (both choices are numerically correct)."""
    def largest_divisor_le(n, k):
        for c in range(max(1, min(n, k)), 0, -1):
            if n % c == 0:
                return c
        return 1

    target = max(1, min(B, 128 // N)) if N < 128 else 1
    bb = largest_divisor_le(B, target)
    if n_cores > 1:
        want_steps = min(n_cores, B)
        while bb > 1 and (B // bb) < want_steps:
            bb = largest_divisor_le(B, bb - 1)
    # TODO(synk): for B == 1 on multi-TensorCore chips (v7x) the grid has a
    # single step and one core idles; a head-split across cores would need a
    # shared combine for proj+FFN and is not implemented here.
    return bb


def transformer_levit(x, kparams):
    """x: (B, C, H, W) float32 -> (B, C, H, W) float32."""
    B, C, H, W = x.shape
    N = H * W
    (w_all, b_all, abias_t, wp, bp, w1t, b1t, w2t, b2t) = kparams

    bb = _choose_batch_block(B, N, _num_tensorcores())
    G = B // bb
    L = bb * N

    # Channel-major, lane-fused layout (G, C, bb*N): one tiny (<=8 KiB) shuffle.
    xg = (x.reshape(G, bb, C, N)
           .transpose(0, 2, 1, 3)
           .reshape(G, C, L))
    abias_blk = _block_diag_bias(abias_t, bb)                      # (H, L, L)

    def _full_spec(arr):
        if arr.ndim == 2:
            return pl.BlockSpec(arr.shape, lambda g: (0, 0))
        return pl.BlockSpec(arr.shape, lambda g: (0, 0, 0))

    weights = (w_all, b_all, abias_blk, wp, bp, w1t, b1t, w2t, b2t)

    out = pl.pallas_call(
        _levit_kernel,
        grid=(G,),
        in_specs=[pl.BlockSpec((1, C, L), lambda g: (g, 0, 0))] +
                 [_full_spec(a) for a in weights],
        out_specs=pl.BlockSpec((1, C, L), lambda g: (g, 0, 0)),
        out_shape=jax.ShapeDtypeStruct((G, C, L), jnp.float32),
        compiler_params=pltpu.CompilerParams(dimension_semantics=("parallel",)),
    )(xg, *weights)

    return (out.reshape(G, C, bb, N)
               .transpose(0, 2, 1, 3)
               .reshape(B, C, H, W))


transformer_levit = jax.jit(transformer_levit)


# ---------------- pure-JAX reference (for a sanity check) ---------------------
def transformer_levit_ref(x, params):
    B, C, H, W = x.shape
    N = H * W
    wqkv, bqkv, abias, wproj, bproj, w1, b1, w2, b2 = params
    x_in = jnp.transpose(x.reshape(B, C, N), (0, 2, 1))            # (B, N, C)
    qkv = x_in @ wqkv + bqkv[0]                                    # (B, N, 512)
    qkv = qkv.reshape(B, N, HEADS, -1)
    q, k, v = jnp.split(qkv, [KEY_DIM, 2 * KEY_DIM], axis=3)
    q = jnp.transpose(q, (0, 2, 1, 3))
    k = jnp.transpose(k, (0, 2, 1, 3))
    v = jnp.transpose(v, (0, 2, 1, 3))
    attn = jnp.einsum('bhnd,bhmd->bhnm', q, k) * SCALE + abias[None]
    attn = jax.nn.softmax(attn, axis=-1)
    o = jnp.einsum('bhnm,bhmd->bhnd', attn, v)
    o = jnp.transpose(o, (0, 2, 1, 3)).reshape(B, N, NH_V)
    o = jnp.clip(o, -1.0, 1.0) @ wproj + bproj[0]
    x1 = x_in + o
    h1 = jnp.clip(x1 @ w1 + b1[0], -1.0, 1.0)
    x2 = x1 + (h1 @ w2 + b2[0])
    return jnp.transpose(x2, (0, 2, 1)).reshape(B, C, H, W)


# ---------------- main ---------------------------------------------------------
if __name__ == "__main__":
    B, C = 2, 16
    CROP = 8                      # H = W = Crop_size, so N = 64 (and B*N = 128)
    H = W = CROP

    key = jax.random.PRNGKey(0)
    k_x, k_p = jax.random.split(key)
    x = jax.random.normal(k_x, (B, C, H, W), jnp.float32)
    params = init_params(k_p, C, CROP)
    kparams = prep_kernel_params(params)

    out = jax.block_until_ready(transformer_levit(x, kparams))
    ref = jax.block_until_ready(transformer_levit_ref(x, params))
    assert out.shape == (B, C, H, W)
    np.testing.assert_allclose(np.asarray(out), np.asarray(ref),
                               rtol=2e-2, atol=2e-2)

    print("KERNEL_OK")
</pallas_src>

<mosaic_0001>
module attributes {stable_mosaic.version = 11 : i64} {
  func.func @_levit_kernel(%arg0: i32, %arg1: memref<1x16x128xf32, #tpu.memory_space<vmem>>, %arg2: memref<512x16xf32, #tpu.memory_space<vmem>>, %arg3: memref<512x1xf32, #tpu.memory_space<vmem>>, %arg4: memref<4x128x128xf32, #tpu.memory_space<vmem>>, %arg5: memref<16x256xf32, #tpu.memory_space<vmem>>, %arg6: memref<16x1xf32, #tpu.memory_space<vmem>>, %arg7: memref<32x16xf32, #tpu.memory_space<vmem>>, %arg8: memref<32x1xf32, #tpu.memory_space<vmem>>, %arg9: memref<16x32xf32, #tpu.memory_space<vmem>>, %arg10: memref<16x1xf32, #tpu.memory_space<vmem>>, %arg11: memref<1x16x128xf32, #tpu.memory_space<vmem>>) attributes {dimension_semantics = [#tpu.dimension_semantics<parallel>], iteration_bounds = array<i64: 1>, scalar_prefetch = 0 : i64, scratch_operands = 0 : i64, tpu.core_type = #tpu.core_type<tc>, window_params = [{transform_indices = @transform_0, window_bounds = array<i64: 1, 16, 128>}, {pipeline_mode = #tpu.pipeline_mode<synchronous>, transform_indices = @transform_1, window_bounds = array<i64: 512, 16>}, {pipeline_mode = #tpu.pipeline_mode<synchronous>, transform_indices = @transform_2, window_bounds = array<i64: 512, 1>}, {pipeline_mode = #tpu.pipeline_mode<synchronous>, transform_indices = @transform_3, window_bounds = array<i64: 4, 128, 128>}, {pipeline_mode = #tpu.pipeline_mode<synchronous>, transform_indices = @transform_4, window_bounds = array<i64: 16, 256>}, {pipeline_mode = #tpu.pipeline_mode<synchronous>, transform_indices = @transform_5, window_bounds = array<i64: 16, 1>}, {pipeline_mode = #tpu.pipeline_mode<synchronous>, transform_indices = @transform_6, window_bounds = array<i64: 32, 16>}, {pipeline_mode = #tpu.pipeline_mode<synchronous>, transform_indices = @transform_7, window_bounds = array<i64: 32, 1>}, {pipeline_mode = #tpu.pipeline_mode<synchronous>, transform_indices = @transform_8, window_bounds = array<i64: 16, 32>}, {pipeline_mode = #tpu.pipeline_mode<synchronous>, transform_indices = @transform_9, window_bounds = array<i64: 16, 1>}, {transform_indices = @transform_10, window_bounds = array<i64: 1, 16, 128>}]} {
    %c0 = arith.constant 0 : index
    %c0_0 = arith.constant 0 : index
    %c0_1 = arith.constant 0 : index
    %0 = vector.load %arg1[%c0, %c0_0, %c0_1] : memref<1x16x128xf32, #tpu.memory_space<vmem>>, vector<1x16x128xf32>
    %1 = vector.shape_cast %0 : vector<1x16x128xf32> to vector<16x128xf32>
    %c0_2 = arith.constant 0 : index
    %c0_3 = arith.constant 0 : index
    %2 = vector.load %arg2[%c0_2, %c0_3] : memref<512x16xf32, #tpu.memory_space<vmem>>, vector<512x16xf32>
    %cst = arith.constant dense<0.000000e+00> : vector<512x128xf32>
    %3 = tpu.matmul %2, %1, %cst {dimension_numbers = #tpu.dot_dimension_numbers<[1], [0], [0], [1], [0, 0, 1, 1], [], []>} : vector<512x16xf32>, vector<16x128xf32>, vector<512x128xf32> -> vector<512x128xf32>
    %c0_4 = arith.constant 0 : index
    %c0_5 = arith.constant 0 : index
    %4 = vector.load %arg3[%c0_4, %c0_5] : memref<512x1xf32, #tpu.memory_space<vmem>>, vector<512x1xf32>
    %5 = vector.broadcast %4 : vector<512x1xf32> to vector<512x128xf32>
    %6 = arith.addf %3, %5 : vector<512x128xf32>
    %7 = vector.extract_strided_slice %6 {offsets = [0, 0], sizes = [128, 128], strides = [1, 1]} : vector<512x128xf32> to vector<128x128xf32>
    %8 = vector.extract_strided_slice %6 {offsets = [128, 0], sizes = [128, 128], strides = [1, 1]} : vector<512x128xf32> to vector<128x128xf32>
    %9 = vector.extract_strided_slice %6 {offsets = [256, 0], sizes = [256, 128], strides = [1, 1]} : vector<512x128xf32> to vector<256x128xf32>
    %10 = vector.extract_strided_slice %7 {offsets = [0, 0], sizes = [32, 128], strides = [1, 1]} : vector<128x128xf32> to vector<32x128xf32>
    %11 = vector.extract_strided_slice %8 {offsets = [0, 0], sizes = [32, 128], strides = [1, 1]} : vector<128x128xf32> to vector<32x128xf32>
    %12 = vector.extract_strided_slice %9 {offsets = [0, 0], sizes = [64, 128], strides = [1, 1]} : vector<256x128xf32> to vector<64x128xf32>
    %cst_6 = arith.constant dense<0.000000e+00> : vector<128x128xf32>
    %13 = tpu.matmul %11, %10, %cst_6 {dimension_numbers = #tpu.dot_dimension_numbers<[0], [0], [1], [1], [0, 1, 1, 1], [], []>} : vector<32x128xf32>, vector<32x128xf32>, vector<128x128xf32> -> vector<128x128xf32>
    %c0_7 = arith.constant 0 : index
    %c0_8 = arith.constant 0 : index
    %c0_9 = arith.constant 0 : index
    %14 = vector.load %arg4[%c0_7, %c0_8, %c0_9] : memref<4x128x128xf32, #tpu.memory_space<vmem>>, vector<1x128x128xf32>
    %15 = vector.shape_cast %14 : vector<1x128x128xf32> to vector<128x128xf32>
    %16 = arith.addf %13, %15 : vector<128x128xf32>
    %cst_10 = arith.constant dense<0xFF800000> : vector<128xf32>
    %17 = vector.multi_reduction <maximumf>, %16, %cst_10 [0] : vector<128x128xf32> to vector<128xf32>
    %18 = vector.shape_cast %17 : vector<128xf32> to vector<1x128xf32>
    %19 = vector.broadcast %18 : vector<1x128xf32> to vector<128x128xf32>
    %20 = arith.subf %16, %19 : vector<128x128xf32>
    %21 = math.exp %20 : vector<128x128xf32>
    %cst_11 = arith.constant dense<0.000000e+00> : vector<128xf32>
    %22 = vector.multi_reduction <add>, %21, %cst_11 [0] : vector<128x128xf32> to vector<128xf32>
    %23 = vector.shape_cast %22 : vector<128xf32> to vector<1x128xf32>
    %24 = tpu.reciprocal %23 {approx = true} : vector<1x128xf32> -> vector<1x128xf32>
    %25 = vector.broadcast %24 : vector<1x128xf32> to vector<128x128xf32>
    %26 = arith.mulf %21, %25 : vector<128x128xf32>
    %cst_12 = arith.constant dense<0.000000e+00> : vector<64x128xf32>
    %27 = tpu.matmul %12, %26, %cst_12 {dimension_numbers = #tpu.dot_dimension_numbers<[1], [0], [0], [1], [0, 0, 1, 1], [], []>} : vector<64x128xf32>, vector<128x128xf32>, vector<64x128xf32> -> vector<64x128xf32>
    %cst_13 = arith.constant -1.000000e+00 : f32
    %cst_14 = arith.constant 1.000000e+00 : f32
    %28 = vector.broadcast %cst_13 : f32 to vector<64x128xf32>
    %29 = arith.maximumf %28, %27 : vector<64x128xf32>
    %30 = vector.broadcast %cst_14 : f32 to vector<64x128xf32>
    %31 = arith.minimumf %30, %29 : vector<64x128xf32>
    %32 = vector.extract_strided_slice %7 {offsets = [32, 0], sizes = [32, 128], strides = [1, 1]} : vector<128x128xf32> to vector<32x128xf32>
    %33 = vector.extract_strided_slice %8 {offsets = [32, 0], sizes = [32, 128], strides = [1, 1]} : vector<128x128xf32> to vector<32x128xf32>
    %34 = vector.extract_strided_slice %9 {offsets = [64, 0], sizes = [64, 128], strides = [1, 1]} : vector<256x128xf32> to vector<64x128xf32>
    %cst_15 = arith.constant dense<0.000000e+00> : vector<128x128xf32>
    %35 = tpu.matmul %33, %32, %cst_15 {dimension_numbers = #tpu.dot_dimension_numbers<[0], [0], [1], [1], [0, 1, 1, 1], [], []>} : vector<32x128xf32>, vector<32x128xf32>, vector<128x128xf32> -> vector<128x128xf32>
    %c1 = arith.constant 1 : index
    %c0_16 = arith.constant 0 : index
    %c0_17 = arith.constant 0 : index
    %36 = vector.load %arg4[%c1, %c0_16, %c0_17] : memref<4x128x128xf32, #tpu.memory_space<vmem>>, vector<1x128x128xf32>
    %37 = vector.shape_cast %36 : vector<1x128x128xf32> to vector<128x128xf32>
    %38 = arith.addf %35, %37 : vector<128x128xf32>
    %cst_18 = arith.constant dense<0xFF800000> : vector<128xf32>
    %39 = vector.multi_reduction <maximumf>, %38, %cst_18 [0] : vector<128x128xf32> to vector<128xf32>
    %40 = vector.shape_cast %39 : vector<128xf32> to vector<1x128xf32>
    %41 = vector.broadcast %40 : vector<1x128xf32> to vector<128x128xf32>
    %42 = arith.subf %38, %41 : vector<128x128xf32>
    %43 = math.exp %42 : vector<128x128xf32>
    %cst_19 = arith.constant dense<0.000000e+00> : vector<128xf32>
    %44 = vector.multi_reduction <add>, %43, %cst_19 [0] : vector<128x128xf32> to vector<128xf32>
    %45 = vector.shape_cast %44 : vector<128xf32> to vector<1x128xf32>
    %46 = tpu.reciprocal %45 {approx = true} : vector<1x128xf32> -> vector<1x128xf32>
    %47 = vector.broadcast %46 : vector<1x128xf32> to vector<128x128xf32>
    %48 = arith.mulf %43, %47 : vector<128x128xf32>
    %cst_20 = arith.constant dense<0.000000e+00> : vector<64x128xf32>
    %49 = tpu.matmul %34, %48, %cst_20 {dimension_numbers = #tpu.dot_dimension_numbers<[1], [0], [0], [1], [0, 0, 1, 1], [], []>} : vector<64x128xf32>, vector<128x128xf32>, vector<64x128xf32> -> vector<64x128xf32>
    %cst_21 = arith.constant -1.000000e+00 : f32
    %cst_22 = arith.constant 1.000000e+00 : f32
    %50 = vector.broadcast %cst_21 : f32 to vector<64x128xf32>
    %51 = arith.maximumf %50, %49 : vector<64x128xf32>
    %52 = vector.broadcast %cst_22 : f32 to vector<64x128xf32>
    %53 = arith.minimumf %52, %51 : vector<64x128xf32>
    %54 = vector.extract_strided_slice %7 {offsets = [64, 0], sizes = [32, 128], strides = [1, 1]} : vector<128x128xf32> to vector<32x128xf32>
    %55 = vector.extract_strided_slice %8 {offsets = [64, 0], sizes = [32, 128], strides = [1, 1]} : vector<128x128xf32> to vector<32x128xf32>
    %56 = vector.extract_strided_slice %9 {offsets = [128, 0], sizes = [64, 128], strides = [1, 1]} : vector<256x128xf32> to vector<64x128xf32>
    %cst_23 = arith.constant dense<0.000000e+00> : vector<128x128xf32>
    %57 = tpu.matmul %55, %54, %cst_23 {dimension_numbers = #tpu.dot_dimension_numbers<[0], [0], [1], [1], [0, 1, 1, 1], [], []>} : vector<32x128xf32>, vector<32x128xf32>, vector<128x128xf32> -> vector<128x128xf32>
    %c2 = arith.constant 2 : index
    %c0_24 = arith.constant 0 : index
    %c0_25 = arith.constant 0 : index
    %58 = vector.load %arg4[%c2, %c0_24, %c0_25] : memref<4x128x128xf32, #tpu.memory_space<vmem>>, vector<1x128x128xf32>
    %59 = vector.shape_cast %58 : vector<1x128x128xf32> to vector<128x128xf32>
    %60 = arith.addf %57, %59 : vector<128x128xf32>
    %cst_26 = arith.constant dense<0xFF800000> : vector<128xf32>
    %61 = vector.multi_reduction <maximumf>, %60, %cst_26 [0] : vector<128x128xf32> to vector<128xf32>
    %62 = vector.shape_cast %61 : vector<128xf32> to vector<1x128xf32>
    %63 = vector.broadcast %62 : vector<1x128xf32> to vector<128x128xf32>
    %64 = arith.subf %60, %63 : vector<128x128xf32>
    %65 = math.exp %64 : vector<128x128xf32>
    %cst_27 = arith.constant dense<0.000000e+00> : vector<128xf32>
    %66 = vector.multi_reduction <add>, %65, %cst_27 [0] : vector<128x128xf32> to vector<128xf32>
    %67 = vector.shape_cast %66 : vector<128xf32> to vector<1x128xf32>
    %68 = tpu.reciprocal %67 {approx = true} : vector<1x128xf32> -> vector<1x128xf32>
    %69 = vector.broadcast %68 : vector<1x128xf32> to vector<128x128xf32>
    %70 = arith.mulf %65, %69 : vector<128x128xf32>
    %cst_28 = arith.constant dense<0.000000e+00> : vector<64x128xf32>
    %71 = tpu.matmul %56, %70, %cst_28 {dimension_numbers = #tpu.dot_dimension_numbers<[1], [0], [0], [1], [0, 0, 1, 1], [], []>} : vector<64x128xf32>, vector<128x128xf32>, vector<64x128xf32> -> vector<64x128xf32>
    %cst_29 = arith.constant -1.000000e+00 : f32
    %cst_30 = arith.constant 1.000000e+00 : f32
    %72 = vector.broadcast %cst_29 : f32 to vector<64x128xf32>
    %73 = arith.maximumf %72, %71 : vector<64x128xf32>
    %74 = vector.broadcast %cst_30 : f32 to vector<64x128xf32>
    %75 = arith.minimumf %74, %73 : vector<64x128xf32>
    %76 = vector.extract_strided_slice %7 {offsets = [96, 0], sizes = [32, 128], strides = [1, 1]} : vector<128x128xf32> to vector<32x128xf32>
    %77 = vector.extract_strided_slice %8 {offsets = [96, 0], sizes = [32, 128], strides = [1, 1]} : vector<128x128xf32> to vector<32x128xf32>
    %78 = vector.extract_strided_slice %9 {offsets = [192, 0], sizes = [64, 128], strides = [1, 1]} : vector<256x128xf32> to vector<64x128xf32>
    %cst_31 = arith.constant dense<0.000000e+00> : vector<128x128xf32>
    %79 = tpu.matmul %77, %76, %cst_31 {dimension_numbers = #tpu.dot_dimension_numbers<[0], [0], [1], [1], [0, 1, 1, 1], [], []>} : vector<32x128xf32>, vector<32x128xf32>, vector<128x128xf32> -> vector<128x128xf32>
    %c3 = arith.constant 3 : index
    %c0_32 = arith.constant 0 : index
    %c0_33 = arith.constant 0 : index
    %80 = vector.load %arg4[%c3, %c0_32, %c0_33] : memref<4x128x128xf32, #tpu.memory_space<vmem>>, vector<1x128x128xf32>
    %81 = vector.shape_cast %80 : vector<1x128x128xf32> to vector<128x128xf32>
    %82 = arith.addf %79, %81 : vector<128x128xf32>
    %cst_34 = arith.constant dense<0xFF800000> : vector<128xf32>
    %83 = vector.multi_reduction <maximumf>, %82, %cst_34 [0] : vector<128x128xf32> to vector<128xf32>
    %84 = vector.shape_cast %83 : vector<128xf32> to vector<1x128xf32>
    %85 = vector.broadcast %84 : vector<1x128xf32> to vector<128x128xf32>
    %86 = arith.subf %82, %85 : vector<128x128xf32>
    %87 = math.exp %86 : vector<128x128xf32>
    %cst_35 = arith.constant dense<0.000000e+00> : vector<128xf32>
    %88 = vector.multi_reduction <add>, %87, %cst_35 [0] : vector<128x128xf32> to vector<128xf32>
    %89 = vector.shape_cast %88 : vector<128xf32> to vector<1x128xf32>
    %90 = tpu.reciprocal %89 {approx = true} : vector<1x128xf32> -> vector<1x128xf32>
    %91 = vector.broadcast %90 : vector<1x128xf32> to vector<128x128xf32>
    %92 = arith.mulf %87, %91 : vector<128x128xf32>
    %cst_36 = arith.constant dense<0.000000e+00> : vector<64x128xf32>
    %93 = tpu.matmul %78, %92, %cst_36 {dimension_numbers = #tpu.dot_dimension_numbers<[1], [0], [0], [1], [0, 0, 1, 1], [], []>} : vector<64x128xf32>, vector<128x128xf32>, vector<64x128xf32> -> vector<64x128xf32>
    %cst_37 = arith.constant -1.000000e+00 : f32
    %cst_38 = arith.constant 1.000000e+00 : f32
    %94 = vector.broadcast %cst_37 : f32 to vector<64x128xf32>
    %95 = arith.maximumf %94, %93 : vector<64x128xf32>
    %96 = vector.broadcast %cst_38 : f32 to vector<64x128xf32>
    %97 = arith.minimumf %96, %95 : vector<64x128xf32>
    %98 = tpu.concatenate %31, %53, %75, %97 in 0 : vector<64x128xf32>, vector<64x128xf32>, vector<64x128xf32>, vector<64x128xf32> -> vector<256x128xf32>
    %c0_39 = arith.constant 0 : index
    %c0_40 = arith.constant 0 : index
    %99 = vector.load %arg5[%c0_39, %c0_40] : memref<16x256xf32, #tpu.memory_space<vmem>>, vector<16x256xf32>
    %cst_41 = arith.constant dense<0.000000e+00> : vector<16x128xf32>
    %100 = tpu.matmul %99, %98, %cst_41 {dimension_numbers = #tpu.dot_dimension_numbers<[1], [0], [0], [1], [0, 0, 1, 1], [], []>} : vector<16x256xf32>, vector<256x128xf32>, vector<16x128xf32> -> vector<16x128xf32>
    %101 = arith.addf %1, %100 : vector<16x128xf32>
    %c0_42 = arith.constant 0 : index
    %c0_43 = arith.constant 0 : index
    %102 = vector.load %arg6[%c0_42, %c0_43] : memref<16x1xf32, #tpu.memory_space<vmem>>, vector<16x1xf32>
    %103 = vector.broadcast %102 : vector<16x1xf32> to vector<16x128xf32>
    %104 = arith.addf %101, %103 : vector<16x128xf32>
    %c0_44 = arith.constant 0 : index
    %c0_45 = arith.constant 0 : index
    %105 = vector.load %arg7[%c0_44, %c0_45] : memref<32x16xf32, #tpu.memory_space<vmem>>, vector<32x16xf32>
    %cst_46 = arith.constant dense<0.000000e+00> : vector<32x128xf32>
    %106 = tpu.matmul %105, %104, %cst_46 {dimension_numbers = #tpu.dot_dimension_numbers<[1], [0], [0], [1], [0, 0, 1, 1], [], []>} : vector<32x16xf32>, vector<16x128xf32>, vector<32x128xf32> -> vector<32x128xf32>
    %c0_47 = arith.constant 0 : index
    %c0_48 = arith.constant 0 : index
    %107 = vector.load %arg8[%c0_47, %c0_48] : memref<32x1xf32, #tpu.memory_space<vmem>>, vector<32x1xf32>
    %108 = vector.broadcast %107 : vector<32x1xf32> to vector<32x128xf32>
    %109 = arith.addf %106, %108 : vector<32x128xf32>
    %cst_49 = arith.constant -1.000000e+00 : f32
    %cst_50 = arith.constant 1.000000e+00 : f32
    %110 = vector.broadcast %cst_49 : f32 to vector<32x128xf32>
    %111 = arith.maximumf %110, %109 : vector<32x128xf32>
    %112 = vector.broadcast %cst_50 : f32 to vector<32x128xf32>
    %113 = arith.minimumf %112, %111 : vector<32x128xf32>
    %c0_51 = arith.constant 0 : index
    %c0_52 = arith.constant 0 : index
    %114 = vector.load %arg9[%c0_51, %c0_52] : memref<16x32xf32, #tpu.memory_space<vmem>>, vector<16x32xf32>
    %cst_53 = arith.constant dense<0.000000e+00> : vector<16x128xf32>
    %115 = tpu.matmul %114, %113, %cst_53 {dimension_numbers = #tpu.dot_dimension_numbers<[1], [0], [0], [1], [0, 0, 1, 1], [], []>} : vector<16x32xf32>, vector<32x128xf32>, vector<16x128xf32> -> vector<16x128xf32>
    %c0_54 = arith.constant 0 : index
    %c0_55 = arith.constant 0 : index
    %116 = vector.load %arg10[%c0_54, %c0_55] : memref<16x1xf32, #tpu.memory_space<vmem>>, vector<16x1xf32>
    %117 = vector.broadcast %116 : vector<16x1xf32> to vector<16x128xf32>
    %118 = arith.addf %115, %117 : vector<16x128xf32>
    %119 = arith.addf %104, %118 : vector<16x128xf32>
    %c0_56 = arith.constant 0 : index
    %c0_57 = arith.constant 0 : index
    %c0_58 = arith.constant 0 : index
    %120 = vector.load %arg11[%c0_56, %c0_57, %c0_58] : memref<1x16x128xf32, #tpu.memory_space<vmem>>, vector<1x16x128xf32>
    %121 = vector.shape_cast %120 : vector<1x16x128xf32> to vector<16x128xf32>
    %122 = vector.shape_cast %119 : vector<16x128xf32> to vector<1x16x128xf32>
    tpu.vector_store %arg11[%c0_56, %c0_57, %c0_58], %122 {strides = array<i32>} : memref<1x16x128xf32, #tpu.memory_space<vmem>>, vector<1x16x128xf32>,
    return
  }
  func.func @transform_0(%arg0: i32) -> (i32, i32, i32) {
    %c0_i32 = arith.constant 0 : i32
    %c0_i32_0 = arith.constant 0 : i32
    %c0_i32_1 = arith.constant 0 : i32
    return %arg0, %c0_i32, %c0_i32_0 : i32, i32, i32
  }
  func.func @transform_1(%arg0: i32) -> (i32, i32) {
    %c0_i32 = arith.constant 0 : i32
    %c0_i32_0 = arith.constant 0 : i32
    %c0_i32_1 = arith.constant 0 : i32
    return %c0_i32, %c0_i32_0 : i32, i32
  }
  func.func @transform_2(%arg0: i32) -> (i32, i32) {
    %c0_i32 = arith.constant 0 : i32
    %c0_i32_0 = arith.constant 0 : i32
    %c0_i32_1 = arith.constant 0 : i32
    return %c0_i32, %c0_i32_0 : i32, i32
  }
  func.func @transform_3(%arg0: i32) -> (i32, i32, i32) {
    %c0_i32 = arith.constant 0 : i32
    %c0_i32_0 = arith.constant 0 : i32
    %c0_i32_1 = arith.constant 0 : i32
    %c0_i32_2 = arith.constant 0 : i32
    return %c0_i32, %c0_i32_0, %c0_i32_1 : i32, i32, i32
  }
  func.func @transform_4(%arg0: i32) -> (i32, i32) {
    %c0_i32 = arith.constant 0 : i32
    %c0_i32_0 = arith.constant 0 : i32
    %c0_i32_1 = arith.constant 0 : i32
    return %c0_i32, %c0_i32_0 : i32, i32
  }
  func.func @transform_5(%arg0: i32) -> (i32, i32) {
    %c0_i32 = arith.constant 0 : i32
    %c0_i32_0 = arith.constant 0 : i32
    %c0_i32_1 = arith.constant 0 : i32
    return %c0_i32, %c0_i32_0 : i32, i32
  }
  func.func @transform_6(%arg0: i32) -> (i32, i32) {
    %c0_i32 = arith.constant 0 : i32
    %c0_i32_0 = arith.constant 0 : i32
    %c0_i32_1 = arith.constant 0 : i32
    return %c0_i32, %c0_i32_0 : i32, i32
  }
  func.func @transform_7(%arg0: i32) -> (i32, i32) {
    %c0_i32 = arith.constant 0 : i32
    %c0_i32_0 = arith.constant 0 : i32
    %c0_i32_1 = arith.constant 0 : i32
    return %c0_i32, %c0_i32_0 : i32, i32
  }
  func.func @transform_8(%arg0: i32) -> (i32, i32) {
    %c0_i32 = arith.constant 0 : i32
    %c0_i32_0 = arith.constant 0 : i32
    %c0_i32_1 = arith.constant 0 : i32
    return %c0_i32, %c0_i32_0 : i32, i32
  }
  func.func @transform_9(%arg0: i32) -> (i32, i32) {
    %c0_i32 = arith.constant 0 : i32
    %c0_i32_0 = arith.constant 0 : i32
    %c0_i32_1 = arith.constant 0 : i32
    return %c0_i32, %c0_i32_0 : i32, i32
  }
  func.func @transform_10(%arg0: i32) -> (i32, i32, i32) {
    %c0_i32 = arith.constant 0 : i32
    %c0_i32_0 = arith.constant 0 : i32
    %c0_i32_1 = arith.constant 0 : i32
    return %arg0, %c0_i32, %c0_i32_0 : i32, i32, i32
  }
}

</mosaic_0001>

<bundles_post_ra>
// kernel: transformer_levit.1
= control target key start
LH: loop header
LB: loop body
LE: loop exit
PB: predicated region body
PF: predicated region fallthrough
CT: control target
= control target key end

     0   :  { %vm485_vm0 = vcmask 130048   ;;  %v4559_v3 = vmov 0   ;;  %vm1111_vm1 = vcmask 261120   ;;  %s6205_s0 = inlined_call_operand.vmem [shape: f32[1,16,128], index: 0, kind: input, shape index: {}]   ;;  %s6206_s1 = inlined_call_operand.vmem [shape: f32[512,16], index: 1, kind: input, shape index: {}]   ;;  %s6207_s2 = inlined_call_operand.vmem [shape: f32[512,1], index: 2, kind: input, shape index: {}]   ;;  %s6208_s3 = inlined_call_operand.vmem [shape: f32[4,128,128], index: 3, kind: input, shape index: {}]   ;;  %s6209_s5 = inlined_call_operand.vmem [shape: f32[16,1], index: 5, kind: input, shape index: {}]   ;;  %s6210_s7 = inlined_call_operand.vmem [shape: f32[32,1], index: 7, kind: input, shape index: {}]   ;;  %s6211_s9 = inlined_call_operand.vmem [shape: f32[16,1], index: 9, kind: input, shape index: {}]   ;;  %s6212_s4 = inlined_call_operand.vmem [shape: f32[16,256], index: 4, kind: input, shape index: {}]   ;;  %s6213_s6 = inlined_call_operand.vmem [shape: f32[32,16], index: 6, kind: input, shape index: {}]   ;;  %s6214_s8 = inlined_call_operand.vmem [shape: f32[16,32], index: 8, kind: input, shape index: {}]   ;;  %s6215_s10 = inlined_call_operand.vmem [shape: f32[1,16,128], index: 10, kind: output, shape index: {}]  }
   0x1   :  { %v35_v0 = vld [vmem:[%s6205_s0] sm:$0xff]  ;;  %v36_v1 = vld [vmem:[%s6205_s0 + $0x8] sm:$0xff]  ;;  %4420 = vset.pattern.permute.xlu1 %v4559_v3  ;;  %4419 = vset.pattern.permute.xlu0 %v4559_v3  ;;  %v39_v6 = vld [vmem:[%s6206_s1 + $0x10] sm:$0xff] }
   0x2   :  { %v37_v2 = vld [vmem:[%s6206_s1] sm:$0xff]  ;;  %v4209_v4 = vpack.c.bf16 %v36_v1, %v35_v0  ;;  %v38_v5 = vld [vmem:[%s6206_s1 + $0x8] sm:$0xff]  ;;  %v119_v7 = vld [vmem:[%s6207_s2 + $0x90] sm:$0xff] }
   0x3   :  { %3788 = vmatprep.mubr.msk.f32.mxu0 %vm485_vm0, %v37_v2  ;;  %257 = vperm.xlu1 %4420, %v119_v7   ;;  %v40_v8 = vld [vmem:[%s6206_s1 + $0x18] sm:$0xff]  ;;  %v41_v10 = vld [vmem:[%s6206_s1 + $0x20] sm:$0xff]  ;;  %v42_v11 = vld [vmem:[%s6206_s1 + $0x28] sm:$0xff] }
   0x4   :  { %4210 = vmatprep.subr.bf16.mxu0 %v4209_v4  ;;  %v120_v9 = vld [vmem:[%s6207_s2 + $0x98] sm:$0xff]  ;;  %v102_v12 = vld [vmem:[%s6207_s2 + $0x8] sm:$0xff]  ;;  %v43_v13 = vld [vmem:[%s6206_s1 + $0x30] sm:$0xff] }
   0x5   :  { %4212 = vmatpush3.bf16.msra.mxu0 %v4209_v4  ;;  %v44_v14 = vld [vmem:[%s6206_s1 + $0x38] sm:$0xff]  ;;  %v45_v16 = vld [vmem:[%s6206_s1 + $0x40] sm:$0xff]  ;;  %v46_v18 = vld [vmem:[%s6206_s1 + $0x48] sm:$0xff] }
   0x6   :  { %v104_v15 = vld [vmem:[%s6207_s2 + $0x18] sm:$0xff]  ;;  %v117_v17 = vld [vmem:[%s6207_s2 + $0x80] sm:$0xff]  ;;  %v47_v20 = vld [vmem:[%s6206_s1 + $0x50] sm:$0xff] }
   0x7   :  { %262 = vperm.xlu1 %4420, %v120_v9   ;;  %v121_v19 = vld [vmem:[%s6207_s2 + $0xa0] sm:$0xff]  ;;  %247 = vperm.xlu0 %4419, %v117_v17   ;;  %v118_v21 = vld [vmem:[%s6207_s2 + $0x88] sm:$0xff]  ;;  %v48_v22 = vld [vmem:[%s6206_s1 + $0x58] sm:$0xff] }
   0x8   :  { %3789 = vmatmul.mubr.msk.f32.vlgmr.msra.gmra.mrb[0].mxu0 %vm485_vm0, %v38_v5  ;;  %v122_v23 = vld [vmem:[%s6207_s2 + $0xa8] sm:$0xff]  ;;  %v49_v24 = vld [vmem:[%s6206_s1 + $0x60] sm:$0xff]  ;;  %v123_v27 = vld [vmem:[%s6207_s2 + $0xb0] sm:$0xff] }
   0x9   :  { %3791 = vmatprep.mubr.msk.f32.mxu0 %vm485_vm0, %v39_v6  ;;  %v101_v25 = vld [vmem:[%s6207_s2] sm:$0xff]  ;;  %v50_v26 = vld [vmem:[%s6206_s1 + $0x68] sm:$0xff]  ;;  %v51_v28 = vld [vmem:[%s6206_s1 + $0x70] sm:$0xff] }
   0xa   :  { %v103_v29 = vld [vmem:[%s6207_s2 + $0x10] sm:$0xff]  ;;  %v52_v30 = vld [vmem:[%s6206_s1 + $0x78] sm:$0xff]  ;;  %v53_v32 = vld [vmem:[%s6206_s1 + $0x80] sm:$0xff] }
   0xb   :  { %172 = vperm.xlu1 %4420, %v102_v12   ;;  %252 = vperm.xlu0 %4419, %v118_v21   ;;  %v124_v31 = vld [vmem:[%s6207_s2 + $0xb8] sm:$0xff]  ;;  %v54_v33 = vld [vmem:[%s6206_s1 + $0x88] sm:$0xff]  ;;  %v133_v34 = vld [vmem:[%s6207_s2 + $0x100] sm:$0xff] }
   0xc   :  { %3792 = vmatmul.mubr.msk.f32.gmra.mrb[2].mxu0 %vm485_vm0, %v40_v8  ;;  %v55_v35 = vld [vmem:[%s6206_s1 + $0x90] sm:$0xff]  ;;  %v56_v36 = vld [vmem:[%s6206_s1 + $0x98] sm:$0xff]  ;;  %v134_v37 = vld [vmem:[%s6207_s2 + $0x108] sm:$0xff] }
   0xd   :  { %3794 = vmatprep.mubr.msk.f32.mxu0 %vm485_vm0, %v41_v10  ;;  %v57_v38 = vld [vmem:[%s6206_s1 + $0xa0] sm:$0xff]  ;;  %v58_v39 = vld [vmem:[%s6206_s1 + $0xa8] sm:$0xff]  ;;  %v135_v40 = vld [vmem:[%s6207_s2 + $0x110] sm:$0xff] }
   0xe   :  { %v59_v41 = vld [vmem:[%s6206_s1 + $0xb0] sm:$0xff]  ;;  %v60_v42 = vld [vmem:[%s6206_s1 + $0xb8] sm:$0xff]  ;;  %v61_v44 = vld [vmem:[%s6206_s1 + $0xc0] sm:$0xff] }
   0xf   :  { %182 = vperm.xlu1 %4420, %v104_v15   ;;  %167 = vperm.xlu0 %4419, %v101_v25   ;;  %v136_v43 = vld [vmem:[%s6207_s2 + $0x118] sm:$0xff]  ;;  %v62_v45 = vld [vmem:[%s6206_s1 + $0xc8] sm:$0xff]  ;;  %v105_v46 = vld [vmem:[%s6207_s2 + $0x20] sm:$0xff] }
  0x10   :  { %3795 = vmatmul.mubr.msk.f32.gmra.mrb[4].mxu0 %vm485_vm0, %v42_v11  ;;  %v63_v47 = vld [vmem:[%s6206_s1 + $0xd0] sm:$0xff]  ;;  %v64_v48 = vld [vmem:[%s6206_s1 + $0xd8] sm:$0xff]  ;;  %v106_v49 = vld [vmem:[%s6207_s2 + $0x28] sm:$0xff] }
  0x11   :  { %3797 = vmatprep.mubr.msk.f32.mxu0 %vm485_vm0, %v43_v13  ;;  %v65_v50 = vld [vmem:[%s6206_s1 + $0xe0] sm:$0xff]  ;;  %v66_v51 = vld [vmem:[%s6206_s1 + $0xe8] sm:$0xff]  ;;  %v67_v53 = vld [vmem:[%s6206_s1 + $0xf0] sm:$0xff] }
  0x12   :  { %v137_v52 = vld [vmem:[%s6207_s2 + $0x120] sm:$0xff]  ;;  %v68_v54 = vld [vmem:[%s6206_s1 + $0xf8] sm:$0xff]  ;;  %v107_v55 = vld [vmem:[%s6207_s2 + $0x30] sm:$0xff] }
  0x13   :  { %267 = vperm.xlu1 %4420, %v121_v19   ;;  %177 = vperm.xlu0 %4419, %v103_v29   ;;  %v69_v56 = vld [vmem:[%s6206_s1 + $0x100] sm:$0xff]  ;;  %v70_v57 = vld [vmem:[%s6206_s1 + $0x108] sm:$0xff]  ;;  %v108_v58 = vld [vmem:[%s6207_s2 + $0x38] sm:$0xff] }
  0x14   :  { %3798 = vmatmul.mubr.msk.f32.gmra.mrb[6].mxu0 %vm485_vm0, %v44_v14  ;;  %v71_v59 = vld [vmem:[%s6206_s1 + $0x110] sm:$0xff]  ;;  %v72_v60 = vld [vmem:[%s6206_s1 + $0x118] sm:$0xff]  ;;  %v73_v62 = vld [vmem:[%s6206_s1 + $0x120] sm:$0xff] }
  0x15   :  { %3800 = vmatprep.mubr.msk.f32.mxu0 %vm485_vm0, %v45_v16  ;;  %v139_v61 = vld [vmem:[%s6207_s2 + $0x130] sm:$0xff]  ;;  %v74_v63 = vld [vmem:[%s6206_s1 + $0x128] sm:$0xff]  ;;  %v140_v0 = vld [vmem:[%s6207_s2 + $0x138] sm:$0xff] }
  0x16   :  { %v75_v1 = vld [vmem:[%s6206_s1 + $0x130] sm:$0xff]  ;;  %v76_v2 = vld [vmem:[%s6206_s1 + $0x138] sm:$0xff]  ;;  %v77_v4 = vld [vmem:[%s6206_s1 + $0x140] sm:$0xff] }
  0x17   :  { %272 = vperm.xlu1 %4420, %v122_v23   ;;  %v78_v5 = vld [vmem:[%s6206_s1 + $0x148] sm:$0xff]  ;;  %v79_v7 = vld [vmem:[%s6206_s1 + $0x150] sm:$0xff]  ;;  %v80_v8 = vld [vmem:[%s6206_s1 + $0x158] sm:$0xff] }
  0x18   :  { %3801 = vmatmul.mubr.msk.f32.gmra.mrb[8].mxu0 %vm485_vm0, %v46_v18  ;;  %v81_v9 = vld [vmem:[%s6206_s1 + $0x160] sm:$0xff]  ;;  %v82_v10 = vld [vmem:[%s6206_s1 + $0x168] sm:$0xff]  ;;  %v83_v12 = vld [vmem:[%s6206_s1 + $0x170] sm:$0xff] }
  0x19   :  { %3803 = vmatprep.mubr.msk.f32.mxu0 %vm485_vm0, %v47_v20  ;;  %v84_v13 = vld [vmem:[%s6206_s1 + $0x178] sm:$0xff] }
  0x1b   :  { %277 = vperm.xlu1 %4420, %v123_v27  }
  0x1c   :  { %3804 = vmatmul.mubr.msk.f32.gmra.mrb[10].mxu0 %vm485_vm0, %v48_v22 }
  0x1d   :  { %3806 = vmatprep.mubr.msk.f32.mxu0 %vm485_vm0, %v49_v24 }
  0x1f   :  { %282 = vperm.xlu1 %4420, %v124_v31  }
  0x20   :  { %3807 = vmatmul.mubr.msk.f32.gmra.mrb[12].mxu0 %vm485_vm0, %v50_v26 }
  0x21   :  { %3809 = vmatprep.mubr.msk.f32.mxu0 %vm485_vm0, %v51_v28 }
  0x23   :  { %327 = vperm.xlu1 %4420, %v133_v34  }
  0x24   :  { %3810 = vmatmul.mubr.msk.f32.gmra.mrb[14].mxu0 %vm485_vm0, %v52_v30 }
  0x25   :  { %3812 = vmatprep.mubr.msk.f32.mxu0 %vm485_vm0, %v53_v32 }
  0x27   :  { %332 = vperm.xlu1 %4420, %v134_v37  }
  0x28   :  { %3813 = vmatmul.mubr.msk.f32.gmra.mrb[16].mxu0 %vm485_vm0, %v54_v33 }
  0x29   :  { %3815 = vmatprep.mubr.msk.f32.mxu0 %vm485_vm0, %v55_v35 }
  0x2b   :  { %337 = vperm.xlu1 %4420, %v135_v40  }
  0x2c   :  { %3816 = vmatmul.mubr.msk.f32.gmra.mrb[18].mxu0 %vm485_vm0, %v56_v36 }
  0x2d   :  { %3818 = vmatprep.mubr.msk.f32.mxu0 %vm485_vm0, %v57_v38 }
  0x2f   :  { %342 = vperm.xlu1 %4420, %v136_v43  }
  0x30   :  { %3819 = vmatmul.mubr.msk.f32.gmra.mrb[20].mxu0 %vm485_vm0, %v58_v39 }
  0x31   :  { %3821 = vmatprep.mubr.msk.f32.mxu0 %vm485_vm0, %v59_v41 }
  0x33   :  { %187 = vperm.xlu1 %4420, %v105_v46  }
  0x34   :  { %3822 = vmatmul.mubr.msk.f32.gmra.mrb[22].mxu0 %vm485_vm0, %v60_v42 }
  0x35   :  { %3824 = vmatprep.mubr.msk.f32.mxu0 %vm485_vm0, %v61_v44 }
  0x37   :  { %192 = vperm.xlu1 %4420, %v106_v49  }
  0x38   :  { %3825 = vmatmul.mubr.msk.f32.gmra.mrb[24].mxu0 %vm485_vm0, %v62_v45 }
  0x39   :  { %3827 = vmatprep.mubr.msk.f32.mxu0 %vm485_vm0, %v63_v47 }
  0x3b   :  { %347 = vperm.xlu1 %4420, %v137_v52  }
  0x3c   :  { %3828 = vmatmul.mubr.msk.f32.gmra.mrb[26].mxu0 %vm485_vm0, %v64_v48 }
  0x3d   :  { %3830 = vmatprep.mubr.msk.f32.mxu0 %vm485_vm0, %v65_v50 }
  0x3f   :  { %197 = vperm.xlu1 %4420, %v107_v55  }
  0x40   :  { %3831 = vmatmul.mubr.msk.f32.gmra.mrb[28].mxu0 %vm485_vm0, %v66_v51 }
  0x41   :  { %3833 = vmatprep.mubr.msk.f32.mxu0 %vm485_vm0, %v67_v53 }
  0x43   :  { %202 = vperm.xlu1 %4420, %v108_v58  }
  0x44   :  { %3834 = vmatmul.mubr.msk.f32.gmra.mrb[30].mxu0 %vm485_vm0, %v68_v54 }
  0x45   :  { %3836 = vmatprep.mubr.msk.f32.mxu0 %vm485_vm0, %v69_v56 }
  0x47   :  { %357 = vperm.xlu1 %4420, %v139_v61  }
  0x48   :  { %3837 = vmatmul.mubr.msk.f32.gmra.mrb[32].mxu0 %vm485_vm0, %v70_v57 }
  0x49   :  { %3839 = vmatprep.mubr.msk.f32.mxu0 %vm485_vm0, %v71_v59 }
  0x4b   :  { %362 = vperm.xlu1 %4420, %v140_v0  }
  0x4c   :  { %3840 = vmatmul.mubr.msk.f32.gmra.mrb[34].mxu0 %vm485_vm0, %v72_v60 }
  0x4d   :  { %3842 = vmatprep.mubr.msk.f32.mxu0 %vm485_vm0, %v73_v62 }
  0x50   :  { %3843 = vmatmul.mubr.msk.f32.gmra.mrb[36].mxu0 %vm485_vm0, %v74_v63 }
  0x51   :  { %3845 = vmatprep.mubr.msk.f32.mxu0 %vm485_vm0, %v75_v1 }
  0x54   :  { %3846 = vmatmul.mubr.msk.f32.gmra.mrb[38].mxu0 %vm485_vm0, %v76_v2 }
  0x55   :  { %3848 = vmatprep.mubr.msk.f32.mxu0 %vm485_vm0, %v77_v4 }
  0x58   :  { %3849 = vmatmul.mubr.msk.f32.gmra.mrb[40].mxu0 %vm485_vm0, %v78_v5 }
  0x59   :  { %3851 = vmatprep.mubr.msk.f32.mxu0 %vm485_vm0, %v79_v7 }
  0x5c   :  { %3852 = vmatmul.mubr.msk.f32.gmra.mrb[42].mxu0 %vm485_vm0, %v80_v8 }
  0x5d   :  { %3854 = vmatprep.mubr.msk.f32.mxu0 %vm485_vm0, %v81_v9 }
  0x60   :  { %3855 = vmatmul.mubr.msk.f32.gmra.mrb[44].mxu0 %vm485_vm0, %v82_v10 }
  0x61   :  { %3857 = vmatprep.mubr.msk.f32.mxu0 %vm485_vm0, %v83_v12 }
  0x64   :  { %3858 = vmatmul.mubr.msk.f32.gmra.mrb[46].mxu0 %vm485_vm0, %v84_v13 }
  0x82   :  { %v4850_v3 = vpop.permute.xlu1 %257 }
  0x86   :  { %v4860_v6 = vpop.permute.xlu1 %262  ;;  %v248_v23 = vpop.permute.xlu0 %247 }
  0x8a   :  { %v173_v11 = vpop.permute.xlu1 %172  ;;  %v253_v25 = vpop.permute.xlu0 %252 }
  0x8e   :  { %v183_v14 = vpop.permute.xlu1 %182  ;;  %v168_v27 = vpop.permute.xlu0 %167 }
  0x92   :  { %v268_v15 = vpop.permute.xlu1 %267  ;;  %v178_v33 = vpop.permute.xlu0 %177 }
  0x96   :  { %v4886_v16 = vpop.permute.xlu1 %272 }
  0x9a   :  { %v4888_v17 = vpop.permute.xlu1 %277 }
  0x9e   :  { %v4890_v18 = vpop.permute.xlu1 %282 }
  0xa2   :  { %v4892_v19 = vpop.permute.xlu1 %327 }
  0xa6   :  { %v4894_v20 = vpop.permute.xlu1 %332 }
  0xaa   :  { %v4896_v21 = vpop.permute.xlu1 %337 }
  0xae   :  { %v4898_v22 = vpop.permute.xlu1 %342 }
  0xb2   :  { %v188_v24 = vpop.permute.xlu1 %187 }
  0xb6   :  { %v193_v26 = vpop.permute.xlu1 %192 }
  0xba   :  { %v4900_v28 = vpop.permute.xlu1 %347 }
  0xbe   :  { %v198_v36 = vpop.permute.xlu1 %197 }
  0xc2   :  { %v203_v45 = vpop.permute.xlu1 %202 }
  0xdb   :  { %v3790_v29 = vpop.f32.mrb[0].mxu0 }
  0xdc   :  { %v750_v30 = vadd.f32 %v3790_v29, %v173_v11  ;;  %v744_v31 = vpop.f32.mrb[1].mxu0 }
  0xdd   :  { %v745_v32 = vadd.f32 %v744_v31, %v168_v27 }
  0xdf   :  { %v3793_v34 = vpop.f32.mrb[2].mxu0  ;;  %v4213_v35 = vpack.c.bf16 %v750_v30, %v745_v32 }
  0xe0   :  { %v760_v37 = vadd.f32 %v3793_v34, %v183_v14  ;;  %v754_v38 = vpop.f32.mrb[3].mxu0  ;;  %v138_v34 = vld [vmem:[%s6207_s2 + $0x128] sm:$0xff] }
  0xe1   :  { %v755_v39 = vadd.f32 %v754_v38, %v178_v33  ;;  %4214 = vmatprep.subr.bf16.mxu1 %v4213_v35  ;;  %v125_v33 = vld [vmem:[%s6207_s2 + $0xc0] sm:$0xff] }
  0xe2   :  { %4216 = vmatpush3.bf16.msra.mxu1 %v4213_v35 }
  0xe3   :  { %v4217_v40 = vpack.c.bf16 %v760_v37, %v755_v39  ;;  %v3796_v41 = vpop.f32.mrb[4].mxu0  ;;  %v126_v39 = vld [vmem:[%s6207_s2 + $0xc8] sm:$0xff] }
  0xe4   :  { %v770_v42 = vadd.f32 %v3796_v41, %v193_v26  ;;  %v764_v43 = vpop.f32.mrb[5].mxu0  ;;  %v148_v41 = vld [vmem:[%s6207_s2 + $0x178] sm:$0xff] }
  0xe5   :  { %v765_v44 = vadd.f32 %v764_v43, %v188_v24  ;;  %4218 = vmatprep.subr.bf16.mxu1 %v4217_v40 }
  0xe6   :  { %4220 = vmatpush3.bf16.msra.mxu1 %v4217_v40 }
  0xe7   :  { %v4902_v46 = vpack.c.bf16 %v770_v42, %v765_v44  ;;  %v3799_v47 = vpop.f32.mrb[6].mxu0 }
  0xe8   :  { %v780_v48 = vadd.f32 %v3799_v47, %v203_v45  ;;  %v774_v49 = vpop.f32.mrb[7].mxu0  ;;  %v127_v45 = vld [vmem:[%s6207_s2 + $0xd0] sm:$0xff]  ;;  %v114_v47 = vld [vmem:[%s6207_s2 + $0x68] sm:$0xff] }
  0xe9   :  { %v775_v50 = vadd.f32 %v774_v49, %v198_v36  ;;  %v132_v36 = vld [vmem:[%s6207_s2 + $0xf8] sm:$0xff] }
  0xea   :  { %v116_v49 = vld [vmem:[%s6207_s2 + $0x78] sm:$0xff] }
  0xeb   :  { %v4904_v51 = vpack.c.bf16 %v780_v48, %v775_v50  ;;  %v4906_v52 = vpop.f32.mrb[8].mxu0  ;;  %v128_v48 = vld [vmem:[%s6207_s2 + $0xd8] sm:$0xff]  ;;  %v141_v50 = vld [vmem:[%s6207_s2 + $0x140] sm:$0xff] }
  0xec   :  { %v4908_v53 = vpop.f32.mrb[9].mxu0 }
  0xef   :  { %v4910_v54 = vpop.f32.mrb[10].mxu0 }
  0xf0   :  { %v4912_v55 = vpop.f32.mrb[11].mxu0 }
  0xf3   :  { %v4914_v56 = vpop.f32.mrb[12].mxu0 }
  0xf4   :  { %v4916_v57 = vpop.f32.mrb[13].mxu0 }
  0xf7   :  { %v4918_v58 = vpop.f32.mrb[14].mxu0 }
  0xf8   :  { %v4920_v59 = vpop.f32.mrb[15].mxu0 }
  0xfb   :  { %v3814_v60 = vpop.f32.mrb[16].mxu0 }
  0xfc   :  { %v824_v61 = vpop.f32.mrb[17].mxu0  ;;  %v830_v1 = vadd.f32 %v3814_v60, %v253_v25  ;;  %v85_v60 = vld [vmem:[%s6206_s1 + $0x180] sm:$0xff] }
  0xfd   :  { %v825_v62 = vadd.f32 %v824_v61, %v248_v23  ;;  %v86_v61 = vld [vmem:[%s6206_s1 + $0x188] sm:$0xff]  ;;  %3860 = vmatprep.mubr.msk.f32.mxu0 %vm485_vm0, %v85_v60  ;;  %v97_v60 = vld [vmem:[%s6206_s1 + $0x1e0] sm:$0xff] }
  0xfe   :  { %3861 = vmatmul.mubr.msk.f32.gmra.mrb[48].mxu0 %vm485_vm0, %v86_v61  ;;  %v130_v61 = vld [vmem:[%s6207_s2 + $0xe8] sm:$0xff] }
  0xff   :  { %1079 = vxpose.xlu0.b32.start [1/4] (short) %v825_v62, 128  ;;  %v3817_v63 = vpop.f32.mrb[18].mxu0  ;;  %v142_v62 = vld [vmem:[%s6207_s2 + $0x148] sm:$0xff] }
 0x100   :  { %v834_v0 = vpop.f32.mrb[19].mxu0  ;;  %v840_v10 = vadd.f32 %v3817_v63, %v4860_v6  ;;  %v87_v63 = vld [vmem:[%s6206_s1 + $0x190] sm:$0xff] }
 0x101   :  { %v835_v2 = vadd.f32 %v834_v0, %v4850_v3  ;;  %v88_v0 = vld [vmem:[%s6206_s1 + $0x198] sm:$0xff]  ;;  %3863 = vmatprep.mubr.msk.f32.mxu0 %vm485_vm0, %v87_v63 }
 0x102   :  { %3864 = vmatmul.mubr.msk.f32.gmra.mrb[50].mxu0 %vm485_vm0, %v88_v0 }
 0x103   :  { %v3820_v4 = vpop.f32.mrb[20].mxu0  ;;  %1080 = vxpose.xlu0.b32.cont [2/4] (short) %v830_v1, 128  ;;  %v143_v1 = vld [vmem:[%s6207_s2 + $0x150] sm:$0xff] }
 0x104   :  { %v844_v5 = vpop.f32.mrb[21].mxu0  ;;  %v850_v11 = vadd.f32 %v3820_v4, %v4886_v16  ;;  %v90_v4 = vld [vmem:[%s6206_s1 + $0x1a8] sm:$0xff] }
 0x105   :  { %v845_v7 = vadd.f32 %v844_v5, %v268_v15  ;;  %v5031_v5 = vpop.permute.xlu1 %357 }
 0x107   :  { %v3823_v8 = vpop.f32.mrb[22].mxu0  ;;  %1550 = vxpose.xlu1.b32.start [1/4] (short) %v845_v7, 128  ;;  %1081 = vxpose.xlu0.b32.cont [3/4] (short) %v835_v2, 128  ;;  %v89_v2 = vld [vmem:[%s6206_s1 + $0x1a0] sm:$0xff]  ;;  %v144_v7 = vld [vmem:[%s6207_s2 + $0x158] sm:$0xff] }
 0x108   :  { %v854_v9 = vpop.f32.mrb[23].mxu0  ;;  %v860_v23 = vadd.f32 %v3823_v8, %v4890_v18  ;;  %3866 = vmatprep.mubr.msk.f32.mxu0 %vm485_vm0, %v89_v2  ;;  %v100_v2 = vld [vmem:[%s6206_s1 + $0x1f8] sm:$0xff] }
 0x109   :  { %v855_v3 = vadd.f32 %v854_v9, %v4888_v17  ;;  %3867 = vmatmul.mubr.msk.f32.gmra.mrb[52].mxu0 %vm485_vm0, %v90_v4  ;;  %v91_v9 = vld [vmem:[%s6206_s1 + $0x1b0] sm:$0xff]  ;;  %v145_v4 = vld [vmem:[%s6207_s2 + $0x160] sm:$0xff] }
 0x10a   :  { %3869 = vmatprep.mubr.msk.f32.mxu0 %vm485_vm0, %v91_v9  ;;  %v146_v9 = vld [vmem:[%s6207_s2 + $0x168] sm:$0xff] }
 0x10b   :  { %1551 = vxpose.xlu1.b32.cont [2/4] (short) %v850_v11, 128  ;;  %1082 = vxpose.xlu0.b32.end [4/4] (short) %v840_v10, 128  ;;  %v4925_v12 = vpop.f32.mrb[24].mxu0  ;;  %v92_v10 = vld [vmem:[%s6206_s1 + $0x1b8] sm:$0xff]  ;;  %v129_v11 = vld [vmem:[%s6207_s2 + $0xe0] sm:$0xff] }
 0x10c   :  { %v4927_v13 = vpop.f32.mrb[25].mxu0 }
 0x10d   :  { %3870 = vmatmul.mubr.msk.f32.gmra.mrb[54].mxu0 %vm485_vm0, %v92_v10 }
 0x10f   :  { %1552 = vxpose.xlu1.b32.cont [3/4] (short) %v855_v3, 128  ;;  %v4930_v14 = vpop.f32.mrb[26].mxu0  ;;  %v5050_v3 = vpop.permute.xlu1 %362 }
 0x110   :  { %v4932_v15 = vpop.f32.mrb[27].mxu0 }
 0x113   :  { %1553 = vxpose.xlu1.b32.end [4/4] (short) %v860_v23, 128  ;;  %v4935_v24 = vpop.f32.mrb[28].mxu0 }
 0x114   :  { %v4937_v6 = vpop.f32.mrb[29].mxu0 }
 0x117   :  { %v4939_v16 = vpop.f32.mrb[30].mxu0 }
 0x118   :  { %v4941_v25 = vpop.f32.mrb[31].mxu0 }
 0x11b   :  { %v4943_v26 = vpop.f32.mrb[32].mxu0 }
 0x11c   :  { %v4945_v27 = vpop.f32.mrb[33].mxu0 }
 0x11f   :  { %v4947_v17 = vpop.f32.mrb[34].mxu0 }
 0x120   :  { %v4949_v29 = vpop.f32.mrb[35].mxu0 }
 0x123   :  { %v4951_v30 = vpop.f32.mrb[36].mxu0 }
 0x124   :  { %v4953_v18 = vpop.f32.mrb[37].mxu0 }
 0x127   :  { %v4955_v31 = vpop.f32.mrb[38].mxu0 }
 0x128   :  { %v4957_v32 = vpop.f32.mrb[39].mxu0 }
 0x12b   :  { %v4965_v35 = vpop.f32.mrb[40].mxu0 }
 0x12c   :  { %v4970_v37 = vpop.f32.mrb[41].mxu0 }
 0x12f   :  { %v4972_v38 = vpop.f32.mrb[42].mxu0 }
 0x130   :  { %v4977_v40 = vpop.f32.mrb[43].mxu0 }
 0x133   :  { %v4982_v42 = vpop.f32.mrb[44].mxu0 }
 0x134   :  { %v4984_v43 = vpop.f32.mrb[45].mxu0 }
 0x137   :  { %v4986_v44 = vpop.f32.mrb[46].mxu0 }
 0x138   :  { %6220 = vst [vmem:[#allocation2_spill] sm:$0xff] %v4986_v44 }
 0x161   :  { %287 = vperm.xlu1 %4420, %v125_v33   ;;  %v93_v33 = vld [vmem:[%s6206_s1 + $0x1c0] sm:$0xff] }
 0x162   :  { %3872 = vmatprep.mubr.msk.f32.mxu0 %vm485_vm0, %v93_v33 }
 0x164   :  { %352 = vperm.xlu0 %4419, %v138_v34   ;;  %v94_v34 = vld [vmem:[%s6206_s1 + $0x1c8] sm:$0xff] }
 0x165   :  { %322 = vperm.xlu1 %4420, %v132_v36   ;;  %v109_v36 = vld [vmem:[%s6207_s2 + $0x40] sm:$0xff]  ;;  %3873 = vmatmul.mubr.msk.f32.gmra.mrb[56].mxu0 %vm485_vm0, %v94_v34  ;;  %v111_v34 = vld [vmem:[%s6207_s2 + $0x50] sm:$0xff] }
 0x168   :  { %292 = vperm.xlu0 %4419, %v126_v39  }
 0x169   :  { %402 = vperm.xlu1 %4420, %v148_v41  }
 0x16c   :  { %297 = vperm.xlu0 %4419, %v127_v45   ;;  %v95_v45 = vld [vmem:[%s6206_s1 + $0x1d0] sm:$0xff] }
 0x16d   :  { %232 = vperm.xlu1 %4420, %v114_v47   ;;  %v96_v47 = vld [vmem:[%s6206_s1 + $0x1d8] sm:$0xff]  ;;  %3875 = vmatprep.mubr.msk.f32.mxu0 %vm485_vm0, %v95_v45 }
 0x16e   :  { %3876 = vmatmul.mubr.msk.f32.gmra.mrb[58].mxu0 %vm485_vm0, %v96_v47  ;;  %v112_v45 = vld [vmem:[%s6207_s2 + $0x58] sm:$0xff] }
 0x16f   :  { %3878 = vmatprep.mubr.msk.f32.mxu0 %vm485_vm0, %v97_v60  ;;  %v5134_v60 = vpop.f32.mrb[47].mxu0 }
 0x170   :  { %302 = vperm.xlu0 %4419, %v128_v48   ;;  %v110_v48 = vld [vmem:[%s6207_s2 + $0x48] sm:$0xff] }
 0x171   :  { %242 = vperm.xlu1 %4420, %v116_v49  }
 0x174   :  { %367 = vperm.xlu0 %4419, %v141_v50  }
 0x178   :  { %372 = vperm.xlu0 %4419, %v142_v62   ;;  %v98_v62 = vld [vmem:[%s6206_s1 + $0x1e8] sm:$0xff] }
 0x179   :  { %3879 = vmatmul.mubr.msk.f32.gmra.mrb[60].mxu0 %vm485_vm0, %v98_v62  ;;  %v113_v62 = vld [vmem:[%s6207_s2 + $0x60] sm:$0xff] }
 0x17c   :  { %377 = vperm.xlu0 %4419, %v143_v1   ;;  %v99_v1 = vld [vmem:[%s6206_s1 + $0x1f0] sm:$0xff] }
 0x17d   :  { %3881 = vmatprep.mubr.msk.f32.mxu0 %vm485_vm0, %v99_v1 }
 0x17e   :  { %3882 = vmatmul.mubr.msk.f32.gmra.mrb[62].mxu0 %vm485_vm0, %v100_v2  ;;  %v115_v2 = vld [vmem:[%s6207_s2 + $0x70] sm:$0xff] }
 0x17f   :  { %v1095_v8 = vpop.trf.xlu0 }
 0x180   :  { %382 = vperm.xlu0 %4419, %v144_v7   ;;  %3892 = vmatprep.mubr.msk.f32.mxu1 %vm1111_vm1, %v1095_v8 }
 0x183   :  { %v1096_v23 = vpop.trf.xlu0 }
 0x184   :  { %307 = vperm.xlu0 %4419, %v129_v11   ;;  %3893 = vmatmul.mubr.msk.f32.vlgmr.msra.gmra.mrb[0].mxu1 %vm1111_vm1, %v1096_v23  ;;  %v131_v23 = vld [vmem:[%s6207_s2 + $0xf0] sm:$0xff] }
 0x187   :  { %v1097_v39 = vpop.trf.xlu0  ;;  %v5064_v41 = vpop.trf.xlu1 }
 0x188   :  { %207 = vperm.xlu0 %4419, %v109_v36   ;;  %3895 = vmatprep.mubr.msk.f32.mxu1 %vm1111_vm1, %v1097_v39 }
 0x18b   :  { %v1098_v49 = vpop.trf.xlu0  ;;  %v5078_v50 = vpop.trf.xlu1 }
 0x18c   :  { %212 = vperm.xlu0 %4419, %v110_v48   ;;  %3896 = vmatmul.mubr.msk.f32.gmra.mrb[2].mxu1 %vm1111_vm1, %v1098_v49  ;;  %v147_v49 = vld [vmem:[%s6207_s2 + $0x170] sm:$0xff] }
 0x18f   :  { %v1099_v63 = vpop.trf.xlu0  ;;  %v5092_v0 = vpop.trf.xlu1 }
 0x190   :  { %312 = vperm.xlu0 %4419, %v130_v61   ;;  %3898 = vmatprep.mubr.msk.f32.mxu1 %vm1111_vm1, %v1099_v63 }
 0x193   :  { %v1100_v7 = vpop.trf.xlu0  ;;  %v5106_v8 = vpop.trf.xlu1 }
 0x194   :  { %387 = vperm.xlu0 %4419, %v145_v4   ;;  %3899 = vmatmul.mubr.msk.f32.gmra.mrb[4].mxu1 %vm1111_vm1, %v1100_v7 }
 0x197   :  { %v1101_v10 = vpop.trf.xlu0  ;;  %v5113_v11 = vpop.trf.xlu1 }
 0x198   :  { %392 = vperm.xlu0 %4419, %v146_v9   ;;  %3901 = vmatprep.mubr.msk.f32.mxu1 %vm1111_vm1, %v1101_v10 }
 0x19b   :  { %v1102_v33 = vpop.trf.xlu0  ;;  %v5122_v36 = vpop.trf.xlu1 }
 0x19c   :  { %317 = vperm.xlu0 %4419, %v131_v23   ;;  %3902 = vmatmul.mubr.msk.f32.gmra.mrb[6].mxu1 %vm1111_vm1, %v1102_v33  ;;  %v905_v33 = vadd.f32 %v4945_v27, %v4892_v19 }
 0x19f   :  { %v1103_v39 = vpop.trf.xlu0  ;;  %v5129_v48 = vpop.trf.xlu1 }
 0x1a0   :  { %217 = vperm.xlu0 %4419, %v111_v34   ;;  %3904 = vmatprep.mubr.msk.f32.mxu1 %vm1111_vm1, %v1103_v39 }
 0x1a3   :  { %v1104_v47 = vpop.trf.xlu0  ;;  %v5140_v63 = vpop.trf.xlu1 }
 0x1a4   :  { %222 = vperm.xlu0 %4419, %v112_v45   ;;  %3905 = vmatmul.mubr.msk.f32.gmra.mrb[8].mxu1 %vm1111_vm1, %v1104_v47 }
 0x1a7   :  { %v1105_v61 = vpop.trf.xlu0  ;;  %v5147_v7 = vpop.trf.xlu1 }
 0x1a8   :  { %397 = vperm.xlu0 %4419, %v147_v49   ;;  %3907 = vmatprep.mubr.msk.f32.mxu1 %vm1111_vm1, %v1105_v61 }
 0x1ab   :  { %v1106_v1 = vpop.trf.xlu0  ;;  %v5150_v10 = vpop.trf.xlu1 }
 0x1ac   :  { %227 = vperm.xlu0 %4419, %v113_v62   ;;  %3908 = vmatmul.mubr.msk.f32.gmra.mrb[10].mxu1 %vm1111_vm1, %v1106_v1 }
 0x1af   :  { %v1107_v4 = vpop.trf.xlu0  ;;  %v5156_v39 = vpop.trf.xlu1 }
 0x1b0   :  { %237 = vperm.xlu0 %4419, %v115_v2   ;;  %3910 = vmatprep.mubr.msk.f32.mxu1 %vm1111_vm1, %v1107_v4 }
 0x1b3   :  { %v1108_v9 = vpop.trf.xlu0  ;;  %v5158_v45 = vpop.trf.xlu1 }
 0x1b4   :  { %3911 = vmatmul.mubr.msk.f32.gmra.mrb[12].mxu1 %vm1111_vm1, %v1108_v9 }
 0x1b7   :  { %v1109_v23 = vpop.trf.xlu0  ;;  %v5160_v47 = vpop.trf.xlu1 }
 0x1b8   :  { %3913 = vmatprep.mubr.msk.f32.mxu1 %vm1111_vm1, %v1109_v23 }
 0x1bb   :  { %v1110_v34 = vpop.trf.xlu0  ;;  %v5162_v49 = vpop.trf.xlu1 }
 0x1bc   :  { %3914 = vmatmul.mubr.msk.f32.gmra.mrb[14].mxu1 %vm1111_vm1, %v1110_v34 }
 0x1bd   :  { %3948 = vmatprep.mubr.f32.mxu1 %v905_v33 }
 0x1bf   :  { %v5164_v61 = vpop.trf.xlu1 }
 0x1c0   :  { %6221 = vst [vmem:[#allocation3_spill] sm:$0xff] %v5164_v61 }
 0x1c3   :  { %v5166_v62 = vpop.trf.xlu1 }
 0x1c4   :  { %6222 = vst [vmem:[#allocation4_spill] sm:$0xff] %v5166_v62 }
 0x1e0   :  { %v288_v1 = vpop.permute.xlu1 %287 }
 0x1e1   :  { %v865_v2 = vadd.f32 %v4927_v13, %v288_v1 }
 0x1e3   :  { %2020 = vxpose.xlu0.b32.start [1/4] (short) %v865_v2, 128  ;;  %v353_v19 = vpop.permute.xlu0 %352 }
 0x1e4   :  { %v5170_v27 = vadd.f32 %v4951_v30, %v353_v19 }
 0x1e7   :  { %v293_v4 = vpop.permute.xlu0 %292 }
 0x1e8   :  { %v870_v9 = vadd.f32 %v4925_v12, %v293_v4 }
 0x1ea   :  { %2021 = vxpose.xlu0.b32.cont [2/4] (short) %v870_v9, 128 }
 0x1eb   :  { %v298_v23 = vpop.permute.xlu0 %297 }
 0x1ec   :  { %v875_v33 = vadd.f32 %v4932_v15, %v298_v23 }
 0x1ee   :  { %2022 = vxpose.xlu0.b32.cont [3/4] (short) %v875_v33, 128 }
 0x1ef   :  { %v303_v34 = vpop.permute.xlu0 %302 }
 0x1f0   :  { %v880_v44 = vadd.f32 %v4930_v14, %v303_v34 }
 0x1f2   :  { %2023 = vxpose.xlu0.b32.end [4/4] (short) %v880_v44, 128 }
 0x1f3   :  { %v368_v62 = vpop.permute.xlu0 %367 }
 0x1f4   :  { %v5176_v13 = vadd.f32 %v4970_v37, %v368_v62 }
 0x1f6   :  { %6223 = vst [vmem:[#allocation5_spill] sm:$0xff] %v5176_v13 }
 0x1f7   :  { %v373_v1 = vpop.permute.xlu0 %372 }
 0x1f8   :  { %v5179_v30 = vadd.f32 %v4965_v35, %v373_v1  ;;  %v323_v1 = vpop.permute.xlu1 %322 }
 0x1fa   :  { %6224 = vst [vmem:[#allocation6_spill] sm:$0xff] %v5179_v30 }
 0x1fb   :  { %v378_v2 = vpop.permute.xlu0 %377 }
 0x1fc   :  { %v5182_v12 = vadd.f32 %v4977_v40, %v378_v2 }
 0x1fe   :  { %6225 = vst [vmem:[#allocation7_spill] sm:$0xff] %v5182_v12 }
 0x1ff   :  { %v383_v19 = vpop.permute.xlu0 %382 }
 0x200   :  { %v5185_v15 = vadd.f32 %v4972_v38, %v383_v19  ;;  %v900_v19 = vadd.f32 %v4939_v16, %v323_v1 }
 0x202   :  { %6226 = vst [vmem:[#allocation8_spill] sm:$0xff] %v5185_v15 }
 0x203   :  { %v308_v4 = vpop.permute.xlu0 %307 }
 0x204   :  { %v885_v14 = vadd.f32 %v4937_v6, %v308_v4 }
 0x206   :  { %2490 = vxpose.xlu1.b32.start [1/4] (short) %v885_v14, 128 }
 0x207   :  { %v208_v44 = vpop.permute.xlu0 %207 }
 0x208   :  { %v785_v37 = vadd.f32 %v4908_v53, %v208_v44 }
 0x20b   :  { %v213_v62 = vpop.permute.xlu0 %212 }
 0x20c   :  { %v790_v9 = vadd.f32 %v4906_v52, %v213_v62 }
 0x20e   :  { %v5190_v35 = vpack.c.bf16 %v790_v9, %v785_v37 }
 0x20f   :  { %v313_v23 = vpop.permute.xlu0 %312 }
 0x210   :  { %6227 = vst [vmem:[#allocation9_spill] sm:$0xff] %v5190_v35  ;;  %v890_v40 = vadd.f32 %v4935_v24, %v313_v23  ;;  %v5202_v24 = vpop.permute.xlu1 %402 }
 0x211   :  { %6230 = vst [vmem:[#allocation12_spill] sm:$0xff] %v5202_v24 }
 0x212   :  { %2491 = vxpose.xlu1.b32.cont [2/4] (short) %v890_v40, 128 }
 0x213   :  { %v388_v33 = vpop.permute.xlu0 %387 }
 0x214   :  { %v5194_v38 = vadd.f32 %v4984_v43, %v388_v33 }
 0x216   :  { %6228 = vst [vmem:[#allocation10_spill] sm:$0xff] %v5194_v38 }
 0x217   :  { %v393_v34 = vpop.permute.xlu0 %392 }
 0x218   :  { %v5197_v6 = vadd.f32 %v4982_v42, %v393_v34  ;;  %v233_v42 = vpop.permute.xlu1 %232 }
 0x219   :  { %v810_v9 = vadd.f32 %v4914_v56, %v233_v42  ;;  %v151_v56 = vld [vmem:[%s6207_s2 + $0x190] sm:$0xff] }
 0x21a   :  { %6229 = vst [vmem:[#allocation11_spill] sm:$0xff] %v5197_v6 }
 0x21b   :  { %v318_v2 = vpop.permute.xlu0 %317 }
 0x21c   :  { %v895_v53 = vadd.f32 %v4941_v25, %v318_v2  ;;  %v243_v23 = vpop.permute.xlu1 %242  ;;  %v157_v2 = vld [vmem:[%s6207_s2 + $0x1c0] sm:$0xff] }
 0x21d   :  { %v820_v33 = vadd.f32 %v4918_v58, %v243_v23  ;;  %v155_v58 = vld [vmem:[%s6207_s2 + $0x1b0] sm:$0xff] }
 0x21e   :  { %2492 = vxpose.xlu1.b32.cont [3/4] (short) %v895_v53, 128  ;;  %v5233_v53 = vpop.f32.mrb[48].mxu0  ;;  %v163_v23 = vld [vmem:[%s6207_s2 + $0x1f0] sm:$0xff] }
 0x21f   :  { %v218_v52 = vpop.permute.xlu0 %217  ;;  %6235 = vst [vmem:[#allocation17_spill] sm:$0xff] %v5233_v53  ;;  %v3044_v53 = vld [vmem:[%s6210_s7 + $0x10] sm:$0xff] }
 0x220   :  { %v795_v4 = vadd.f32 %v4912_v55, %v218_v52  ;;  %v5235_v52 = vpop.f32.mrb[49].mxu0 }
 0x222   :  { %2493 = vxpose.xlu1.b32.end [4/4] (short) %v900_v19, 128  ;;  %v159_v19 = vld [vmem:[%s6207_s2 + $0x1d0] sm:$0xff] }
 0x223   :  { %v223_v14 = vpop.permute.xlu0 %222 }
 0x224   :  { %v800_v43 = vadd.f32 %v4910_v54, %v223_v14 }
 0x226   :  { %v5205_v44 = vpack.c.bf16 %v800_v43, %v795_v4  ;;  %v5240_v4 = vpop.f32.mrb[50].mxu0 }
 0x227   :  { %v398_v37 = vpop.permute.xlu0 %397  ;;  %6236 = vst [vmem:[#allocation18_spill] sm:$0xff] %v5240_v4  ;;  %v5242_v43 = vpop.f32.mrb[51].mxu0 }
 0x228   :  { %6231 = vst [vmem:[#allocation13_spill] sm:$0xff] %v5205_v44  ;;  %v5208_v62 = vadd.f32 %v5134_v60, %v398_v37  ;;  %v149_v60 = vld [vmem:[%s6207_s2 + $0x180] sm:$0xff]  ;;  %6237 = vst [vmem:[#allocation19_spill] sm:$0xff] %v5242_v43 }
 0x229   :  { %v161_v37 = vld [vmem:[%s6207_s2 + $0x1e0] sm:$0xff] }
 0x22a   :  { %6232 = vst [vmem:[#allocation14_spill] sm:$0xff] %v5208_v62 }
 0x22b   :  { %v228_v25 = vpop.permute.xlu0 %227 }
 0x22c   :  { %v805_v16 = vadd.f32 %v4916_v57, %v228_v25  ;;  %v153_v57 = vld [vmem:[%s6207_s2 + $0x1a0] sm:$0xff]  ;;  %v5247_v25 = vpop.f32.mrb[52].mxu0 }
 0x22d   :  { %6238 = vst [vmem:[#allocation20_spill] sm:$0xff] %v5247_v25 }
 0x22e   :  { %v5212_v55 = vpack.c.bf16 %v810_v9, %v805_v16  ;;  %v5249_v9 = vpop.f32.mrb[53].mxu0 }
 0x22f   :  { %v238_v40 = vpop.permute.xlu0 %237  ;;  %6239 = vst [vmem:[#allocation21_spill] sm:$0xff] %v5249_v9  ;;  %v5251_v16 = vpop.f32.mrb[54].mxu0 }
 0x230   :  { %6233 = vst [vmem:[#allocation15_spill] sm:$0xff] %v5212_v55  ;;  %v815_v54 = vadd.f32 %v4920_v59, %v238_v40  ;;  %6240 = vst [vmem:[#allocation22_spill] sm:$0xff] %v5251_v16  ;;  %v5256_v40 = vpop.f32.mrb[55].mxu0 }
 0x231   :  { %6241 = vst [vmem:[#allocation23_spill] sm:$0xff] %v5256_v40 }
 0x232   :  { %v5216_v34 = vpack.c.bf16 %v820_v33, %v815_v54  ;;  %v1064_v33 = vld [vmem:[%s6208_s3 + $0x8] sm:$0xff] }
 0x233   :  { %v1068_v54 = vld [vmem:[%s6208_s3 + $0x28] sm:$0xff] }
 0x234   :  { %6234 = vst [vmem:[#allocation16_spill] sm:$0xff] %v5216_v34 }
 0x24b   :  { %407 = vperm.xlu0 %4419, %v149_v60   ;;  %v5264_v60 = vpop.f32.mrb[56].mxu0 }
 0x24c   :  { %6242 = vst [vmem:[#allocation24_spill] sm:$0xff] %v5264_v60  ;;  %v3024_v60 = vld [vmem:[%s6209_s5] sm:$0xff] }
 0x24f   :  { %417 = vperm.xlu0 %4419, %v151_v56   ;;  %v1063_v56 = vld [vmem:[%s6208_s3] sm:$0xff] }
 0x253   :  { %427 = vperm.xlu0 %4419, %v153_v57   ;;  %v1067_v57 = vld [vmem:[%s6208_s3 + $0x20] sm:$0xff] }
 0x257   :  { %437 = vperm.xlu0 %4419, %v155_v58   ;;  %v3894_v59 = vpop.f32.mrb[0].mxu1  ;;  %v5272_v58 = vpop.f32.mrb[57].mxu0 }
 0x258   :  { %v1226_v1 = vpop.f32.mrb[1].mxu1  ;;  %6243 = vst [vmem:[#allocation25_spill] sm:$0xff] %v5272_v58 }
 0x259   :  { %v5285_v9 = vadd.f32 %v1226_v1, %v1063_v56  ;;  %v3042_v1 = vld [vmem:[%s6210_s7] sm:$0xff]  ;;  %v1066_v56 = vld [vmem:[%s6208_s3 + $0x18] sm:$0xff] }
 0x25b   :  { %447 = vperm.xlu0 %4419, %v157_v2  }
 0x25f   :  { %457 = vperm.xlu0 %4419, %v159_v19   ;;  %v3897_v14 = vpop.f32.mrb[2].mxu1  ;;  %v5274_v19 = vpop.f32.mrb[58].mxu0 }
 0x260   :  { %v1236_v42 = vpop.f32.mrb[3].mxu1  ;;  %6244 = vst [vmem:[#allocation26_spill] sm:$0xff] %v5274_v19  ;;  %v5283_v25 = vpop.f32.mrb[59].mxu0 }
 0x261   :  { %6245 = vst [vmem:[#allocation27_spill] sm:$0xff] %v5283_v25  ;;  %v5289_v58 = vpop.f32.mrb[60].mxu0 }
 0x262   :  { %6246 = vst [vmem:[#allocation28_spill] sm:$0xff] %v5289_v58 }
 0x263   :  { %467 = vperm.xlu0 %4419, %v161_v37   ;;  %v5276_v37 = vadd.f32 %v3894_v59, %v1064_v33  ;;  %v5295_v33 = vpop.f32.mrb[61].mxu0 }
 0x264   :  { %6248 = vst [vmem:[#allocation30_spill] sm:$0xff] %v5295_v33  ;;  %v5321_v33 = vadd.f32 %v3897_v14, %v1066_v56  ;;  %v3173_v56 = vld [vmem:[%s6211_s9] sm:$0xff] }
 0x266   :  { %v5293_v59 = vpop.trf.xlu0 }
 0x267   :  { %477 = vperm.xlu0 %4419, %v163_v23   ;;  %v3900_v2 = vpop.f32.mrb[4].mxu1  ;;  %6247 = vst [vmem:[#allocation29_spill] sm:$0xff] %v5293_v59 }
 0x268   :  { %v5278_v16 = vadd.f32 %v3900_v2, %v1068_v54  ;;  %v1246_v40 = vpop.f32.mrb[5].mxu1  ;;  %v5299_v2 = vpop.f32.mrb[62].mxu0 }
 0x269   :  { %v5287_v4 = vadd.f32 %v1246_v40, %v1067_v57  ;;  %6249 = vst [vmem:[#allocation31_spill] sm:$0xff] %v5299_v2  ;;  %v5304_v40 = vpop.f32.mrb[63].mxu0  ;;  %v1070_v57 = vld [vmem:[%s6208_s3 + $0x38] sm:$0xff]  ;;  %v1065_v2 = vld [vmem:[%s6208_s3 + $0x10] sm:$0xff] }
 0x26a   :  { %v1306_v23 = vmax.f32 %v5276_v37, %v5278_v16  ;;  %6250 = vst [vmem:[#allocation32_spill] sm:$0xff] %v5304_v40  ;;  %v1069_v40 = vld [vmem:[%s6208_s3 + $0x30] sm:$0xff]  ;;  %v5328_v43 = vpop.trf.xlu0  ;;  %v5330_v34 = vadd.f32 %v1236_v42, %v1065_v2  ;;  %v1072_v42 = vld [vmem:[%s6208_s3 + $0x48] sm:$0xff]  ;;  %v1071_v2 = vld [vmem:[%s6208_s3 + $0x40] sm:$0xff] }
 0x26b   :  { %v1305_v54 = vmax.f32 %v5285_v9, %v5287_v4  ;;  %3028 = vperm.xlu0 %4419, %v3024_v60   ;;  %v150_v60 = vld [vmem:[%s6207_s2 + $0x188] sm:$0xff]  ;;  %6251 = vst [vmem:[#allocation33_spill] sm:$0xff] %v5328_v43  ;;  %v156_v43 = vld [vmem:[%s6207_s2 + $0x1b8] sm:$0xff] }
 0x26f   :  { %3048 = vperm.xlu0 %4419, %v3042_v1   ;;  %v3903_v58 = vpop.f32.mrb[6].mxu1  ;;  %v152_v1 = vld [vmem:[%s6207_s2 + $0x198] sm:$0xff] }
 0x270   :  { %v5323_v19 = vadd.f32 %v3903_v58, %v1070_v57  ;;  %412 = vperm.xlu1 %4420, %v150_v60   ;;  %v1256_v25 = vpop.f32.mrb[7].mxu1 }
 0x271   :  { %v5332_v59 = vadd.f32 %v1256_v25, %v1069_v40  ;;  %v154_v25 = vld [vmem:[%s6207_s2 + $0x1a8] sm:$0xff]  ;;  %v5353_v40 = vpop.trf.xlu0 }
 0x272   :  { %v1308_v14 = vmax.f32 %v5321_v33, %v5323_v19  ;;  %6252 = vst [vmem:[#allocation34_spill] sm:$0xff] %v5353_v40 }
 0x273   :  { %v1307_v58 = vmax.f32 %v5330_v34, %v5332_v59  ;;  %3058 = vperm.xlu0 %4419, %v3044_v53  }
 0x274   :  { %422 = vperm.xlu1 %4420, %v152_v1  }
 0x275   :  { %v5364_v6 = vpop.trf.xlu0 }
 0x276   :  { %6253 = vst [vmem:[#allocation35_spill] sm:$0xff] %v5364_v6 }
 0x277   :  { %3177 = vperm.xlu0 %4419, %v3173_v56   ;;  %v3906_v53 = vpop.f32.mrb[8].mxu1  ;;  %v1074_v56 = vld [vmem:[%s6208_s3 + $0x58] sm:$0xff] }
 0x278   :  { %v5355_v57 = vadd.f32 %v3906_v53, %v1072_v42  ;;  %432 = vperm.xlu1 %4420, %v154_v25   ;;  %v1266_v60 = vpop.f32.mrb[9].mxu1  ;;  %v158_v42 = vld [vmem:[%s6207_s2 + $0x1c8] sm:$0xff]  ;;  %v1073_v25 = vld [vmem:[%s6208_s3 + $0x50] sm:$0xff] }
 0x279   :  { %v5357_v1 = vadd.f32 %v1266_v60, %v1071_v2  ;;  %v5383_v6 = vpop.trf.xlu0 }
 0x27a   :  { %v1310_v24 = vmax.f32 %v1306_v23, %v5355_v57  ;;  %6254 = vst [vmem:[#allocation36_spill] sm:$0xff] %v5383_v6 }
 0x27b   :  { %v1309_v62 = vmax.f32 %v1305_v54, %v5357_v1  ;;  %v160_v54 = vld [vmem:[%s6207_s2 + $0x1d8] sm:$0xff] }
 0x27c   :  { %442 = vperm.xlu1 %4420, %v156_v43  }
 0x27d   :  { %v5397_v6 = vpop.trf.xlu0 }
 0x27e   :  { %6255 = vst [vmem:[#allocation37_spill] sm:$0xff] %v5397_v6 }
 0x27f   :  { %v3909_v2 = vpop.f32.mrb[10].mxu1 }
 0x280   :  { %v5375_v53 = vadd.f32 %v3909_v2, %v1074_v56  ;;  %452 = vperm.xlu1 %4420, %v158_v42   ;;  %v1276_v23 = vpop.f32.mrb[11].mxu1  ;;  %v1076_v56 = vld [vmem:[%s6208_s3 + $0x68] sm:$0xff] }
 0x281   :  { %v5377_v43 = vadd.f32 %v1276_v23, %v1073_v25  ;;  %v162_v42 = vld [vmem:[%s6207_s2 + $0x1e8] sm:$0xff]  ;;  %v1075_v25 = vld [vmem:[%s6208_s3 + $0x60] sm:$0xff] }
 0x282   :  { %v1312_v60 = vmax.f32 %v1308_v14, %v5375_v53 }
 0x283   :  { %v1311_v40 = vmax.f32 %v1307_v58, %v5377_v43 }
 0x284   :  { %462 = vperm.xlu1 %4420, %v160_v54   ;;  %v164_v54 = vld [vmem:[%s6207_s2 + $0x1f8] sm:$0xff] }
 0x287   :  { %v3912_v2 = vpop.f32.mrb[12].mxu1 }
 0x288   :  { %v5395_v23 = vadd.f32 %v3912_v2, %v1076_v56  ;;  %472 = vperm.xlu1 %4420, %v162_v42   ;;  %v1286_v14 = vpop.f32.mrb[13].mxu1  ;;  %v1078_v56 = vld [vmem:[%s6208_s3 + $0x78] sm:$0xff]  ;;  %v3025_v42 = vld [vmem:[%s6209_s5 + $0x8] sm:$0xff]  ;;  %v5415_v2 = vpop.trf.xlu0 }
 0x289   :  { %v5399_v58 = vadd.f32 %v1286_v14, %v1075_v25  ;;  %v1077_v25 = vld [vmem:[%s6208_s3 + $0x70] sm:$0xff]  ;;  %6256 = vst [vmem:[#allocation38_spill] sm:$0xff] %v5415_v2 }
 0x28a   :  { %v1314_v55 = vmax.f32 %v1310_v24, %v5395_v23 }
 0x28b   :  { %v1313_v38 = vmax.f32 %v1309_v62, %v5399_v58 }
 0x28c   :  { %482 = vperm.xlu1 %4420, %v164_v54   ;;  %v5426_v44 = vpop.trf.xlu0 }
 0x28d   :  { %v1317_v15 = vmax.f32 %v1313_v38, %v1314_v55  ;;  %v3043_v55 = vld [vmem:[%s6210_s7 + $0x8] sm:$0xff]  ;;  %6257 = vst [vmem:[#allocation39_spill] sm:$0xff] %v5426_v44 }
 0x28f   :  { %v3915_v14 = vpop.f32.mrb[14].mxu1 }
 0x290   :  { %v5417_v24 = vadd.f32 %v3915_v14, %v1078_v56  ;;  %3033 = vperm.xlu1 %4420, %v3025_v42   ;;  %v1296_v62 = vpop.f32.mrb[15].mxu1  ;;  %v3045_v56 = vld [vmem:[%s6210_s7 + $0x18] sm:$0xff]  ;;  %v3174_v14 = vld [vmem:[%s6211_s9 + $0x8] sm:$0xff] }
 0x291   :  { %v5419_v38 = vadd.f32 %v1296_v62, %v1077_v25  ;;  %v5434_v62 = vpop.trf.xlu0 }
 0x292   :  { %v1316_v54 = vmax.f32 %v1312_v60, %v5417_v24  ;;  %6258 = vst [vmem:[#allocation40_spill] sm:$0xff] %v5434_v62 }
 0x293   :  { %v1315_v6 = vmax.f32 %v1311_v40, %v5419_v38 }
 0x294   :  { %3053 = vperm.xlu1 %4420, %v3043_v55  }
 0x295   :  { %v1318_v12 = vmax.f32 %v1315_v6, %v1316_v54  ;;  %v5436_v2 = vpop.trf.xlu0 }
 0x296   :  { %6259 = vst [vmem:[#allocation41_spill] sm:$0xff] %v5436_v2 }
 0x297   :  { %v1319_v42 = vmax.f32 %v1317_v15, %v1318_v12 }
 0x298   :  { %3063 = vperm.xlu1 %4420, %v3045_v56  }
 0x299   :  { %v1320_v25 = vrot.slane %v1319_v42, 4 }
 0x29b   :  { %v1321_v60 = vmax.f32 %v1319_v42, %v1320_v25 }
 0x29c   :  { %3182 = vperm.xlu1 %4420, %v3174_v14  }
 0x29d   :  { %v1322_v40 = vrot.slane %v1321_v60, 2 }
 0x29f   :  { %v1323_v55 = vmax.f32 %v1321_v60, %v1322_v40  ;;  %v5456_v40 = vpop.trf.xlu0 }
 0x2a0   :  { %6260 = vst [vmem:[#allocation42_spill] sm:$0xff] %v5456_v40 }
 0x2a1   :  { %v1324_v6 = vrot.slane %v1323_v55, 1 }
 0x2a3   :  { %v5438_v54 = vmax.f32 %v1323_v55, %v1324_v6  ;;  %v5474_v40 = vpop.trf.xlu0 }
 0x2a4   :  { %6261 = vst [vmem:[#allocation43_spill] sm:$0xff] %v5474_v40 }
 0x2a5   :  { %v1326_v12 = vsub.f32 %v5285_v9, %v5438_v54  ;;  %v1327_v15 = vsub.f32 %v5276_v37, %v5438_v54  ;;  %v1328_v56 = vsub.f32 %v5330_v34, %v5438_v54  ;;  %v1329_v42 = vsub.f32 %v5321_v33, %v5438_v54 }
 0x2a6   :  { %v1330_v25 = vsub.f32 %v5287_v4, %v5438_v54  ;;  %v1331_v14 = vsub.f32 %v5278_v16, %v5438_v54  ;;  %v1332_v60 = vsub.f32 %v5332_v59, %v5438_v54  ;;  %v1333_v9 = vsub.f32 %v5323_v19, %v5438_v54 }
 0x2a7   :  { %v1334_v34 = vsub.f32 %v5357_v1, %v5438_v54  ;;  %v1335_v37 = vsub.f32 %v5355_v57, %v5438_v54  ;;  %v1336_v4 = vsub.f32 %v5377_v43, %v5438_v54  ;;  %v1337_v16 = vsub.f32 %v5375_v53, %v5438_v54  ;;  %v5476_v2 = vpop.trf.xlu0 }
 0x2a8   :  { %v1338_v59 = vsub.f32 %v5399_v58, %v5438_v54  ;;  %v1339_v19 = vsub.f32 %v5395_v23, %v5438_v54  ;;  %v1340_v33 = vsub.f32 %v5419_v38, %v5438_v54  ;;  %v1341_v1 = vsub.f32 %v5417_v24, %v5438_v54  ;;  %6262 = vst [vmem:[#allocation44_spill] sm:$0xff] %v5476_v2 }
 0x2a9   :  { %v1342_v55 = vmul.f32 1.442695, %v1326_v12  ;;  %v1344_v57 = vmul.f32 1.442695, %v1327_v15  ;;  %v1346_v6 = vmul.f32 1.442695, %v1328_v56 }
 0x2aa   :  { %v1348_v43 = vmul.f32 1.442695, %v1329_v42  ;;  %v1350_v53 = vmul.f32 1.442695, %v1330_v25  ;;  %v1352_v58 = vmul.f32 1.442695, %v1331_v14 }
 0x2ab   :  { %4421 = vpow2.f32 %v1342_v55  ;;  %v1354_v23 = vmul.f32 1.442695, %v1332_v60  ;;  %v1356_v38 = vmul.f32 1.442695, %v1333_v9  ;;  %v1358_v54 = vmul.f32 1.442695, %v1334_v34  ;;  %v5484_v42 = vpop.trf.xlu0 }
 0x2ac   :  { %4423 = vpow2.f32 %v1344_v57  ;;  %v1360_v56 = vmul.f32 1.442695, %v1335_v37  ;;  %6263 = vst [vmem:[#allocation45_spill] sm:$0xff] %v5484_v42  ;;  %v1362_v60 = vmul.f32 1.442695, %v1336_v4 }
 0x2ad   :  { %4425 = vpow2.f32 %v1346_v6  ;;  %v1364_v57 = vmul.f32 1.442695, %v1337_v16  ;;  %v1366_v34 = vmul.f32 1.442695, %v1338_v59  ;;  %v1368_v37 = vmul.f32 1.442695, %v1339_v19 }
 0x2ae   :  { %4427 = vpow2.f32 %v1348_v43 }
 0x2af   :  { %4429 = vpow2.f32 %v1350_v53  ;;  %v5486_v53 = vpop.trf.xlu0 }
 0x2b0   :  { %4431 = vpow2.f32 %v1352_v58  ;;  %6264 = vst [vmem:[#allocation46_spill] sm:$0xff] %v5486_v53 }
 0x2b1   :  { %4433 = vpow2.f32 %v1354_v23 }
 0x2b2   :  { %4435 = vpow2.f32 %v1356_v38 }
 0x2b3   :  { %4437 = vpow2.f32 %v1358_v54 }
 0x2b4   :  { %4439 = vpow2.f32 %v1360_v56  ;;  %v5488_v56 = vpop.trf.xlu0 }
 0x2b5   :  { %v5478_v62 = vpop.eup %4421  ;;  %4441 = vpow2.f32 %v1362_v60  ;;  %6265 = vst [vmem:[#allocation47_spill] sm:$0xff] %v5488_v56 }
 0x2b6   :  { %v5480_v24 = vpop.eup %4423  ;;  %4443 = vpow2.f32 %v1364_v57 }
 0x2b7   :  { %v1374_v12 = vadd.f32 %v5480_v24, %v5478_v62  ;;  %v4426_v15 = vpop.eup %4425  ;;  %4445 = vpow2.f32 %v1366_v34 }
 0x2b8   :  { %v4428_v14 = vpop.eup %4427  ;;  %4447 = vpow2.f32 %v1368_v37 }
 0x2b9   :  { %v1375_v25 = vadd.f32 %v4426_v15, %v1374_v12  ;;  %v4430_v9 = vpop.eup %4429  ;;  %v1370_v12 = vmul.f32 1.442695, %v1340_v33 }
 0x2ba   :  { %v4432_v43 = vpop.eup %4431 }
 0x2bb   :  { %v1376_v55 = vadd.f32 %v4428_v14, %v1375_v25  ;;  %v4434_v23 = vpop.eup %4433  ;;  %v1372_v25 = vmul.f32 1.442695, %v1341_v1  ;;  %4449 = vpow2.f32 %v1370_v12 }
 0x2bc   :  { %v4436_v42 = vpop.eup %4435 }
 0x2bd   :  { %v1377_v6 = vadd.f32 %v4430_v9, %v1376_v55  ;;  %v4438_v4 = vpop.eup %4437  ;;  %4451 = vpow2.f32 %v1372_v25 }
 0x2be   :  { %v4440_v55 = vpop.eup %4439 }
 0x2bf   :  { %v1378_v58 = vadd.f32 %v4432_v43, %v1377_v6  ;;  %v4442_v60 = vpop.eup %4441 }
 0x2c0   :  { %v4444_v53 = vpop.eup %4443 }
 0x2c1   :  { %v1379_v38 = vadd.f32 %v4434_v23, %v1378_v58  ;;  %v4446_v34 = vpop.eup %4445 }
 0x2c3   :  { %v1380_v54 = vadd.f32 %v4436_v42, %v1379_v38  ;;  %v4448_v38 = vpop.eup %4447 }
 0x2c5   :  { %v1381_v16 = vadd.f32 %v4438_v4, %v1380_v54  ;;  %v4450_v1 = vpop.eup %4449 }
 0x2c7   :  { %v1382_v59 = vadd.f32 %v4440_v55, %v1381_v16  ;;  %v4452_v56 = vpop.eup %4451 }
 0x2c9   :  { %v1383_v6 = vadd.f32 %v4442_v60, %v1382_v59 }
 0x2ca   :  { %v408_v57 = vpop.permute.xlu0 %407 }
 0x2cb   :  { %v1384_v19 = vadd.f32 %v4444_v53, %v1383_v6  ;;  %v985_v58 = vadd.f32 %v5235_v52, %v408_v57 }
 0x2cd   :  { %v1385_v33 = vadd.f32 %v4446_v34, %v1384_v19  ;;  %4100 = vmatprep.mubr.f32.mxu0 %v985_v58 }
 0x2cf   :  { %v1386_v37 = vadd.f32 %v4448_v38, %v1385_v33 }
 0x2d1   :  { %v1387_v2 = vadd.f32 %v4450_v1, %v1386_v37 }
 0x2d3   :  { %v1388_v54 = vadd.f32 %v4452_v56, %v1387_v2 }
 0x2d5   :  { %v1389_v40 = vrot.slane %v1388_v54, 4 }
 0x2d7   :  { %v1390_v12 = vadd.f32 %v1389_v40, %v1388_v54 }
 0x2d9   :  { %v1391_v16 = vrot.slane %v1390_v12, 2 }
 0x2db   :  { %v1392_v44 = vadd.f32 %v1391_v16, %v1390_v12 }
 0x2dd   :  { %v1393_v25 = vrot.slane %v1392_v44, 1 }
 0x2df   :  { %v1394_v59 = vadd.f32 %v1393_v25, %v1392_v44 }
 0x2e1   :  { %4453 = vrcp.f32 %v1394_v59 }
 0x2eb   :  { %v4454_v30 = vpop.eup %4453 }
 0x2ec   :  { %v1396_v6 = vmul.f32 %v4454_v30, %v5478_v62  ;;  %v1397_v52 = vmul.f32 %v4454_v30, %v5480_v24  ;;  %v1398_v57 = vmul.f32 %v4454_v30, %v4426_v15  ;;  %v1399_v19 = vmul.f32 %v4454_v30, %v4428_v14 }
 0x2ed   :  { %v1400_v58 = vmul.f32 %v4454_v30, %v4430_v9  ;;  %v1401_v33 = vmul.f32 %v4454_v30, %v4432_v43  ;;  %v1402_v35 = vmul.f32 %v4454_v30, %v4434_v23  ;;  %v1403_v37 = vmul.f32 %v4454_v30, %v4436_v42  ;;  %v3363_v42 = vld [vmem:[%s6208_s3 + $0x88] sm:$0xff]  ;;  %v3362_v23 = vld [vmem:[%s6208_s3 + $0x80] sm:$0xff] }
 0x2ee   :  { %v4221_v13 = vpack.c.bf16 %v1397_v52, %v1396_v6  ;;  %v4225_v2 = vpack.c.bf16 %v1399_v19, %v1398_v57  ;;  %v1404_v61 = vmul.f32 %v4454_v30, %v4438_v4  ;;  %v1405_v40 = vmul.f32 %v4454_v30, %v4440_v55  ;;  %v3366_v4 = vld [vmem:[%s6208_s3 + $0xa0] sm:$0xff]  ;;  %v3369_v52 = vld [vmem:[%s6208_s3 + $0xb8] sm:$0xff]  ;;  %v3364_v57 = vld [vmem:[%s6208_s3 + $0x90] sm:$0xff] }
 0x2ef   :  { %v4229_v54 = vpack.c.bf16 %v1401_v33, %v1400_v58  ;;  %v4233_v12 = vpack.c.bf16 %v1403_v37, %v1402_v35  ;;  %v1406_v16 = vmul.f32 %v4454_v30, %v4442_v60  ;;  %v1407_v44 = vmul.f32 %v4454_v30, %v4444_v53  ;;  %v3367_v53 = vld [vmem:[%s6208_s3 + $0xa8] sm:$0xff]  ;;  %v3368_v58 = vld [vmem:[%s6208_s3 + $0xb0] sm:$0xff] }
 0x2f0   :  { %4222 = vmatprep.subr.bf16.mxu1 %v4221_v13  ;;  %v4237_v25 = vpack.c.bf16 %v1405_v40, %v1404_v61  ;;  %v1408_v59 = vmul.f32 %v4454_v30, %v4446_v34  ;;  %v1409_v62 = vmul.f32 %v4454_v30, %v4448_v38  ;;  %v1410_v15 = vmul.f32 %v4454_v30, %v4450_v1  ;;  %v3365_v1 = vld [vmem:[%s6208_s3 + $0x98] sm:$0xff] }
 0x2f1   :  { %4224 = vmatpush3.bf16.msra.mxu1 %v4221_v13  ;;  %v4241_v24 = vpack.c.bf16 %v1407_v44, %v1406_v16  ;;  %v1411_v14 = vmul.f32 %v4454_v30, %v4452_v56  ;;  %v910_v61 = vadd.f32 %v4943_v26, %v4894_v20  ;;  %v915_v13 = vadd.f32 %v4949_v29, %v4896_v21  ;;  %v3371_v44 = vld [vmem:[%s6208_s3 + $0xc8] sm:$0xff] }
 0x2f2   :  { %4226 = vmatprep.subr.bf16.mxu1 %v4225_v2  ;;  %v4245_v9 = vpack.c.bf16 %v1409_v62, %v1408_v59  ;;  %v920_v30 = vadd.f32 %v4947_v17, %v4898_v22  ;;  %v925_v35 = vadd.f32 %v4953_v18, %v4900_v28  ;;  %v935_v20 = vadd.f32 %v4957_v32, %v5031_v5  ;;  %v6266_v22 = vld [vmem:[#allocation3_spill] sm:$0xff]  ;;  %v6267_v28 = vld [vmem:[#allocation4_spill] sm:$0xff]  ;;  %v3370_v59 = vld [vmem:[%s6208_s3 + $0xc0] sm:$0xff] }
 0x2f3   :  { %v4249_v43 = vpack.c.bf16 %v1411_v14, %v1410_v15  ;;  %v940_v21 = vadd.f32 %v4955_v31, %v5050_v3 }
 0x2f5   :  { %4228 = vmatpush3.bf16.msra.mxu1 %v4225_v2 }
 0x2f6   :  { %4230 = vmatprep.subr.bf16.mxu1 %v4229_v54 }
 0x2f9   :  { %4232 = vmatpush3.bf16.msra.mxu1 %v4229_v54 }
 0x2fa   :  { %4234 = vmatprep.subr.bf16.mxu1 %v4233_v12 }
 0x2fd   :  { %4236 = vmatpush3.bf16.msra.mxu1 %v4233_v12 }
 0x2fe   :  { %4238 = vmatprep.subr.bf16.mxu1 %v4237_v25 }
 0x301   :  { %4240 = vmatpush3.bf16.msra.mxu1 %v4237_v25 }
 0x302   :  { %4242 = vmatprep.subr.bf16.mxu1 %v4241_v24 }
 0x305   :  { %4244 = vmatpush3.bf16.msra.mxu1 %v4241_v24 }
 0x306   :  { %4246 = vmatprep.subr.bf16.mxu1 %v4245_v9 }
 0x309   :  { %4248 = vmatpush3.bf16.msra.mxu1 %v4245_v9 }
 0x30a   :  { %4250 = vmatprep.subr.bf16.mxu1 %v4249_v43 }
 0x30d   :  { %4252 = vmatpush3.bf16.msra.mxu1 %v4249_v43  ;;  %v3373_v43 = vld [vmem:[%s6208_s3 + $0xd8] sm:$0xff] }
 0x30e   :  { %4254 = vmatprep.subr.bf16.mxu1 %v4902_v46 }
 0x310   :  { %3949 = vmatmul.mubr.f32.vlgmr.msra.gmra.mrb[16].mxu1 %v910_v61 }
 0x311   :  { %3951 = vmatprep.mubr.f32.mxu1 %v915_v13  ;;  %4256 = vmatpush3.bf16.msra.mxu1 %v4902_v46  ;;  %v6268_v46 = vld [vmem:[#allocation5_spill] sm:$0xff]  ;;  %v3372_v13 = vld [vmem:[%s6208_s3 + $0xd0] sm:$0xff] }
 0x312   :  { %4258 = vmatprep.subr.bf16.mxu1 %v4904_v51 }
 0x314   :  { %3952 = vmatmul.mubr.f32.gmra.mrb[18].mxu1 %v920_v30 }
 0x315   :  { %3954 = vmatprep.mubr.f32.mxu1 %v925_v35  ;;  %4260 = vmatpush3.bf16.msra.mxu1 %v4904_v51 }
 0x318   :  { %3955 = vmatmul.mubr.f32.gmra.mrb[20].mxu1 %v5170_v27 }
 0x319   :  { %3957 = vmatprep.mubr.f32.mxu1 %v935_v20 }
 0x31c   :  { %3958 = vmatmul.mubr.f32.gmra.mrb[22].mxu1 %v940_v21 }
 0x31d   :  { %3968 = vmatprep.mubr.msk.f32.mxu1 %vm1111_vm1, %v5064_v41 }
 0x320   :  { %3969 = vmatmul.mubr.msk.f32.vlgmr.msra.gmra.mrb[24].mxu1 %vm1111_vm1, %v5078_v50 }
 0x321   :  { %3971 = vmatprep.mubr.msk.f32.mxu1 %vm1111_vm1, %v5092_v0 }
 0x324   :  { %3972 = vmatmul.mubr.msk.f32.gmra.mrb[26].mxu1 %vm1111_vm1, %v5106_v8 }
 0x325   :  { %3974 = vmatprep.mubr.msk.f32.mxu1 %vm1111_vm1, %v5113_v11 }
 0x328   :  { %3975 = vmatmul.mubr.msk.f32.gmra.mrb[28].mxu1 %vm1111_vm1, %v5122_v36 }
 0x329   :  { %3977 = vmatprep.mubr.msk.f32.mxu1 %vm1111_vm1, %v5129_v48 }
 0x32c   :  { %3978 = vmatmul.mubr.msk.f32.gmra.mrb[30].mxu1 %vm1111_vm1, %v5140_v63 }
 0x32d   :  { %3980 = vmatprep.mubr.msk.f32.mxu1 %vm1111_vm1, %v5147_v7 }
 0x330   :  { %3981 = vmatmul.mubr.msk.f32.gmra.mrb[32].mxu1 %vm1111_vm1, %v5150_v10 }
 0x331   :  { %3983 = vmatprep.mubr.msk.f32.mxu1 %vm1111_vm1, %v5156_v39 }
 0x334   :  { %3984 = vmatmul.mubr.msk.f32.gmra.mrb[34].mxu1 %vm1111_vm1, %v5158_v45 }
 0x335   :  { %3986 = vmatprep.mubr.msk.f32.mxu1 %vm1111_vm1, %v5160_v47 }
 0x338   :  { %3987 = vmatmul.mubr.msk.f32.gmra.mrb[36].mxu1 %vm1111_vm1, %v5162_v49 }
 0x339   :  { %3989 = vmatprep.mubr.msk.f32.mxu1 %vm1111_vm1, %v6266_v22 }
 0x33c   :  { %3990 = vmatmul.mubr.msk.f32.gmra.mrb[38].mxu1 %vm1111_vm1, %v6267_v28  ;;  %v3375_v28 = vld [vmem:[%s6208_s3 + $0xe8] sm:$0xff] }
 0x33d   :  { %4024 = vmatprep.mubr.f32.mxu1 %v6268_v46 }
 0x3e3   :  { %v3950_v51 = vpop.f32.mrb[16].mxu1 }
 0x3e4   :  { %v3355_v26 = vclamps-f32 %v3950_v51, 1.0  ;;  %v1478_v17 = vpop.f32.mrb[17].mxu1  ;;  %v3374_v51 = vld [vmem:[%s6208_s3 + $0xe0] sm:$0xff] }
 0x3e5   :  { %v3354_v29 = vclamps-f32 %v1478_v17, 1.0 }
 0x3e7   :  { %v5543_v18 = vpack.c.bf16 %v3355_v26, %v3354_v29  ;;  %v3953_v31 = vpop.f32.mrb[18].mxu1 }
 0x3e8   :  { %v3357_v32 = vclamps-f32 %v3953_v31, 1.0  ;;  %v1488_v5 = vpop.f32.mrb[19].mxu1 }
 0x3e9   :  { %v3356_v3 = vclamps-f32 %v1488_v5, 1.0  ;;  %v3377_v5 = vld [vmem:[%s6208_s3 + $0xf8] sm:$0xff] }
 0x3eb   :  { %v5545_v41 = vpack.c.bf16 %v3357_v32, %v3356_v3  ;;  %v3956_v50 = vpop.f32.mrb[20].mxu1 }
 0x3ec   :  { %v3359_v0 = vclamps-f32 %v3956_v50, 1.0  ;;  %v1498_v8 = vpop.f32.mrb[21].mxu1  ;;  %v3376_v50 = vld [vmem:[%s6208_s3 + $0xf0] sm:$0xff] }
 0x3ed   :  { %v3358_v11 = vclamps-f32 %v1498_v8, 1.0 }
 0x3ef   :  { %v5547_v36 = vpack.c.bf16 %v3359_v0, %v3358_v11  ;;  %v3959_v48 = vpop.f32.mrb[22].mxu1 }
 0x3f0   :  { %v3361_v63 = vclamps-f32 %v3959_v48, 1.0  ;;  %v1508_v7 = vpop.f32.mrb[23].mxu1 }
 0x3f1   :  { %v3360_v10 = vclamps-f32 %v1508_v7, 1.0 }
 0x3f3   :  { %v5549_v39 = vpack.c.bf16 %v3361_v63, %v3360_v10  ;;  %v3970_v45 = vpop.f32.mrb[24].mxu1 }
 0x3f4   :  { %v1696_v47 = vpop.f32.mrb[25].mxu1  ;;  %v5563_v55 = vadd.f32 %v3970_v45, %v3363_v42 }
 0x3f5   :  { %v5567_v38 = vadd.f32 %v3362_v23, %v1696_v47 }
 0x3f7   :  { %v3973_v49 = vpop.f32.mrb[26].mxu1 }
 0x3f8   :  { %v1706_v27 = vpop.f32.mrb[27].mxu1  ;;  %v5587_v2 = vadd.f32 %v3973_v49, %v3365_v1 }
 0x3f9   :  { %v5591_v12 = vadd.f32 %v3364_v57, %v1706_v27 }
 0x3fb   :  { %v3976_v56 = vpop.f32.mrb[28].mxu1 }
 0x3fc   :  { %v5565_v60 = vadd.f32 %v3976_v56, %v3367_v53  ;;  %v1716_v34 = vpop.f32.mrb[29].mxu1 }
 0x3fd   :  { %v5572_v6 = vadd.f32 %v3366_v4, %v1716_v34 }
 0x3fe   :  { %v1776_v19 = vmax.f32 %v5563_v55, %v5565_v60 }
 0x3ff   :  { %v1775_v33 = vmax.f32 %v5567_v38, %v5572_v6  ;;  %v3979_v37 = vpop.f32.mrb[30].mxu1 }
 0x400   :  { %v5589_v40 = vadd.f32 %v3979_v37, %v3369_v52  ;;  %v1726_v54 = vpop.f32.mrb[31].mxu1 }
 0x401   :  { %v5593_v16 = vadd.f32 %v3368_v58, %v1726_v54 }
 0x402   :  { %v1778_v25 = vmax.f32 %v5587_v2, %v5589_v40 }
 0x403   :  { %v1777_v62 = vmax.f32 %v5591_v12, %v5593_v16  ;;  %v3982_v24 = vpop.f32.mrb[32].mxu1 }
 0x404   :  { %v5605_v15 = vadd.f32 %v3982_v24, %v3371_v44  ;;  %v1736_v14 = vpop.f32.mrb[33].mxu1 }
 0x405   :  { %v5607_v9 = vadd.f32 %v3370_v59, %v1736_v14 }
 0x406   :  { %v1780_v61 = vmax.f32 %v1776_v19, %v5605_v15 }
 0x407   :  { %v1779_v30 = vmax.f32 %v1775_v33, %v5607_v9  ;;  %v3985_v35 = vpop.f32.mrb[34].mxu1 }
 0x408   :  { %v5617_v20 = vadd.f32 %v3985_v35, %v3373_v43  ;;  %v1746_v21 = vpop.f32.mrb[35].mxu1 }
 0x409   :  { %v5619_v22 = vadd.f32 %v3372_v13, %v1746_v21 }
 0x40a   :  { %v1782_v46 = vmax.f32 %v1778_v25, %v5617_v20 }
 0x40b   :  { %v1781_v26 = vmax.f32 %v1777_v62, %v5619_v22  ;;  %v3988_v17 = vpop.f32.mrb[36].mxu1 }
 0x40c   :  { %v5629_v29 = vadd.f32 %v3988_v17, %v3375_v28  ;;  %v1756_v31 = vpop.f32.mrb[37].mxu1 }
 0x40d   :  { %v5631_v32 = vadd.f32 %v3374_v51, %v1756_v31 }
 0x40e   :  { %v1784_v3 = vmax.f32 %v1780_v61, %v5629_v29 }
 0x40f   :  { %v1783_v0 = vmax.f32 %v1779_v30, %v5631_v32  ;;  %v3991_v8 = vpop.f32.mrb[38].mxu1 }
 0x410   :  { %v5641_v11 = vadd.f32 %v3991_v8, %v3377_v5  ;;  %v1766_v48 = vpop.f32.mrb[39].mxu1 }
 0x411   :  { %v1787_v63 = vmax.f32 %v1783_v0, %v1784_v3  ;;  %v5643_v7 = vadd.f32 %v3376_v50, %v1766_v48 }
 0x412   :  { %v1786_v10 = vmax.f32 %v1782_v46, %v5641_v11 }
 0x413   :  { %v1785_v45 = vmax.f32 %v1781_v26, %v5643_v7 }
 0x415   :  { %v1788_v47 = vmax.f32 %v1785_v45, %v1786_v10 }
 0x417   :  { %v1789_v49 = vmax.f32 %v1787_v63, %v1788_v47 }
 0x419   :  { %v1790_v27 = vrot.slane %v1789_v49, 4 }
 0x41b   :  { %v1791_v42 = vmax.f32 %v1789_v49, %v1790_v27 }
 0x41d   :  { %v1792_v53 = vrot.slane %v1791_v42, 2 }
 0x41f   :  { %v1793_v23 = vmax.f32 %v1791_v42, %v1792_v53 }
 0x421   :  { %v1794_v4 = vrot.slane %v1793_v23, 1 }
 0x423   :  { %v1795_v56 = vmax.f32 %v1793_v23, %v1794_v4 }
 0x425   :  { %v1796_v34 = vsub.f32 %v5567_v38, %v1795_v56  ;;  %v1797_v1 = vsub.f32 %v5563_v55, %v1795_v56  ;;  %v1798_v52 = vsub.f32 %v5591_v12, %v1795_v56  ;;  %v1799_v57 = vsub.f32 %v5587_v2, %v1795_v56 }
 0x426   :  { %v1800_v19 = vsub.f32 %v5572_v6, %v1795_v56  ;;  %v1801_v58 = vsub.f32 %v5565_v60, %v1795_v56  ;;  %v1802_v33 = vsub.f32 %v5593_v16, %v1795_v56  ;;  %v1803_v37 = vsub.f32 %v5589_v40, %v1795_v56 }
 0x427   :  { %v1804_v54 = vsub.f32 %v5607_v9, %v1795_v56  ;;  %v1805_v44 = vsub.f32 %v5605_v15, %v1795_v56  ;;  %v1806_v38 = vsub.f32 %v5619_v22, %v1795_v56  ;;  %v1807_v55 = vsub.f32 %v5617_v20, %v1795_v56 }
 0x428   :  { %v1808_v12 = vsub.f32 %v5631_v32, %v1795_v56  ;;  %v1809_v2 = vsub.f32 %v5629_v29, %v1795_v56  ;;  %v1810_v6 = vsub.f32 %v5643_v7, %v1795_v56  ;;  %v1811_v60 = vsub.f32 %v5641_v11, %v1795_v56 }
 0x429   :  { %v1812_v25 = vmul.f32 1.442695, %v1796_v34  ;;  %v1814_v16 = vmul.f32 1.442695, %v1797_v1  ;;  %v1816_v59 = vmul.f32 1.442695, %v1798_v52 }
 0x42a   :  { %v1818_v40 = vmul.f32 1.442695, %v1799_v57  ;;  %v1820_v62 = vmul.f32 1.442695, %v1800_v19  ;;  %v1822_v24 = vmul.f32 1.442695, %v1801_v58 }
 0x42b   :  { %4455 = vpow2.f32 %v1812_v25  ;;  %v1824_v15 = vmul.f32 1.442695, %v1802_v33  ;;  %v1826_v14 = vmul.f32 1.442695, %v1803_v37  ;;  %v1828_v61 = vmul.f32 1.442695, %v1804_v54 }
 0x42c   :  { %4457 = vpow2.f32 %v1814_v16  ;;  %v1830_v35 = vmul.f32 1.442695, %v1805_v44  ;;  %v1832_v22 = vmul.f32 1.442695, %v1806_v38  ;;  %v1834_v51 = vmul.f32 1.442695, %v1807_v55 }
 0x42d   :  { %4459 = vpow2.f32 %v1816_v59  ;;  %v1836_v29 = vmul.f32 1.442695, %v1808_v12  ;;  %v1838_v5 = vmul.f32 1.442695, %v1809_v2  ;;  %v1840_v0 = vmul.f32 1.442695, %v1810_v6 }
 0x42e   :  { %4461 = vpow2.f32 %v1818_v40  ;;  %v1842_v48 = vmul.f32 1.442695, %v1811_v60 }
 0x42f   :  { %4463 = vpow2.f32 %v1820_v62 }
 0x430   :  { %4465 = vpow2.f32 %v1822_v24 }
 0x431   :  { %4467 = vpow2.f32 %v1824_v15 }
 0x432   :  { %4469 = vpow2.f32 %v1826_v14 }
 0x433   :  { %4471 = vpow2.f32 %v1828_v61 }
 0x434   :  { %4473 = vpow2.f32 %v1830_v35 }
 0x435   :  { %v4456_v9 = vpop.eup %4455  ;;  %4475 = vpow2.f32 %v1832_v22 }
 0x436   :  { %v4458_v43 = vpop.eup %4457  ;;  %4477 = vpow2.f32 %v1834_v51 }
 0x437   :  { %v1844_v13 = vadd.f32 %v4458_v43, %v4456_v9  ;;  %v4460_v30 = vpop.eup %4459  ;;  %4479 = vpow2.f32 %v1836_v29  ;;  %v6270_v29 = vld [vmem:[#allocation6_spill] sm:$0xff] }
 0x438   :  { %v4462_v21 = vpop.eup %4461  ;;  %4481 = vpow2.f32 %v1838_v5 }
 0x439   :  { %v1845_v20 = vadd.f32 %v4460_v30, %v1844_v13  ;;  %v4464_v46 = vpop.eup %4463  ;;  %4483 = vpow2.f32 %v1840_v0  ;;  %v6275_v0 = vld [vmem:[#allocation15_spill] sm:$0xff] }
 0x43a   :  { %v4466_v17 = vpop.eup %4465  ;;  %4485 = vpow2.f32 %v1842_v48  ;;  %v6277_v48 = vld [vmem:[#allocation14_spill] sm:$0xff] }
 0x43b   :  { %v1846_v28 = vadd.f32 %v4462_v21, %v1845_v20  ;;  %v4468_v32 = vpop.eup %4467 }
 0x43c   :  { %v4470_v50 = vpop.eup %4469 }
 0x43d   :  { %v1847_v26 = vadd.f32 %v4464_v46, %v1846_v28  ;;  %v4472_v11 = vpop.eup %4471 }
 0x43e   :  { %v4474_v7 = vpop.eup %4473 }
 0x43f   :  { %v1848_v31 = vadd.f32 %v4466_v17, %v1847_v26  ;;  %v4476_v45 = vpop.eup %4475 }
 0x440   :  { %v4478_v49 = vpop.eup %4477 }
 0x441   :  { %v1849_v3 = vadd.f32 %v4468_v32, %v1848_v31  ;;  %v4480_v42 = vpop.eup %4479  ;;  %v6271_v31 = vld [vmem:[#allocation7_spill] sm:$0xff] }
 0x442   :  { %v4482_v23 = vpop.eup %4481 }
 0x443   :  { %v1850_v8 = vadd.f32 %v4470_v50, %v1849_v3  ;;  %v4484_v56 = vpop.eup %4483  ;;  %v6273_v3 = vld [vmem:[#allocation8_spill] sm:$0xff] }
 0x444   :  { %v4486_v1 = vpop.eup %4485 }
 0x445   :  { %v1851_v63 = vadd.f32 %v4472_v11, %v1850_v8  ;;  %v6276_v8 = vld [vmem:[#allocation11_spill] sm:$0xff] }
 0x447   :  { %v1852_v10 = vadd.f32 %v4474_v7, %v1851_v63  ;;  %v6278_v63 = vld [vmem:[#allocation12_spill] sm:$0xff] }
 0x449   :  { %v1853_v47 = vadd.f32 %v4476_v45, %v1852_v10 }
 0x44b   :  { %v1854_v27 = vadd.f32 %v4478_v49, %v1853_v47 }
 0x44d   :  { %v1855_v53 = vadd.f32 %v4480_v42, %v1854_v27  ;;  %v6282_v27 = vld [vmem:[#allocation34_spill] sm:$0xff] }
 0x44f   :  { %v1856_v4 = vadd.f32 %v4482_v23, %v1855_v53  ;;  %v6284_v53 = vld [vmem:[#allocation35_spill] sm:$0xff] }
 0x451   :  { %v1857_v34 = vadd.f32 %v4484_v56, %v1856_v4  ;;  %v6285_v4 = vld [vmem:[#allocation36_spill] sm:$0xff] }
 0x453   :  { %v1858_v52 = vadd.f32 %v4486_v1, %v1857_v34  ;;  %v6287_v34 = vld [vmem:[#allocation38_spill] sm:$0xff] }
 0x455   :  { %v1859_v57 = vrot.slane %v1858_v52, 4 }
 0x457   :  { %v1860_v19 = vadd.f32 %v1859_v57, %v1858_v52  ;;  %v6288_v52 = vld [vmem:[#allocation39_spill] sm:$0xff]  ;;  %v6289_v57 = vld [vmem:[#allocation40_spill] sm:$0xff] }
 0x459   :  { %v1861_v58 = vrot.slane %v1860_v19, 2 }
 0x45b   :  { %v1862_v33 = vadd.f32 %v1861_v58, %v1860_v19  ;;  %v6290_v19 = vld [vmem:[#allocation41_spill] sm:$0xff] }
 0x45d   :  { %v1863_v37 = vrot.slane %v1862_v33, 1 }
 0x45f   :  { %v1864_v54 = vadd.f32 %v1863_v37, %v1862_v33  ;;  %v6291_v33 = vld [vmem:[#allocation42_spill] sm:$0xff]  ;;  %v6292_v37 = vld [vmem:[#allocation43_spill] sm:$0xff] }
 0x461   :  { %4487 = vrcp.f32 %v1864_v54  ;;  %v6293_v54 = vld [vmem:[#allocation44_spill] sm:$0xff] }
 0x46b   :  { %v4488_v44 = vpop.eup %4487 }
 0x46c   :  { %v1866_v38 = vmul.f32 %v4488_v44, %v4456_v9  ;;  %v1867_v55 = vmul.f32 %v4488_v44, %v4458_v43  ;;  %v1868_v12 = vmul.f32 %v4488_v44, %v4460_v30  ;;  %v1869_v2 = vmul.f32 %v4488_v44, %v4462_v21 }
 0x46d   :  { %v1870_v6 = vmul.f32 %v4488_v44, %v4464_v46  ;;  %v1871_v60 = vmul.f32 %v4488_v44, %v4466_v17  ;;  %v1872_v25 = vmul.f32 %v4488_v44, %v4468_v32  ;;  %v1873_v16 = vmul.f32 %v4488_v44, %v4470_v50  ;;  %v2506_v46 = vpop.trf.xlu1  ;;  %v6269_v17 = vld [vmem:[#allocation9_spill] sm:$0xff]  ;;  %v6274_v50 = vld [vmem:[#allocation10_spill] sm:$0xff] }
 0x46e   :  { %v4261_v59 = vpack.c.bf16 %v1867_v55, %v1866_v38  ;;  %v4265_v40 = vpack.c.bf16 %v1869_v2, %v1868_v12  ;;  %v1874_v62 = vmul.f32 %v4488_v44, %v4472_v11  ;;  %v1875_v24 = vmul.f32 %v4488_v44, %v4474_v7  ;;  %v6272_v32 = vld [vmem:[#allocation13_spill] sm:$0xff]  ;;  %v6279_v7 = vld [vmem:[#allocation2_spill] sm:$0xff]  ;;  %v6296_v12 = vld [vmem:[#allocation47_spill] sm:$0xff] }
 0x46f   :  { %v4269_v15 = vpack.c.bf16 %v1871_v60, %v1870_v6  ;;  %v4273_v14 = vpack.c.bf16 %v1873_v16, %v1872_v25  ;;  %v1876_v61 = vmul.f32 %v4488_v44, %v4476_v45  ;;  %v1877_v13 = vmul.f32 %v4488_v44, %v4478_v49  ;;  %v6280_v45 = vld [vmem:[#allocation29_spill] sm:$0xff]  ;;  %v6295_v55 = vld [vmem:[#allocation46_spill] sm:$0xff] }
 0x470   :  { %4262 = vmatprep.subr.bf16.mxu1 %v4261_v59  ;;  %v4277_v35 = vpack.c.bf16 %v1875_v24, %v1874_v62  ;;  %v1878_v20 = vmul.f32 %v4488_v44, %v4480_v42  ;;  %v1879_v22 = vmul.f32 %v4488_v44, %v4482_v23  ;;  %v1880_v9 = vmul.f32 %v4488_v44, %v4484_v56  ;;  %v6281_v49 = vld [vmem:[#allocation33_spill] sm:$0xff]  ;;  %v6283_v42 = vld [vmem:[#allocation16_spill] sm:$0xff] }
 0x471   :  { %4264 = vmatpush3.bf16.msra.mxu1 %v4261_v59  ;;  %v4281_v43 = vpack.c.bf16 %v1877_v13, %v1876_v61  ;;  %v1881_v30 = vmul.f32 %v4488_v44, %v4486_v1  ;;  %v2507_v51 = vpop.trf.xlu1  ;;  %v980_v10 = vadd.f32 %v6279_v7, %v6278_v63  ;;  %v6286_v56 = vld [vmem:[#allocation37_spill] sm:$0xff] }
 0x472   :  { %4266 = vmatprep.subr.bf16.mxu1 %v4265_v40  ;;  %v4285_v21 = vpack.c.bf16 %v1879_v22, %v1878_v20  ;;  %v6294_v38 = vld [vmem:[#allocation45_spill] sm:$0xff] }
 0x473   :  { %v4289_v28 = vpack.c.bf16 %v1881_v30, %v1880_v9 }
 0x475   :  { %4268 = vmatpush3.bf16.msra.mxu1 %v4265_v40  ;;  %v2508_v26 = vpop.trf.xlu1 }
 0x476   :  { %4270 = vmatprep.subr.bf16.mxu1 %v4269_v15 }
 0x479   :  { %4272 = vmatpush3.bf16.msra.mxu1 %v4269_v15  ;;  %v2509_v5 = vpop.trf.xlu1 }
 0x47a   :  { %4274 = vmatprep.subr.bf16.mxu1 %v4273_v14 }
 0x47d   :  { %4276 = vmatpush3.bf16.msra.mxu1 %v4273_v14  ;;  %v2510_v11 = vpop.trf.xlu1 }
 0x47e   :  { %4278 = vmatprep.subr.bf16.mxu1 %v4277_v35 }
 0x481   :  { %4280 = vmatpush3.bf16.msra.mxu1 %v4277_v35  ;;  %v2511_v47 = vpop.trf.xlu1 }
 0x482   :  { %4282 = vmatprep.subr.bf16.mxu1 %v4281_v43 }
 0x485   :  { %4284 = vmatpush3.bf16.msra.mxu1 %v4281_v43  ;;  %v2512_v23 = vpop.trf.xlu1 }
 0x486   :  { %4286 = vmatprep.subr.bf16.mxu1 %v4285_v21 }
 0x489   :  { %4288 = vmatpush3.bf16.msra.mxu1 %v4285_v21  ;;  %v2513_v1 = vpop.trf.xlu1 }
 0x48a   :  { %4290 = vmatprep.subr.bf16.mxu1 %v4289_v28 }
 0x48d   :  { %4292 = vmatpush3.bf16.msra.mxu1 %v4289_v28  ;;  %v2514_v58 = vpop.trf.xlu1 }
 0x48e   :  { %4294 = vmatprep.subr.bf16.mxu1 %v6269_v17 }
 0x490   :  { %4025 = vmatmul.mubr.f32.vlgmr.msra.gmra.mrb[40].mxu1 %v6270_v29 }
 0x491   :  { %4027 = vmatprep.mubr.f32.mxu1 %v6271_v31  ;;  %4296 = vmatpush3.bf16.msra.mxu1 %v6269_v17  ;;  %v2515_v44 = vpop.trf.xlu1 }
 0x492   :  { %4298 = vmatprep.subr.bf16.mxu1 %v6272_v32 }
 0x494   :  { %4028 = vmatmul.mubr.f32.gmra.mrb[42].mxu1 %v6273_v3 }
 0x495   :  { %4030 = vmatprep.mubr.f32.mxu1 %v6274_v50  ;;  %4300 = vmatpush3.bf16.msra.mxu1 %v6272_v32  ;;  %v2516_v2 = vpop.trf.xlu1  ;;  %v3403_v50 = vld [vmem:[%s6208_s3 + $0x108] sm:$0xff] }
 0x496   :  { %4334 = vmatprep.subr.bf16.mxu1 %v6275_v0 }
 0x498   :  { %4031 = vmatmul.mubr.f32.gmra.mrb[44].mxu1 %v6276_v8  ;;  %v3402_v8 = vld [vmem:[%s6208_s3 + $0x100] sm:$0xff] }
 0x499   :  { %4033 = vmatprep.mubr.f32.mxu1 %v6277_v48  ;;  %v2517_v6 = vpop.trf.xlu1 }
 0x49c   :  { %4034 = vmatmul.mubr.f32.gmra.mrb[46].mxu1 %v980_v10 }
 0x49d   :  { %4044 = vmatprep.mubr.msk.f32.mxu1 %vm1111_vm1, %v6280_v45  ;;  %v2518_v60 = vpop.trf.xlu1 }
 0x4a0   :  { %4045 = vmatmul.mubr.msk.f32.vlgmr.msra.gmra.mrb[48].mxu1 %vm1111_vm1, %v6281_v49 }
 0x4a1   :  { %4336 = vmatpush3.bf16.msra.mxu1 %v6275_v0  ;;  %4047 = vmatprep.mubr.msk.f32.mxu1 %vm1111_vm1, %v6282_v27  ;;  %v2519_v25 = vpop.trf.xlu1  ;;  %v3407_v0 = vld [vmem:[%s6208_s3 + $0x128] sm:$0xff]  ;;  %v3409_v27 = vld [vmem:[%s6208_s3 + $0x138] sm:$0xff] }
 0x4a2   :  { %4338 = vmatprep.subr.bf16.mxu1 %v6283_v42 }
 0x4a4   :  { %4048 = vmatmul.mubr.msk.f32.gmra.mrb[50].mxu1 %vm1111_vm1, %v6284_v53 }
 0x4a5   :  { %4340 = vmatpush3.bf16.msra.mxu1 %v6283_v42  ;;  %4050 = vmatprep.mubr.msk.f32.mxu1 %vm1111_vm1, %v6285_v4  ;;  %v2520_v16 = vpop.trf.xlu1  ;;  %v3404_v42 = vld [vmem:[%s6208_s3 + $0x110] sm:$0xff] }
 0x4a8   :  { %4051 = vmatmul.mubr.msk.f32.gmra.mrb[52].mxu1 %vm1111_vm1, %v6286_v56 }
 0x4a9   :  { %4053 = vmatprep.mubr.msk.f32.mxu1 %vm1111_vm1, %v6287_v34  ;;  %v2521_v59 = vpop.trf.xlu1 }
 0x4ac   :  { %4054 = vmatmul.mubr.msk.f32.gmra.mrb[54].mxu1 %vm1111_vm1, %v6288_v52 }
 0x4ad   :  { %4056 = vmatprep.mubr.msk.f32.mxu1 %vm1111_vm1, %v6289_v57 }
 0x4b0   :  { %4057 = vmatmul.mubr.msk.f32.gmra.mrb[56].mxu1 %vm1111_vm1, %v6290_v19 }
 0x4b1   :  { %4059 = vmatprep.mubr.msk.f32.mxu1 %vm1111_vm1, %v6291_v33 }
 0x4b4   :  { %4060 = vmatmul.mubr.msk.f32.gmra.mrb[58].mxu1 %vm1111_vm1, %v6292_v37  ;;  %v3410_v37 = vld [vmem:[%s6208_s3 + $0x140] sm:$0xff] }
 0x4b5   :  { %4062 = vmatprep.mubr.msk.f32.mxu1 %vm1111_vm1, %v6293_v54 }
 0x4b8   :  { %4063 = vmatmul.mubr.msk.f32.gmra.mrb[60].mxu1 %vm1111_vm1, %v6294_v38 }
 0x4b9   :  { %4065 = vmatprep.mubr.msk.f32.mxu1 %vm1111_vm1, %v6295_v55 }
 0x4bc   :  { %4066 = vmatmul.mubr.msk.f32.gmra.mrb[62].mxu1 %vm1111_vm1, %v6296_v12 }
 0x4bd   :  { %4120 = vmatprep.mubr.msk.f32.mxu1 %vm1111_vm1, %v2506_v46 }
 0x4c0   :  { %4121 = vmatmul.mubr.msk.f32.vlgmr.msra.gmra.mrb[64].mxu1 %vm1111_vm1, %v2507_v51 }
 0x4c1   :  { %4123 = vmatprep.mubr.msk.f32.mxu1 %vm1111_vm1, %v2508_v26 }
 0x4c4   :  { %4124 = vmatmul.mubr.msk.f32.gmra.mrb[66].mxu1 %vm1111_vm1, %v2509_v5 }
 0x4c5   :  { %4126 = vmatprep.mubr.msk.f32.mxu1 %vm1111_vm1, %v2510_v11  ;;  %v3406_v11 = vld [vmem:[%s6208_s3 + $0x120] sm:$0xff] }
 0x4c8   :  { %4127 = vmatmul.mubr.msk.f32.gmra.mrb[68].mxu1 %vm1111_vm1, %v2511_v47  ;;  %v3405_v47 = vld [vmem:[%s6208_s3 + $0x118] sm:$0xff] }
 0x4c9   :  { %4129 = vmatprep.mubr.msk.f32.mxu1 %vm1111_vm1, %v2512_v23  ;;  %v3408_v23 = vld [vmem:[%s6208_s3 + $0x130] sm:$0xff] }
 0x4cc   :  { %4130 = vmatmul.mubr.msk.f32.gmra.mrb[70].mxu1 %vm1111_vm1, %v2513_v1 }
 0x4cd   :  { %4132 = vmatprep.mubr.msk.f32.mxu1 %vm1111_vm1, %v2514_v58  ;;  %v3411_v58 = vld [vmem:[%s6208_s3 + $0x148] sm:$0xff] }
 0x4d0   :  { %4133 = vmatmul.mubr.msk.f32.gmra.mrb[72].mxu1 %vm1111_vm1, %v2515_v44 }
 0x4d1   :  { %4135 = vmatprep.mubr.msk.f32.mxu1 %vm1111_vm1, %v2516_v2  ;;  %v3413_v2 = vld [vmem:[%s6208_s3 + $0x158] sm:$0xff] }
 0x4d4   :  { %4136 = vmatmul.mubr.msk.f32.gmra.mrb[74].mxu1 %vm1111_vm1, %v2517_v6 }
 0x4d5   :  { %4138 = vmatprep.mubr.msk.f32.mxu1 %vm1111_vm1, %v2518_v60  ;;  %v3412_v60 = vld [vmem:[%s6208_s3 + $0x150] sm:$0xff] }
 0x4d8   :  { %4139 = vmatmul.mubr.msk.f32.gmra.mrb[76].mxu1 %vm1111_vm1, %v2519_v25 }
 0x4d9   :  { %4141 = vmatprep.mubr.msk.f32.mxu1 %vm1111_vm1, %v2520_v16 }
 0x4dc   :  { %4142 = vmatmul.mubr.msk.f32.gmra.mrb[78].mxu1 %vm1111_vm1, %v2521_v59 }
 0x563   :  { %v4026_v40 = vpop.f32.mrb[40].mxu1 }
 0x564   :  { %v3395_v62 = vclamps-f32 %v4026_v40, 1.0  ;;  %v1948_v24 = vpop.f32.mrb[41].mxu1 }
 0x565   :  { %v3394_v15 = vclamps-f32 %v1948_v24, 1.0  ;;  %v3415_v24 = vld [vmem:[%s6208_s3 + $0x168] sm:$0xff] }
 0x567   :  { %v5727_v14 = vpack.c.bf16 %v3395_v62, %v3394_v15  ;;  %v4029_v61 = vpop.f32.mrb[42].mxu1 }
 0x568   :  { %v3397_v13 = vclamps-f32 %v4029_v61, 1.0  ;;  %v1958_v35 = vpop.f32.mrb[43].mxu1  ;;  %v3414_v61 = vld [vmem:[%s6208_s3 + $0x160] sm:$0xff] }
 0x569   :  { %v3396_v20 = vclamps-f32 %v1958_v35, 1.0 }
 0x56b   :  { %v5729_v22 = vpack.c.bf16 %v3397_v13, %v3396_v20  ;;  %v4032_v9 = vpop.f32.mrb[44].mxu1 }
 0x56c   :  { %v3399_v43 = vclamps-f32 %v4032_v9, 1.0  ;;  %v1968_v30 = vpop.f32.mrb[45].mxu1 }
 0x56d   :  { %v3398_v21 = vclamps-f32 %v1968_v30, 1.0  ;;  %v3417_v30 = vld [vmem:[%s6208_s3 + $0x178] sm:$0xff] }
 0x56f   :  { %v5731_v28 = vpack.c.bf16 %v3399_v43, %v3398_v21  ;;  %v4035_v46 = vpop.f32.mrb[46].mxu1 }
 0x570   :  { %v3401_v51 = vclamps-f32 %v4035_v46, 1.0  ;;  %v1978_v26 = vpop.f32.mrb[47].mxu1  ;;  %v3416_v46 = vld [vmem:[%s6208_s3 + $0x170] sm:$0xff] }
 0x571   :  { %v3400_v17 = vclamps-f32 %v1978_v26, 1.0 }
 0x573   :  { %v5733_v29 = vpack.c.bf16 %v3401_v51, %v3400_v17  ;;  %v4046_v31 = vpop.f32.mrb[48].mxu1 }
 0x574   :  { %v2166_v32 = vpop.f32.mrb[49].mxu1  ;;  %v5747_v63 = vadd.f32 %v4046_v31, %v3403_v50 }
 0x575   :  { %v5751_v45 = vadd.f32 %v3402_v8, %v2166_v32 }
 0x577   :  { %v4049_v5 = vpop.f32.mrb[50].mxu1 }
 0x578   :  { %v2176_v3 = vpop.f32.mrb[51].mxu1  ;;  %v5771_v34 = vadd.f32 %v4049_v5, %v3405_v47 }
 0x579   :  { %v5775_v57 = vadd.f32 %v3404_v42, %v2176_v3  ;;  %v3443_v42 = vld [vmem:[%s6208_s3 + $0x188] sm:$0xff] }
 0x57b   :  { %v4052_v48 = vpop.f32.mrb[52].mxu1 }
 0x57c   :  { %v5749_v7 = vadd.f32 %v4052_v48, %v3407_v0  ;;  %v2186_v10 = vpop.f32.mrb[53].mxu1 }
 0x57d   :  { %v5756_v49 = vadd.f32 %v3406_v11, %v2186_v10 }
 0x57e   :  { %v2246_v53 = vmax.f32 %v5747_v63, %v5749_v7 }
 0x57f   :  { %v2245_v4 = vmax.f32 %v5751_v45, %v5756_v49  ;;  %v4055_v56 = vpop.f32.mrb[54].mxu1 }
 0x580   :  { %v5773_v1 = vadd.f32 %v4055_v56, %v3409_v27  ;;  %v2196_v52 = vpop.f32.mrb[55].mxu1 }
 0x581   :  { %v5777_v19 = vadd.f32 %v3408_v23, %v2196_v52  ;;  %v3442_v23 = vld [vmem:[%s6208_s3 + $0x180] sm:$0xff] }
 0x582   :  { %v2248_v33 = vmax.f32 %v5771_v34, %v5773_v1 }
 0x583   :  { %v2247_v54 = vmax.f32 %v5775_v57, %v5777_v19  ;;  %v4058_v44 = vpop.f32.mrb[56].mxu1 }
 0x584   :  { %v5789_v38 = vadd.f32 %v4058_v44, %v3411_v58  ;;  %v2206_v55 = vpop.f32.mrb[57].mxu1 }
 0x585   :  { %v5791_v12 = vadd.f32 %v3410_v37, %v2206_v55  ;;  %v3445_v55 = vld [vmem:[%s6208_s3 + $0x198] sm:$0xff] }
 0x586   :  { %v2250_v6 = vmax.f32 %v2246_v53, %v5789_v38  ;;  %v3447_v53 = vld [vmem:[%s6208_s3 + $0x1a8] sm:$0xff] }
 0x587   :  { %v2249_v25 = vmax.f32 %v2245_v4, %v5791_v12  ;;  %v4061_v16 = vpop.f32.mrb[58].mxu1  ;;  %v3446_v4 = vld [vmem:[%s6208_s3 + $0x1a0] sm:$0xff] }
 0x588   :  { %v5801_v59 = vadd.f32 %v4061_v16, %v3413_v2  ;;  %v2216_v40 = vpop.f32.mrb[59].mxu1  ;;  %v3448_v16 = vld [vmem:[%s6208_s3 + $0x1b0] sm:$0xff] }
 0x589   :  { %v5803_v62 = vadd.f32 %v3412_v60, %v2216_v40  ;;  %v3444_v60 = vld [vmem:[%s6208_s3 + $0x190] sm:$0xff] }
 0x58a   :  { %v2252_v15 = vmax.f32 %v2248_v33, %v5801_v59 }
 0x58b   :  { %v2251_v13 = vmax.f32 %v2247_v54, %v5803_v62  ;;  %v4064_v35 = vpop.f32.mrb[60].mxu1 }
 0x58c   :  { %v5813_v20 = vadd.f32 %v4064_v35, %v3415_v24  ;;  %v2226_v9 = vpop.f32.mrb[61].mxu1 }
 0x58d   :  { %v5815_v43 = vadd.f32 %v3414_v61, %v2226_v9 }
 0x58e   :  { %v2254_v21 = vmax.f32 %v2250_v6, %v5813_v20  ;;  %v3449_v6 = vld [vmem:[%s6208_s3 + $0x1b8] sm:$0xff] }
 0x58f   :  { %v2253_v51 = vmax.f32 %v2249_v25, %v5815_v43  ;;  %v4067_v26 = vpop.f32.mrb[62].mxu1 }
 0x590   :  { %v5825_v17 = vadd.f32 %v4067_v26, %v3417_v30  ;;  %v2236_v31 = vpop.f32.mrb[63].mxu1 }
 0x591   :  { %v2257_v32 = vmax.f32 %v2253_v51, %v2254_v21  ;;  %v5827_v5 = vadd.f32 %v3416_v46, %v2236_v31  ;;  %v3451_v46 = vld [vmem:[%s6208_s3 + $0x1c8] sm:$0xff] }
 0x592   :  { %v2256_v3 = vmax.f32 %v2252_v15, %v5825_v17 }
 0x593   :  { %v2255_v50 = vmax.f32 %v2251_v13, %v5827_v5  ;;  %v4122_v0 = vpop.f32.mrb[64].mxu1 }
 0x594   :  { %v2636_v8 = vpop.f32.mrb[65].mxu1  ;;  %v5843_v58 = vadd.f32 %v4122_v0, %v3443_v42 }
 0x595   :  { %v2258_v11 = vmax.f32 %v2255_v50, %v2256_v3  ;;  %v5847_v44 = vadd.f32 %v3442_v23, %v2636_v8 }
 0x597   :  { %v2259_v48 = vmax.f32 %v2257_v32, %v2258_v11  ;;  %v4125_v10 = vpop.f32.mrb[66].mxu1 }
 0x598   :  { %v2646_v47 = vpop.f32.mrb[67].mxu1  ;;  %v5867_v61 = vadd.f32 %v4125_v10, %v3445_v55  ;;  %v3452_v55 = vld [vmem:[%s6208_s3 + $0x1d0] sm:$0xff] }
 0x599   :  { %v2260_v27 = vrot.slane %v2259_v48, 4  ;;  %v5871_v30 = vadd.f32 %v3444_v60, %v2646_v47  ;;  %v3454_v60 = vld [vmem:[%s6208_s3 + $0x1e0] sm:$0xff] }
 0x59b   :  { %v2261_v56 = vmax.f32 %v2259_v48, %v2260_v27  ;;  %v4128_v52 = vpop.f32.mrb[68].mxu1 }
 0x59c   :  { %v5845_v33 = vadd.f32 %v4128_v52, %v3447_v53  ;;  %v2656_v37 = vpop.f32.mrb[69].mxu1 }
 0x59d   :  { %v2262_v54 = vrot.slane %v2261_v56, 2  ;;  %v5852_v2 = vadd.f32 %v3446_v4, %v2656_v37  ;;  %v3453_v37 = vld [vmem:[%s6208_s3 + $0x1d8] sm:$0xff] }
 0x59e   :  { %v2716_v25 = vmax.f32 %v5843_v58, %v5845_v33 }
 0x59f   :  { %v2263_v40 = vmax.f32 %v2261_v56, %v2262_v54  ;;  %v2715_v24 = vmax.f32 %v5847_v44, %v5852_v2  ;;  %v4131_v15 = vpop.f32.mrb[70].mxu1 }
 0x5a0   :  { %v5869_v13 = vadd.f32 %v4131_v15, %v3449_v6  ;;  %v2666_v35 = vpop.f32.mrb[71].mxu1  ;;  %v3455_v6 = vld [vmem:[%s6208_s3 + $0x1e8] sm:$0xff] }
 0x5a1   :  { %v2264_v9 = vrot.slane %v2263_v40, 1  ;;  %v5873_v21 = vadd.f32 %v3448_v16, %v2666_v35  ;;  %v3457_v35 = vld [vmem:[%s6208_s3 + $0x1f8] sm:$0xff] }
 0x5a2   :  { %v2718_v51 = vmax.f32 %v5867_v61, %v5869_v13 }
 0x5a3   :  { %v5880_v26 = vmax.f32 %v2263_v40, %v2264_v9  ;;  %v2717_v31 = vmax.f32 %v5871_v30, %v5873_v21  ;;  %v4134_v32 = vpop.f32.mrb[72].mxu1 }
 0x5a4   :  { %v5884_v3 = vadd.f32 %v4134_v32, %v3451_v46  ;;  %v2676_v50 = vpop.f32.mrb[73].mxu1 }
 0x5a5   :  { %v2266_v0 = vsub.f32 %v5751_v45, %v5880_v26  ;;  %v2267_v8 = vsub.f32 %v5747_v63, %v5880_v26  ;;  %v2268_v11 = vsub.f32 %v5775_v57, %v5880_v26  ;;  %v2269_v48 = vsub.f32 %v5771_v34, %v5880_v26 }
 0x5a6   :  { %v2270_v10 = vsub.f32 %v5756_v49, %v5880_v26  ;;  %v2271_v47 = vsub.f32 %v5749_v7, %v5880_v26  ;;  %v2272_v27 = vsub.f32 %v5777_v19, %v5880_v26  ;;  %v2273_v45 = vsub.f32 %v5773_v1, %v5880_v26  ;;  %v3450_v7 = vld [vmem:[%s6208_s3 + $0x1c0] sm:$0xff] }
 0x5a7   :  { %v2274_v63 = vsub.f32 %v5791_v12, %v5880_v26  ;;  %v2275_v57 = vsub.f32 %v5789_v38, %v5880_v26  ;;  %v2276_v34 = vsub.f32 %v5803_v62, %v5880_v26  ;;  %v2277_v49 = vsub.f32 %v5801_v59, %v5880_v26  ;;  %v4137_v19 = vpop.f32.mrb[74].mxu1 }
 0x5a8   :  { %v2278_v1 = vsub.f32 %v5815_v43, %v5880_v26  ;;  %v2279_v12 = vsub.f32 %v5813_v20, %v5880_v26  ;;  %v2280_v38 = vsub.f32 %v5827_v5, %v5880_v26  ;;  %v2281_v62 = vsub.f32 %v5825_v17, %v5880_v26  ;;  %v2686_v42 = vpop.f32.mrb[75].mxu1 }
 0x5a9   :  { %v2282_v53 = vmul.f32 1.442695, %v2266_v0  ;;  %v2284_v23 = vmul.f32 1.442695, %v2267_v8  ;;  %v2720_v4 = vmax.f32 %v2716_v25, %v5884_v3  ;;  %v2286_v56 = vmul.f32 1.442695, %v2268_v11 }
 0x5aa   :  { %v5922_v52 = vadd.f32 %v3450_v7, %v2676_v50  ;;  %v2288_v54 = vmul.f32 1.442695, %v2269_v48  ;;  %v2290_v25 = vmul.f32 1.442695, %v2270_v10  ;;  %v5937_v40 = vadd.f32 %v4137_v19, %v3453_v37  ;;  %v3456_v50 = vld [vmem:[%s6208_s3 + $0x1f0] sm:$0xff] }
 0x5ab   :  { %4489 = vpow2.f32 %v2282_v53  ;;  %v4140_v15 = vpop.f32.mrb[76].mxu1  ;;  %v5942_v9 = vadd.f32 %v3452_v55, %v2686_v42  ;;  %v2292_v0 = vmul.f32 1.442695, %v2271_v47  ;;  %v2294_v42 = vmul.f32 1.442695, %v2272_v27 }
 0x5ac   :  { %4491 = vpow2.f32 %v2284_v23  ;;  %v2719_v16 = vmax.f32 %v2715_v24, %v5922_v52  ;;  %v5944_v46 = vadd.f32 %v4140_v15, %v3455_v6  ;;  %v2696_v32 = vpop.f32.mrb[77].mxu1  ;;  %v2722_v24 = vmax.f32 %v2718_v51, %v5937_v40 }
 0x5ad   :  { %4493 = vpow2.f32 %v2286_v56  ;;  %v5950_v8 = vadd.f32 %v3454_v60, %v2696_v32  ;;  %v2721_v48 = vmax.f32 %v2717_v31, %v5942_v9  ;;  %v2296_v51 = vmul.f32 1.442695, %v2273_v45 }
 0x5ae   :  { %4495 = vpow2.f32 %v2288_v54  ;;  %v2724_v10 = vmax.f32 %v2720_v4, %v5944_v46  ;;  %v2298_v4 = vmul.f32 1.442695, %v2274_v63  ;;  %v2300_v60 = vmul.f32 1.442695, %v2275_v57 }
 0x5af   :  { %v4143_v11 = vpop.f32.mrb[78].mxu1  ;;  %4497 = vpow2.f32 %v2290_v25  ;;  %v2723_v53 = vmax.f32 %v2719_v16, %v5950_v8  ;;  %v2302_v15 = vmul.f32 1.442695, %v2276_v34  ;;  %v2304_v63 = vmul.f32 1.442695, %v2277_v49 }
 0x5b0   :  { %v5954_v7 = vadd.f32 %v4143_v11, %v3457_v35  ;;  %v2706_v19 = vpop.f32.mrb[79].mxu1  ;;  %4499 = vpow2.f32 %v2292_v0  ;;  %v2306_v34 = vmul.f32 1.442695, %v2278_v1  ;;  %v2310_v59 = vmul.f32 1.442695, %v2280_v38 }
 0x5b1   :  { %v5957_v23 = vadd.f32 %v3456_v50, %v2706_v19  ;;  %v2727_v56 = vmax.f32 %v2723_v53, %v2724_v10  ;;  %4501 = vpow2.f32 %v2294_v42  ;;  %v2312_v43 = vmul.f32 1.442695, %v2281_v62 }
 0x5b2   :  { %v2726_v47 = vmax.f32 %v2722_v24, %v5954_v7  ;;  %4503 = vpow2.f32 %v2296_v51 }
 0x5b3   :  { %v2725_v37 = vmax.f32 %v2721_v48, %v5957_v23  ;;  %4505 = vpow2.f32 %v2298_v4  ;;  %v2308_v48 = vmul.f32 1.442695, %v2279_v12 }
 0x5b4   :  { %4507 = vpow2.f32 %v2300_v60 }
 0x5b5   :  { %v5961_v54 = vpop.eup %4489  ;;  %v2728_v55 = vmax.f32 %v2725_v37, %v2726_v47  ;;  %4509 = vpow2.f32 %v2302_v15 }
 0x5b6   :  { %v5963_v31 = vpop.eup %4491  ;;  %4511 = vpow2.f32 %v2304_v63 }
 0x5b7   :  { %v2314_v27 = vadd.f32 %v5963_v31, %v5961_v54  ;;  %v5967_v6 = vpop.eup %4493  ;;  %v2729_v25 = vmax.f32 %v2727_v56, %v2728_v55  ;;  %4513 = vpow2.f32 %v2306_v34 }
 0x5b8   :  { %v5970_v16 = vpop.eup %4495  ;;  %4515 = vpow2.f32 %v2308_v48 }
 0x5b9   :  { %v2315_v45 = vadd.f32 %v5967_v6, %v2314_v27  ;;  %v2730_v35 = vrot.slane %v2729_v25, 4  ;;  %v5973_v50 = vpop.eup %4497  ;;  %4517 = vpow2.f32 %v2310_v59 }
 0x5ba   :  { %v5979_v24 = vpop.eup %4499  ;;  %4519 = vpow2.f32 %v2312_v43 }
 0x5bb   :  { %v2316_v32 = vadd.f32 %v5970_v16, %v2315_v45  ;;  %v2731_v0 = vmax.f32 %v2729_v25, %v2730_v35  ;;  %v5988_v19 = vpop.eup %4501 }
 0x5bc   :  { %v5997_v42 = vpop.eup %4503 }
 0x5bd   :  { %v2317_v57 = vadd.f32 %v5973_v50, %v2316_v32  ;;  %v2732_v11 = vrot.slane %v2731_v0, 2  ;;  %v6000_v53 = vpop.eup %4505 }
 0x5be   :  { %v6005_v38 = vpop.eup %4507 }
 0x5bf   :  { %v2318_v10 = vadd.f32 %v5979_v24, %v2317_v57  ;;  %v2733_v49 = vmax.f32 %v2731_v0, %v2732_v11  ;;  %v6022_v55 = vpop.eup %4509 }
 0x5c0   :  { %v6039_v60 = vpop.eup %4511 }
 0x5c1   :  { %v2319_v1 = vadd.f32 %v5988_v19, %v2318_v10  ;;  %v2734_v20 = vrot.slane %v2733_v49, 1 }
 0x5c3   :  { %v2320_v12 = vadd.f32 %v5997_v42, %v2319_v1  ;;  %v6002_v47 = vmax.f32 %v2733_v49, %v2734_v20 }
 0x5c5   :  { %v2321_v5 = vadd.f32 %v6000_v53, %v2320_v12  ;;  %v2736_v17 = vsub.f32 %v5847_v44, %v6002_v47  ;;  %v2737_v26 = vsub.f32 %v5843_v58, %v6002_v47  ;;  %v2738_v62 = vsub.f32 %v5871_v30, %v6002_v47 }
 0x5c6   :  { %v2739_v51 = vsub.f32 %v5867_v61, %v6002_v47  ;;  %v2740_v37 = vsub.f32 %v5852_v2, %v6002_v47  ;;  %v2741_v4 = vsub.f32 %v5845_v33, %v6002_v47  ;;  %v2742_v44 = vsub.f32 %v5873_v21, %v6002_v47 }
 0x5c7   :  { %v2322_v56 = vadd.f32 %v6005_v38, %v2321_v5  ;;  %v2743_v58 = vsub.f32 %v5869_v13, %v6002_v47  ;;  %v2744_v30 = vsub.f32 %v5922_v52, %v6002_v47  ;;  %v2745_v61 = vsub.f32 %v5884_v3, %v6002_v47 }
 0x5c8   :  { %v2746_v2 = vsub.f32 %v5942_v9, %v6002_v47  ;;  %v2747_v33 = vsub.f32 %v5937_v40, %v6002_v47  ;;  %v2748_v21 = vsub.f32 %v5950_v8, %v6002_v47  ;;  %v2749_v13 = vsub.f32 %v5944_v46, %v6002_v47  ;;  %v6046_v40 = vpop.eup %4513 }
 0x5c9   :  { %v2323_v27 = vadd.f32 %v6022_v55, %v2322_v56  ;;  %v2750_v52 = vsub.f32 %v5957_v23, %v6002_v47  ;;  %v2751_v3 = vsub.f32 %v5954_v7, %v6002_v47  ;;  %v2752_v9 = vmul.f32 1.442695, %v2736_v17  ;;  %v6048_v8 = vpop.eup %4515 }
 0x5ca   :  { %v2754_v25 = vmul.f32 1.442695, %v2737_v26  ;;  %v2756_v15 = vmul.f32 1.442695, %v2738_v62  ;;  %v2758_v35 = vmul.f32 1.442695, %v2739_v51  ;;  %v6051_v32 = vpop.eup %4517 }
 0x5cb   :  { %v2324_v45 = vadd.f32 %v6039_v60, %v2323_v27  ;;  %4521 = vpow2.f32 %v2752_v9  ;;  %v6053_v23 = vpop.eup %4519  ;;  %v2760_v63 = vmul.f32 1.442695, %v2740_v37  ;;  %v2762_v57 = vmul.f32 1.442695, %v2741_v4 }
 0x5cc   :  { %4523 = vpow2.f32 %v2754_v25  ;;  %v2764_v11 = vmul.f32 1.442695, %v2742_v44  ;;  %v2766_v10 = vmul.f32 1.442695, %v2743_v58  ;;  %v2768_v1 = vmul.f32 1.442695, %v2744_v30 }
 0x5cd   :  { %v2325_v46 = vadd.f32 %v6046_v40, %v2324_v45  ;;  %4525 = vpow2.f32 %v2756_v15  ;;  %v2770_v5 = vmul.f32 1.442695, %v2745_v61  ;;  %v2772_v51 = vmul.f32 1.442695, %v2746_v2 }
 0x5ce   :  { %4527 = vpow2.f32 %v2758_v35  ;;  %v2774_v56 = vmul.f32 1.442695, %v2747_v33  ;;  %v2776_v61 = vmul.f32 1.442695, %v2748_v21  ;;  %v2778_v2 = vmul.f32 1.442695, %v2749_v13 }
 0x5cf   :  { %v2326_v7 = vadd.f32 %v6048_v8, %v2325_v46  ;;  %4529 = vpow2.f32 %v2760_v63  ;;  %v2780_v15 = vmul.f32 1.442695, %v2750_v52 }
 0x5d0   :  { %4531 = vpow2.f32 %v2762_v57 }
 0x5d1   :  { %v2327_v0 = vadd.f32 %v6051_v32, %v2326_v7  ;;  %4533 = vpow2.f32 %v2764_v11  ;;  %v2782_v7 = vmul.f32 1.442695, %v2751_v3 }
 0x5d2   :  { %4535 = vpow2.f32 %v2766_v10 }
 0x5d3   :  { %v2328_v34 = vadd.f32 %v6053_v23, %v2327_v0  ;;  %4537 = vpow2.f32 %v2768_v1 }
 0x5d4   :  { %4539 = vpow2.f32 %v2770_v5 }
 0x5d5   :  { %v2329_v48 = vrot.slane %v2328_v34, 4  ;;  %v6058_v59 = vpop.eup %4521  ;;  %4541 = vpow2.f32 %v2772_v51 }
 0x5d6   :  { %v6060_v49 = vpop.eup %4523  ;;  %4543 = vpow2.f32 %v2774_v56 }
 0x5d7   :  { %v2330_v43 = vadd.f32 %v2329_v48, %v2328_v34  ;;  %v2784_v20 = vadd.f32 %v6060_v49, %v6058_v59  ;;  %v6064_v12 = vpop.eup %4525 }
 0x5d8   :  { %v6067_v26 = vpop.eup %4527 }
 0x5d9   :  { %v2331_v47 = vrot.slane %v2330_v43, 2  ;;  %v2785_v17 = vadd.f32 %v6064_v12, %v2784_v20  ;;  %v6070_v4 = vpop.eup %4529 }
 0x5da   :  { %v6073_v30 = vpop.eup %4531 }
 0x5db   :  { %v2332_v62 = vadd.f32 %v2331_v47, %v2330_v43  ;;  %v2786_v37 = vadd.f32 %v6067_v26, %v2785_v17  ;;  %v6076_v25 = vpop.eup %4533 }
 0x5dc   :  { %v6079_v45 = vpop.eup %4535 }
 0x5dd   :  { %v2333_v44 = vrot.slane %v2332_v62, 1  ;;  %v2787_v58 = vadd.f32 %v6070_v4, %v2786_v37  ;;  %v6082_v35 = vpop.eup %4537 }
 0x5de   :  { %v6085_v63 = vpop.eup %4539 }
 0x5df   :  { %v2334_v27 = vadd.f32 %v2333_v44, %v2332_v62  ;;  %v2788_v9 = vadd.f32 %v6073_v30, %v2787_v58  ;;  %v6088_v13 = vpop.eup %4541 }
 0x5e0   :  { %v6090_v57 = vpop.eup %4543 }
 0x5e1   :  { %4545 = vrcp.f32 %v2334_v27  ;;  %v2789_v33 = vadd.f32 %v6076_v25, %v2788_v9 }
 0x5e2   :  { %4547 = vpow2.f32 %v2776_v61 }
 0x5e3   :  { %v2790_v46 = vadd.f32 %v6079_v45, %v2789_v33  ;;  %4549 = vpow2.f32 %v2778_v2 }
 0x5e4   :  { %4551 = vpow2.f32 %v2780_v15 }
 0x5e5   :  { %v2791_v21 = vadd.f32 %v6082_v35, %v2790_v46  ;;  %4553 = vpow2.f32 %v2782_v7  ;;  %v413_v7 = vpop.permute.xlu1 %412 }
 0x5e7   :  { %v2792_v0 = vadd.f32 %v6085_v63, %v2791_v21  ;;  %v418_v21 = vpop.permute.xlu0 %417 }
 0x5e9   :  { %v2793_v52 = vadd.f32 %v6088_v13, %v2792_v0  ;;  %v423_v0 = vpop.permute.xlu1 %422 }
 0x5eb   :  { %v4546_v34 = vpop.eup %4545  ;;  %v2794_v11 = vadd.f32 %v6090_v57, %v2793_v52 }
 0x5ec   :  { %v2336_v48 = vmul.f32 %v4546_v34, %v5961_v54  ;;  %v2337_v3 = vmul.f32 %v4546_v34, %v5963_v31  ;;  %v2338_v10 = vmul.f32 %v4546_v34, %v5967_v6  ;;  %v6097_v43 = vpop.eup %4547  ;;  %v2339_v1 = vmul.f32 %v4546_v34, %v5970_v16 }
 0x5ed   :  { %v2340_v20 = vmul.f32 %v4546_v34, %v5973_v50  ;;  %v2341_v47 = vmul.f32 %v4546_v34, %v5979_v24  ;;  %v2342_v5 = vmul.f32 %v4546_v34, %v5988_v19  ;;  %v2795_v17 = vadd.f32 %v6097_v43, %v2794_v11  ;;  %v6106_v31 = vpop.eup %4549 }
 0x5ee   :  { %v4301_v62 = vpack.c.bf16 %v2337_v3, %v2336_v48  ;;  %v2343_v51 = vmul.f32 %v4546_v34, %v5997_v42  ;;  %v2344_v54 = vmul.f32 %v4546_v34, %v6000_v53  ;;  %v4305_v6 = vpack.c.bf16 %v2339_v1, %v2338_v10  ;;  %v6113_v58 = vpop.eup %4551  ;;  %v428_v48 = vpop.permute.xlu0 %427  ;;  %v6298_v3 = vld [vmem:[#allocation17_spill] sm:$0xff] }
 0x5ef   :  { %v4309_v56 = vpack.c.bf16 %v2341_v47, %v2340_v20  ;;  %v2345_v37 = vmul.f32 %v4546_v34, %v6005_v38  ;;  %v2346_v16 = vmul.f32 %v4546_v34, %v6022_v55  ;;  %v2796_v50 = vadd.f32 %v6106_v31, %v2795_v17  ;;  %v4554_v9 = vpop.eup %4553 }
 0x5f0   :  { %4302 = vmatprep.subr.bf16.mxu0 %v4301_v62  ;;  %v4313_v24 = vpack.c.bf16 %v2343_v51, %v2342_v5  ;;  %v2347_v19 = vmul.f32 %v4546_v34, %v6039_v60  ;;  %v2348_v44 = vmul.f32 %v4546_v34, %v6046_v40  ;;  %v2349_v53 = vmul.f32 %v4546_v34, %v6048_v8 }
 0x5f1   :  { %4304 = vmatpush3.bf16.msra.mxu0 %v4301_v62  ;;  %v4317_v42 = vpack.c.bf16 %v2345_v37, %v2344_v54  ;;  %v2350_v27 = vmul.f32 %v4546_v34, %v6051_v32  ;;  %v2351_v38 = vmul.f32 %v4546_v34, %v6053_v23  ;;  %v2797_v55 = vadd.f32 %v6113_v58, %v2796_v50  ;;  %v6297_v34 = vld [vmem:[#allocation19_spill] sm:$0xff] }
 0x5f2   :  { %4306 = vmatprep.subr.bf16.mxu0 %v4305_v6  ;;  %v4321_v61 = vpack.c.bf16 %v2347_v19, %v2346_v16  ;;  %v4325_v2 = vpack.c.bf16 %v2349_v53, %v2348_v44  ;;  %v995_v11 = vadd.f32 %v6297_v34, %v418_v21  ;;  %v990_v10 = vadd.f32 %v6298_v3, %v413_v7  ;;  %v438_v50 = vpop.permute.xlu0 %437  ;;  %v6308_v34 = vld [vmem:[#allocation30_spill] sm:$0xff]  ;;  %v6309_v3 = vld [vmem:[#allocation28_spill] sm:$0xff] }
 0x5f3   :  { %v4329_v33 = vpack.c.bf16 %v2351_v38, %v2350_v27  ;;  %v2798_v60 = vadd.f32 %v4554_v9, %v2797_v55  ;;  %v6301_v27 = vld [vmem:[#allocation20_spill] sm:$0xff] }
 0x5f5   :  { %4308 = vmatpush3.bf16.msra.mxu0 %v4305_v6  ;;  %v2799_v40 = vrot.slane %v2798_v60, 4 }
 0x5f6   :  { %4310 = vmatprep.subr.bf16.mxu0 %v4309_v56 }
 0x5f7   :  { %v2800_v15 = vadd.f32 %v2799_v40, %v2798_v60 }
 0x5f9   :  { %4312 = vmatpush3.bf16.msra.mxu0 %v4309_v56  ;;  %v2801_v46 = vrot.slane %v2800_v15, 2 }
 0x5fa   :  { %4314 = vmatprep.subr.bf16.mxu0 %v4313_v24 }
 0x5fb   :  { %v2802_v8 = vadd.f32 %v2801_v46, %v2800_v15 }
 0x5fd   :  { %4316 = vmatpush3.bf16.msra.mxu0 %v4313_v24  ;;  %v2803_v32 = vrot.slane %v2802_v8, 1  ;;  %v6299_v24 = vld [vmem:[#allocation18_spill] sm:$0xff] }
 0x5fe   :  { %4318 = vmatprep.subr.bf16.mxu0 %v4317_v42 }
 0x5ff   :  { %v2804_v23 = vadd.f32 %v2803_v32, %v2802_v8  ;;  %v6305_v8 = vld [vmem:[#allocation24_spill] sm:$0xff] }
 0x601   :  { %4320 = vmatpush3.bf16.msra.mxu0 %v4317_v42  ;;  %4555 = vrcp.f32 %v2804_v23  ;;  %v6300_v42 = vld [vmem:[#allocation21_spill] sm:$0xff]  ;;  %v6306_v23 = vld [vmem:[#allocation27_spill] sm:$0xff] }
 0x602   :  { %4322 = vmatprep.subr.bf16.mxu0 %v4321_v61 }
 0x605   :  { %4324 = vmatpush3.bf16.msra.mxu0 %v4321_v61  ;;  %v448_v61 = vpop.permute.xlu0 %447 }
 0x606   :  { %4326 = vmatprep.subr.bf16.mxu0 %v4325_v2 }
 0x609   :  { %4328 = vmatpush3.bf16.msra.mxu0 %v4325_v2  ;;  %v6303_v2 = vld [vmem:[#allocation22_spill] sm:$0xff]  ;;  %v458_v40 = vpop.permute.xlu0 %457 }
 0x60a   :  { %4330 = vmatprep.subr.bf16.mxu0 %v4329_v33  ;;  %v1035_v7 = vadd.f32 %v6306_v23, %v458_v40 }
 0x60b   :  { %v4556_v52 = vpop.eup %4555 }
 0x60c   :  { %v2806_v1 = vmul.f32 %v4556_v52, %v6058_v59  ;;  %v2807_v20 = vmul.f32 %v4556_v52, %v6060_v49  ;;  %v2808_v47 = vmul.f32 %v4556_v52, %v6064_v12  ;;  %v2809_v5 = vmul.f32 %v4556_v52, %v6067_v26 }
 0x60d   :  { %4332 = vmatpush3.bf16.msra.mxu0 %v4329_v33  ;;  %v2810_v17 = vmul.f32 %v4556_v52, %v6070_v4  ;;  %v2811_v62 = vmul.f32 %v4556_v52, %v6073_v30  ;;  %v2812_v51 = vmul.f32 %v4556_v52, %v6076_v25  ;;  %v2813_v54 = vmul.f32 %v4556_v52, %v6079_v45  ;;  %v433_v4 = vpop.permute.xlu1 %432  ;;  %v468_v46 = vpop.permute.xlu0 %467 }
 0x60e   :  { %v4341_v6 = vpack.c.bf16 %v2807_v20, %v2806_v1  ;;  %v4345_v56 = vpack.c.bf16 %v2809_v5, %v2808_v47  ;;  %v2814_v37 = vmul.f32 %v4556_v52, %v6082_v35  ;;  %v2815_v59 = vmul.f32 %v4556_v52, %v6085_v63  ;;  %v6310_v1 = vld [vmem:[#allocation32_spill] sm:$0xff]  ;;  %v6311_v5 = vld [vmem:[#allocation31_spill] sm:$0xff] }
 0x60f   :  { %v4349_v49 = vpack.c.bf16 %v2811_v62, %v2810_v17  ;;  %v4353_v16 = vpack.c.bf16 %v2813_v54, %v2812_v51  ;;  %v2816_v12 = vmul.f32 %v4556_v52, %v6088_v13  ;;  %v2817_v26 = vmul.f32 %v4556_v52, %v6090_v57  ;;  %v2944_v62 = vld [vmem:[%s6212_s4 + $0x8] sm:$0xff] }
 0x610   :  { %4101 = vmatmul.mubr.f32.vlgmr.msra.gmra.mrb[64].mxu0 %v990_v10  ;;  %4342 = vmatprep.subr.bf16.mxu0 %v4341_v6  ;;  %v4357_v30 = vpack.c.bf16 %v2815_v59, %v2814_v37  ;;  %v2818_v25 = vmul.f32 %v4556_v52, %v6097_v43  ;;  %v2819_v45 = vmul.f32 %v4556_v52, %v6106_v31  ;;  %v6302_v43 = vld [vmem:[#allocation23_spill] sm:$0xff] }
 0x611   :  { %4103 = vmatprep.mubr.f32.mxu0 %v995_v11  ;;  %v1000_v35 = vadd.f32 %v6299_v24, %v423_v0  ;;  %4344 = vmatpush3.bf16.msra.mxu0 %v4341_v6  ;;  %v4361_v63 = vpack.c.bf16 %v2817_v26, %v2816_v12  ;;  %v2820_v19 = vmul.f32 %v4556_v52, %v6113_v58  ;;  %v443_v55 = vpop.permute.xlu1 %442  ;;  %v6307_v0 = vld [vmem:[#allocation26_spill] sm:$0xff] }
 0x612   :  { %v2821_v44 = vmul.f32 %v4556_v52, %v4554_v9  ;;  %v1005_v13 = vadd.f32 %v6300_v42, %v428_v48  ;;  %4346 = vmatprep.subr.bf16.mxu0 %v4345_v56  ;;  %v4365_v57 = vpack.c.bf16 %v2819_v45, %v2818_v25  ;;  %v1010_v38 = vadd.f32 %v6301_v27, %v433_v4  ;;  %v6304_v9 = vld [vmem:[#allocation25_spill] sm:$0xff]  ;;  %v478_v48 = vpop.permute.xlu0 %477 }
 0x613   :  { %v1015_v31 = vadd.f32 %v6302_v43, %v438_v50  ;;  %v1020_v58 = vadd.f32 %v6303_v2, %v443_v55  ;;  %v1025_v33 = vadd.f32 %v6304_v9, %v448_v61  ;;  %v1045_v11 = vadd.f32 %v6308_v34, %v468_v46  ;;  %3011 = vmatprep.mubr.f32.mxu1 %v2944_v62 }
 0x614   :  { %4104 = vmatmul.mubr.f32.gmra.mrb[66].mxu0 %v1000_v35  ;;  %v4369_v53 = vpack.c.bf16 %v2821_v44, %v2820_v19  ;;  %v1055_v20 = vadd.f32 %v6310_v1, %v478_v48 }
 0x615   :  { %4106 = vmatprep.mubr.f32.mxu0 %v1005_v13  ;;  %4348 = vmatpush3.bf16.msra.mxu0 %v4345_v56  ;;  %v453_v60 = vpop.permute.xlu1 %452 }
 0x616   :  { %4350 = vmatprep.subr.bf16.mxu0 %v4349_v49  ;;  %v1030_v32 = vadd.f32 %v6305_v8, %v453_v60 }
 0x618   :  { %4107 = vmatmul.mubr.f32.gmra.mrb[68].mxu0 %v1010_v38 }
 0x619   :  { %4109 = vmatprep.mubr.f32.mxu0 %v1015_v31  ;;  %4352 = vmatpush3.bf16.msra.mxu0 %v4349_v49  ;;  %v463_v15 = vpop.permute.xlu1 %462 }
 0x61a   :  { %4354 = vmatprep.subr.bf16.mxu0 %v4353_v16  ;;  %v1040_v52 = vadd.f32 %v6307_v0, %v463_v15  ;;  %v2945_v15 = vld [vmem:[%s6212_s4 + $0x10] sm:$0xff] }
 0x61c   :  { %4110 = vmatmul.mubr.f32.gmra.mrb[70].mxu0 %v1020_v58 }
 0x61d   :  { %4176 = vmatprep.mubr.f32.mxu0 %v1025_v33  ;;  %4356 = vmatpush3.bf16.msra.mxu0 %v4353_v16  ;;  %v473_v21 = vpop.permute.xlu1 %472 }
 0x61e   :  { %4358 = vmatprep.subr.bf16.mxu0 %v4357_v30  ;;  %v1050_v10 = vadd.f32 %v6309_v3, %v473_v21 }
 0x621   :  { %4360 = vmatpush3.bf16.msra.mxu0 %v4357_v30  ;;  %v483_v47 = vpop.permute.xlu1 %482 }
 0x622   :  { %4362 = vmatprep.subr.bf16.mxu0 %v4361_v63  ;;  %v1060_v17 = vadd.f32 %v6311_v5, %v483_v47  ;;  %v3040_v47 = vld [vmem:[%s6213_s6 + $0x10] sm:$0xff]  ;;  %v3041_v5 = vld [vmem:[%s6213_s6 + $0x18] sm:$0xff] }
 0x625   :  { %4364 = vmatpush3.bf16.msra.mxu0 %v4361_v63  ;;  %v3034_v48 = vpop.permute.xlu1 %3033 }
 0x626   :  { %4366 = vmatprep.subr.bf16.mxu0 %v4365_v57 }
 0x629   :  { %4368 = vmatpush3.bf16.msra.mxu0 %v4365_v57  ;;  %v3054_v62 = vpop.permute.xlu1 %3053 }
 0x62a   :  { %4370 = vmatprep.subr.bf16.mxu0 %v4369_v53 }
 0x62d   :  { %4372 = vmatpush3.bf16.msra.mxu0 %v4369_v53 }
 0x630   :  { %4177 = vmatmul.mubr.f32.vlgmr.msra.gmra.mrb[72].mxu0 %v1030_v32 }
 0x631   :  { %4179 = vmatprep.mubr.f32.mxu0 %v1035_v7  ;;  %v4557_v7 = vld [vmem:[%s6205_s0] sm:$0xff] }
 0x634   :  { %4180 = vmatmul.mubr.f32.gmra.mrb[74].mxu0 %v1040_v52  ;;  %v4558_v52 = vld [vmem:[%s6205_s0 + $0x8] sm:$0xff] }
 0x635   :  { %4182 = vmatprep.mubr.f32.mxu0 %v1045_v11  ;;  %v3029_v11 = vpop.permute.xlu0 %3028 }
 0x638   :  { %4183 = vmatmul.mubr.f32.gmra.mrb[76].mxu0 %v1050_v10 }
 0x639   :  { %4185 = vmatprep.mubr.f32.mxu0 %v1055_v20  ;;  %v3039_v20 = vld [vmem:[%s6213_s6 + $0x8] sm:$0xff] }
 0x63c   :  { %4186 = vmatmul.mubr.f32.gmra.mrb[78].mxu0 %v1060_v17  ;;  %v3171_v17 = vld [vmem:[%s6214_s8] sm:$0xff] }
 0x63d   :  { %4206 = vmatprep.mubr.msk.f32.mxu0 %vm1111_vm1, %v3171_v17 }
 0x6e3   :  { %v4102_v51 = vpop.f32.mrb[64].mxu0 }
 0x6e4   :  { %v3435_v54 = vclamps-f32 %v4102_v51, 1.0  ;;  %v2418_v6 = vpop.f32.mrb[65].mxu0  ;;  %v3049_v51 = vpop.permute.xlu0 %3048 }
 0x6e5   :  { %v3434_v56 = vclamps-f32 %v2418_v6, 1.0 }
 0x6e7   :  { %v4373_v37 = vpack.c.bf16 %v3435_v54, %v3434_v56  ;;  %v4105_v59 = vpop.f32.mrb[66].mxu0 }
 0x6e8   :  { %v3437_v49 = vclamps-f32 %v4105_v59, 1.0  ;;  %v2428_v16 = vpop.f32.mrb[67].mxu0 }
 0x6e9   :  { %v3436_v12 = vclamps-f32 %v2428_v16, 1.0  ;;  %4374 = vmatprep.subr.bf16.mxu1 %v4373_v37 }
 0x6ea   :  { %4376 = vmatpush3.bf16.msra.mxu1 %v5543_v18 }
 0x6eb   :  { %v4377_v26 = vpack.c.bf16 %v3437_v49, %v3436_v12  ;;  %v4108_v4 = vpop.f32.mrb[68].mxu0  ;;  %v3064_v49 = vpop.permute.xlu1 %3063 }
 0x6ec   :  { %v3439_v30 = vclamps-f32 %v4108_v4, 1.0  ;;  %v2438_v25 = vpop.f32.mrb[69].mxu0 }
 0x6ed   :  { %v3438_v45 = vclamps-f32 %v2438_v25, 1.0  ;;  %4378 = vmatprep.subr.bf16.mxu1 %v4377_v26  ;;  %v3059_v26 = vpop.permute.xlu0 %3058 }
 0x6ee   :  { %4380 = vmatpush3.bf16.msra.mxu1 %v5545_v41 }
 0x6ef   :  { %v4381_v50 = vpack.c.bf16 %v3439_v30, %v3438_v45  ;;  %v4111_v24 = vpop.f32.mrb[70].mxu0 }
 0x6f0   :  { %v3441_v35 = vclamps-f32 %v4111_v24, 1.0  ;;  %v2448_v63 = vpop.f32.mrb[71].mxu0 }
 0x6f1   :  { %v3440_v19 = vclamps-f32 %v2448_v63, 1.0  ;;  %4382 = vmatprep.subr.bf16.mxu1 %v4381_v50  ;;  %v3172_v63 = vld [vmem:[%s6214_s8 + $0x8] sm:$0xff] }
 0x6f2   :  { %4384 = vmatpush3.bf16.msra.mxu1 %v5547_v36 }
 0x6f3   :  { %v4385_v44 = vpack.c.bf16 %v3441_v35, %v3440_v19  ;;  %v3183_v19 = vpop.permute.xlu1 %3182 }
 0x6f5   :  { %4386 = vmatprep.subr.bf16.mxu1 %v4385_v44 }
 0x6f6   :  { %4388 = vmatpush3.bf16.msra.mxu1 %v5549_v39 }
 0x703   :  { %v4178_v18 = vpop.f32.mrb[72].mxu0 }
 0x704   :  { %v3475_v42 = vclamps-f32 %v4178_v18, 1.0  ;;  %v2888_v13 = vpop.f32.mrb[73].mxu0  ;;  %v3178_v18 = vpop.permute.xlu0 %3177 }
 0x705   :  { %v3474_v57 = vclamps-f32 %v2888_v13, 1.0 }
 0x707   :  { %v4389_v53 = vpack.c.bf16 %v3475_v42, %v3474_v57  ;;  %v4181_v27 = vpop.f32.mrb[74].mxu0 }
 0x708   :  { %v3477_v38 = vclamps-f32 %v4181_v27, 1.0  ;;  %v2898_v41 = vpop.f32.mrb[75].mxu0 }
 0x709   :  { %v3476_v43 = vclamps-f32 %v2898_v41, 1.0  ;;  %4390 = vmatprep.subr.bf16.mxu1 %v4389_v53 }
 0x70a   :  { %4392 = vmatpush3.bf16.msra.mxu1 %v5727_v14  ;;  %v2943_v14 = vld [vmem:[%s6212_s4] sm:$0xff] }
 0x70b   :  { %v4393_v31 = vpack.c.bf16 %v3477_v38, %v3476_v43  ;;  %v4184_v55 = vpop.f32.mrb[76].mxu0 }
 0x70c   :  { %v3479_v61 = vclamps-f32 %v4184_v55, 1.0  ;;  %v2908_v36 = vpop.f32.mrb[77].mxu0 }
 0x70d   :  { %v3478_v2 = vclamps-f32 %v2908_v36, 1.0  ;;  %4394 = vmatprep.subr.bf16.mxu1 %v4393_v31 }
 0x70e   :  { %4396 = vmatpush3.bf16.msra.mxu1 %v5729_v22  ;;  %v2946_v22 = vld [vmem:[%s6212_s4 + $0x18] sm:$0xff] }
 0x70f   :  { %v4397_v39 = vpack.c.bf16 %v3479_v61, %v3478_v2  ;;  %v4187_v58 = vpop.f32.mrb[78].mxu0 }
 0x710   :  { %v3481_v9 = vclamps-f32 %v4187_v58, 1.0  ;;  %v2918_v33 = vpop.f32.mrb[79].mxu0 }
 0x711   :  { %v3480_v60 = vclamps-f32 %v2918_v33, 1.0  ;;  %4398 = vmatprep.subr.bf16.mxu1 %v4397_v39 }
 0x712   :  { %4400 = vmatpush3.bf16.msra.mxu1 %v5731_v28  ;;  %v3038_v28 = vld [vmem:[%s6213_s6] sm:$0xff] }
 0x713   :  { %v4401_v40 = vpack.c.bf16 %v3481_v9, %v3480_v60 }
 0x715   :  { %4402 = vmatprep.subr.bf16.mxu1 %v4401_v40 }
 0x716   :  { %4404 = vmatpush3.bf16.msra.mxu1 %v5733_v29 }
 0x719   :  { %3012 = vmatmul.mubr.f32.vlgmr.msra.gmra.mrb[80].mxu1 %v2943_v14 }
 0x71a   :  { %3016 = vmatprep.mubr.f32.mxu1 %v2946_v22 }
 0x71d   :  { %3017 = vmatmul.mubr.f32.gmra.mrb[82].mxu1 %v2945_v15 }
 0x71e   :  { %4192 = vmatprep.mubr.msk.f32.mxu1 %vm485_vm0, %v3038_v28 }
 0x7ec   :  { %v3766_v29 = vpop.f32.mrb[80].mxu1 }
 0x7ed   :  { %v3767_v46 = vpop.f32.mrb[81].mxu1 }
 0x7ee   :  { %v3768_v8 = vadd.f32 %v3767_v46, %v3766_v29 }
 0x7f0   :  { %v3769_v32 = vpop.f32.mrb[82].mxu1  ;;  %v3022_v21 = vadd.f32 %v4557_v7, %v3768_v8 }
 0x7f1   :  { %v3770_v23 = vpop.f32.mrb[83].mxu1 }
 0x7f2   :  { %v3771_v0 = vadd.f32 %v3770_v23, %v3769_v32  ;;  %v3036_v3 = vadd.f32 %v3029_v11, %v3022_v21 }
 0x7f4   :  { %v3023_v34 = vadd.f32 %v4558_v52, %v3771_v0 }
 0x7f6   :  { %v3037_v10 = vadd.f32 %v3034_v48, %v3023_v34 }
 0x7f8   :  { %v4405_v1 = vpack.c.bf16 %v3037_v10, %v3036_v3 }
 0x7fa   :  { %4406 = vmatprep.subr.bf16.mxu1 %v4405_v1 }
 0x7fb   :  { %4408 = vmatpush3.bf16.msra.mxu1 %v4405_v1 }
 0x7fe   :  { %4193 = vmatmul.mubr.msk.f32.vlgmr.msra.gmra.mrb[84].mxu1 %vm485_vm0, %v3039_v20 }
 0x7ff   :  { %4195 = vmatprep.mubr.msk.f32.mxu1 %vm485_vm0, %v3040_v47 }
 0x802   :  { %4196 = vmatmul.mubr.msk.f32.gmra.mrb[86].mxu1 %vm485_vm0, %v3041_v5 }
 0x8d1   :  { %v4194_v54 = vpop.f32.mrb[84].mxu1 }
 0x8d2   :  { %v3150_v6 = vadd.f32 %v4194_v54, %v3054_v62  ;;  %v3144_v56 = vpop.f32.mrb[85].mxu1 }
 0x8d3   :  { %v3145_v37 = vadd.f32 %v3144_v56, %v3049_v51 }
 0x8d4   :  { %v3487_v59 = vclamps-f32 %v3150_v6, 1.0 }
 0x8d5   :  { %v3486_v16 = vclamps-f32 %v3145_v37, 1.0  ;;  %v4197_v12 = vpop.f32.mrb[86].mxu1 }
 0x8d6   :  { %v3160_v4 = vadd.f32 %v4197_v12, %v3064_v49  ;;  %v3154_v30 = vpop.f32.mrb[87].mxu1 }
 0x8d7   :  { %v4409_v25 = vpack.c.bf16 %v3487_v59, %v3486_v16  ;;  %v3155_v45 = vadd.f32 %v3154_v30, %v3059_v26 }
 0x8d8   :  { %v3489_v50 = vclamps-f32 %v3160_v4, 1.0 }
 0x8d9   :  { %v3488_v24 = vclamps-f32 %v3155_v45, 1.0  ;;  %4410 = vmatprep.subr.bf16.mxu0 %v4409_v25 }
 0x8da   :  { %4412 = vmatpush3.bf16.msra.mxu0 %v4409_v25 }
 0x8db   :  { %v4413_v35 = vpack.c.bf16 %v3489_v50, %v3488_v24 }
 0x8dd   :  { %4414 = vmatprep.subr.bf16.mxu0 %v4413_v35 }
 0x8de   :  { %4416 = vmatpush3.bf16.msra.mxu0 %v4413_v35 }
 0x8e1   :  { %4207 = vmatmul.mubr.msk.f32.vlgmr.msra.gmra.mrb[80].mxu0 %vm1111_vm1, %v3172_v63 }
 0x9b4   :  { %v4208_v44 = vpop.f32.mrb[80].mxu0 }
 0x9b5   :  { %v3263_v42 = vadd.f32 %v4208_v44, %v3183_v19  ;;  %v3257_v13 = vpop.f32.mrb[81].mxu0 }
 0x9b6   :  { %v3258_v57 = vadd.f32 %v3257_v13, %v3178_v18 }
 0x9b7   :  { %v3267_v53 = vadd.f32 %v3263_v42, %v3037_v10 }
 0x9b8   :  { %v3266_v27 = vadd.f32 %v3258_v57, %v3036_v3 }
 0x9b9   :  { %3269 = vst [vmem:[%s6215_s10 + $0x8] sm:$0xff] %v3267_v53 }
 0x9ba   :  { %3268 = vst [vmem:[%s6215_s10] sm:$0xff] %v3266_v27 }

</bundles_post_ra>
